<compile_context>
chip_gen: v5e
topology: v5e:2x2
jax: 0.10.0
libtpu: 0.0.40
codegen_flags: <defaults>
</compile_context>

<pallas_src>
import math

import jax
import jax.numpy as jnp
from jax.experimental import pallas as pl
from jax.experimental.pallas import tpu as pltpu

NEG_SLOPE = 0.01      # nn.LeakyReLU default negative_slope
_ROW_ALIGN = 128      # row-tile granularity (MXU friendly, (8,128) safe)
_VMEM_SOFT_DEFAULT = 16 * 1024 * 1024   # v5e scoped-VMEM default (smallest)


def _mlp_kernel(x_ref, w1_ref, b1_ref, w2_ref, b2_ref, o_ref):
    # x_ref:  (tm, D0) in x.dtype (f32); cast to the MXU dtype in-kernel.
    # w1_ref: (D0, D1)  w2_ref: (D1, D2) in compute dtype (bf16 or f32).
    # b1_ref: (1, D1)   b2_ref: (1, D2)  in f32.   o_ref: (tm, D2) in x.dtype.
    x = x_ref[...].astype(w1_ref.dtype)
    h = jnp.dot(x, w1_ref[...], preferred_element_type=jnp.float32)
    h = h + b1_ref[...]                       # bias add in f32
    h = jnp.maximum(h, NEG_SLOPE * h)         # LeakyReLU (slope < 1) in f32
    y = jnp.dot(h.astype(w2_ref.dtype), w2_ref[...],
                preferred_element_type=jnp.float32)
    o_ref[...] = (y + b2_ref[...]).astype(o_ref.dtype)


def _round_up(n, m):
    return ((n + m - 1) // m) * m


def prepare_params(w1, b1, w2, b2, *, compute_dtype=jnp.bfloat16):
    """One-time parameter preparation (cast + bias reshape), hoisted out of
    the per-call forward path.

    compute_dtype=bfloat16 is the fast MXU path (f32 accumulation, f32
    bias/activation epilogue).  Pass jnp.float32 for torch-equivalent math.
    """
    return (w1.astype(compute_dtype),
            b1.reshape(1, -1).astype(jnp.float32),
            w2.astype(compute_dtype),
            b2.reshape(1, -1).astype(jnp.float32))


def ssl_speaker_enc_forward(x, params, *, tm=1024):
    """Fused forward: leaky_relu(x @ w1 + b1) @ w2 + b2.

    x: (B, T, D0).  params: output of prepare_params().
    Returns (B, T, D2) in x.dtype.
    """
    w1c, b1_2d, w2c, b2_2d = params
    B, T, D0 = x.shape
    D1 = w1c.shape[1]
    D2 = w2c.shape[1]
    M = B * T

    # Row tile: as large as requested, but no bigger than the (aligned) row
    # count; kept a multiple of 128 so the (8,128) tiling constraint holds for
    # f32 and bf16 alike.
    tm_eff = max(_ROW_ALIGN,
                 min(_round_up(tm, _ROW_ALIGN), _round_up(M, _ROW_ALIGN)))
    # v7x has 2 TensorCores/chip: if there is enough work, make sure the
    # parallel grid has >= 2 steps so both cores get work.
    while tm_eff > _ROW_ALIGN and pl.cdiv(M, tm_eff) < 2:
        tm_eff = max(_ROW_ALIGN, _round_up(tm_eff // 2, _ROW_ALIGN))
    grid = pl.cdiv(M, tm_eff)                 # ragged final block is masked

    x2d = x.reshape(M, D0)                    # view-like reshape; no cast/pad

    x_item = jnp.dtype(x.dtype).itemsize
    w_item = jnp.dtype(w1c.dtype).itemsize
    cost = pl.CostEstimate(
        flops=2 * M * (D0 * D1 + D1 * D2),
        transcendentals=0,
        bytes_accessed=(M * D0 * x_item                    # x (read in x.dtype)
                        + (D0 * D1 + D1 * D2) * w_item     # weights
                        + (D1 + D2) * 4                    # biases (f32)
                        + M * D2 * x_item),                # out
    )

    # Double-buffered VMEM working set; raise the scoped limit only if a large
    # caller-requested tile would exceed the smallest (v5e) default.
    vmem_est = 2 * (tm_eff * D0 * x_item                   # x tile
                    + tm_eff * D2 * x_item                 # out tile
                    + (D0 * D1 + D1 * D2) * w_item         # weights
                    + (D1 + D2) * 4)                       # biases
    vmem_limit = None
    if vmem_est > _VMEM_SOFT_DEFAULT:
        vmem_limit = min(int(vmem_est * 1.5), 48 * 1024 * 1024)

    grid_spec = pltpu.PrefetchScalarGridSpec(
        num_scalar_prefetch=0,
        grid=(grid,),
        in_specs=[
            pl.BlockSpec((tm_eff, D0), lambda i: (i, 0)),  # x rows (streamed)
            pl.BlockSpec((D0, D1), lambda i: (0, 0)),      # W1 (resident)
            pl.BlockSpec((1, D1), lambda i: (0, 0)),       # b1 (resident)
            pl.BlockSpec((D1, D2), lambda i: (0, 0)),      # W2 (resident)
            pl.BlockSpec((1, D2), lambda i: (0, 0)),       # b2 (resident)
        ],
        out_specs=pl.BlockSpec((tm_eff, D2), lambda i: (i, 0)),
    )
    out = pl.pallas_call(
        _mlp_kernel,
        out_shape=jax.ShapeDtypeStruct((M, D2), x.dtype),
        grid_spec=grid_spec,
        compiler_params=pltpu.CompilerParams(
            dimension_semantics=("parallel",),
            vmem_limit_bytes=vmem_limit,
        ),
        cost_estimate=cost,
    )(x2d, w1c, b1_2d, w2c, b2_2d)

    return out.reshape(B, T, D2)


def _xavier_uniform(key, in_feats, out_feats, dtype=jnp.float32):
    # torch.nn.init.xavier_uniform_ on a (out, in) weight; stored as (in, out).
    bound = math.sqrt(6.0 / (in_feats + out_feats))
    return jax.random.uniform(key, (in_feats, out_feats), dtype=dtype,
                              minval=-bound, maxval=bound)


def _linear_bias(key, in_feats, out_feats, dtype=jnp.float32):
    # nn.Linear default bias init: U(-1/sqrt(in), 1/sqrt(in))
    bound = 1.0 / math.sqrt(in_feats)
    return jax.random.uniform(key, (out_feats,), dtype=dtype,
                              minval=-bound, maxval=bound)


def _reference(x, w1, b1, w2, b2, compute_dtype=jnp.float32):
    cd = compute_dtype
    h = jnp.dot(x.astype(cd), w1.astype(cd),
                preferred_element_type=jnp.float32) + b1
    h = jnp.where(h >= 0, h, NEG_SLOPE * h)
    y = jnp.dot(h.astype(cd), w2.astype(cd),
                preferred_element_type=jnp.float32) + b2
    return y


if __name__ == "__main__":
    lin_dims = [1024, 512, 256]   # SSL_speaker_enc defaults
    B, T = 2, 8                   # small batch / sequence for the smoke test

    key = jax.random.PRNGKey(0)
    kx, kw1, kb1, kw2, kb2 = jax.random.split(key, 5)

    x = jax.random.normal(kx, (B, T, lin_dims[0]), dtype=jnp.float32)
    w1 = _xavier_uniform(kw1, lin_dims[0], lin_dims[1])
    b1 = _linear_bias(kb1, lin_dims[0], lin_dims[1])
    w2 = _xavier_uniform(kw2, lin_dims[1], lin_dims[2])
    b2 = _linear_bias(kb2, lin_dims[1], lin_dims[2])

    ref_f32 = _reference(x, w1, b1, w2, b2, compute_dtype=jnp.float32)

    # Exact (f32) path: matches the PyTorch module's f32 math.
    params_f32 = prepare_params(w1, b1, w2, b2, compute_dtype=jnp.float32)
    y_f32 = jax.block_until_ready(ssl_speaker_enc_forward(x, params_f32))
    assert y_f32.shape == (B, T, lin_dims[2])
    assert jnp.allclose(y_f32, ref_f32, atol=1e-3, rtol=1e-3)

    # Fast (default) path: bf16 MXU operands, f32 accumulation / epilogue.
    params_bf16 = prepare_params(w1, b1, w2, b2)   # compute_dtype=bfloat16
    y_bf16 = jax.block_until_ready(ssl_speaker_enc_forward(x, params_bf16))
    ref_bf16 = _reference(x, w1, b1, w2, b2, compute_dtype=jnp.bfloat16)
    assert y_bf16.shape == (B, T, lin_dims[2])
    assert jnp.allclose(y_bf16, ref_bf16, atol=1e-2, rtol=1e-2)
    assert jnp.allclose(y_bf16, ref_f32, atol=5e-2, rtol=5e-2)

    print("KERNEL_OK")
</pallas_src>

<mosaic_0001>
module attributes {stable_mosaic.version = 11 : i64} {
  func.func @_mlp_kernel(%arg0: i32, %arg1: memref<128x1024xf32, #tpu.memory_space<vmem>>, %arg2: memref<1024x512xf32, #tpu.memory_space<vmem>>, %arg3: memref<1x512xf32, #tpu.memory_space<vmem>>, %arg4: memref<512x256xf32, #tpu.memory_space<vmem>>, %arg5: memref<1x256xf32, #tpu.memory_space<vmem>>, %arg6: memref<128x256xf32, #tpu.memory_space<vmem>>) attributes {dimension_semantics = [#tpu.dimension_semantics<parallel>], iteration_bounds = array<i64: 1>, scalar_prefetch = 0 : i64, scratch_operands = 0 : i64, tpu.core_type = #tpu.core_type<tc>, window_params = [{transform_indices = @transform_0, window_bounds = array<i64: 128, 1024>}, {pipeline_mode = #tpu.pipeline_mode<synchronous>, transform_indices = @transform_1, window_bounds = array<i64: 1024, 512>}, {pipeline_mode = #tpu.pipeline_mode<synchronous>, transform_indices = @transform_2, window_bounds = array<i64: 1, 512>}, {pipeline_mode = #tpu.pipeline_mode<synchronous>, transform_indices = @transform_3, window_bounds = array<i64: 512, 256>}, {pipeline_mode = #tpu.pipeline_mode<synchronous>, transform_indices = @transform_4, window_bounds = array<i64: 1, 256>}, {transform_indices = @transform_5, window_bounds = array<i64: 128, 256>}]} {
    %c0 = arith.constant 0 : index
    %c0_0 = arith.constant 0 : index
    %0 = vector.load %arg1[%c0, %c0_0] : memref<128x1024xf32, #tpu.memory_space<vmem>>, vector<128x1024xf32>
    %c0_1 = arith.constant 0 : index
    %c0_2 = arith.constant 0 : index
    %1 = vector.load %arg2[%c0_1, %c0_2] : memref<1024x512xf32, #tpu.memory_space<vmem>>, vector<1024x512xf32>
    %cst = arith.constant dense<0.000000e+00> : vector<128x512xf32>
    %2 = tpu.matmul %0, %1, %cst {dimension_numbers = #tpu.dot_dimension_numbers<[1], [0], [0], [1], [0, 0, 1, 1], [], []>} : vector<128x1024xf32>, vector<1024x512xf32>, vector<128x512xf32> -> vector<128x512xf32>
    %c0_3 = arith.constant 0 : index
    %c0_4 = arith.constant 0 : index
    %3 = vector.load %arg3[%c0_3, %c0_4] : memref<1x512xf32, #tpu.memory_space<vmem>>, vector<1x512xf32>
    %4 = vector.broadcast %3 : vector<1x512xf32> to vector<128x512xf32>
    %5 = arith.addf %2, %4 : vector<128x512xf32>
    %cst_5 = arith.constant 0.00999999977 : f32
    %6 = vector.broadcast %cst_5 : f32 to vector<128x512xf32>
    %7 = arith.mulf %6, %5 : vector<128x512xf32>
    %8 = arith.maximumf %5, %7 : vector<128x512xf32>
    %c0_6 = arith.constant 0 : index
    %c0_7 = arith.constant 0 : index
    %9 = vector.load %arg4[%c0_6, %c0_7] : memref<512x256xf32, #tpu.memory_space<vmem>>, vector<512x256xf32>
    %cst_8 = arith.constant dense<0.000000e+00> : vector<128x256xf32>
    %10 = tpu.matmul %8, %9, %cst_8 {dimension_numbers = #tpu.dot_dimension_numbers<[1], [0], [0], [1], [0, 0, 1, 1], [], []>} : vector<128x512xf32>, vector<512x256xf32>, vector<128x256xf32> -> vector<128x256xf32>
    %c0_9 = arith.constant 0 : index
    %c0_10 = arith.constant 0 : index
    %11 = vector.load %arg5[%c0_9, %c0_10] : memref<1x256xf32, #tpu.memory_space<vmem>>, vector<1x256xf32>
    %12 = vector.broadcast %11 : vector<1x256xf32> to vector<128x256xf32>
    %13 = arith.addf %10, %12 : vector<128x256xf32>
    %c0_11 = arith.constant 0 : index
    %c0_12 = arith.constant 0 : index
    %14 = vector.load %arg6[%c0_11, %c0_12] : memref<128x256xf32, #tpu.memory_space<vmem>>, vector<128x256xf32>
    tpu.vector_store %arg6[%c0_11, %c0_12], %13 {strides = array<i32>} : memref<128x256xf32, #tpu.memory_space<vmem>>, vector<128x256xf32>,
    return
  }
  func.func @transform_0(%arg0: i32) -> (i32, i32) {
    %c0_i32 = arith.constant 0 : i32
    %c0_i32_0 = arith.constant 0 : i32
    return %arg0, %c0_i32 : i32, i32
  }
  func.func @transform_1(%arg0: i32) -> (i32, i32) {
    %c0_i32 = arith.constant 0 : i32
    %c0_i32_0 = arith.constant 0 : i32
    %c0_i32_1 = arith.constant 0 : i32
    return %c0_i32, %c0_i32_0 : i32, i32
  }
  func.func @transform_2(%arg0: i32) -> (i32, i32) {
    %c0_i32 = arith.constant 0 : i32
    %c0_i32_0 = arith.constant 0 : i32
    %c0_i32_1 = arith.constant 0 : i32
    return %c0_i32, %c0_i32_0 : i32, i32
  }
  func.func @transform_3(%arg0: i32) -> (i32, i32) {
    %c0_i32 = arith.constant 0 : i32
    %c0_i32_0 = arith.constant 0 : i32
    %c0_i32_1 = arith.constant 0 : i32
    return %c0_i32, %c0_i32_0 : i32, i32
  }
  func.func @transform_4(%arg0: i32) -> (i32, i32) {
    %c0_i32 = arith.constant 0 : i32
    %c0_i32_0 = arith.constant 0 : i32
    %c0_i32_1 = arith.constant 0 : i32
    return %c0_i32, %c0_i32_0 : i32, i32
  }
  func.func @transform_5(%arg0: i32) -> (i32, i32) {
    %c0_i32 = arith.constant 0 : i32
    %c0_i32_0 = arith.constant 0 : i32
    return %arg0, %c0_i32 : i32, i32
  }
}

</mosaic_0001>

<bundles_post_ra>
// kernel: tpu_custom_call.1
= control target key start
LH: loop header
LB: loop body
LE: loop exit
PB: predicated region body
PF: predicated region fallthrough
CT: control target
= control target key end

     0   :  { %10 = vsyncpa [#allocation3], 0  ;;  %s5053_s0 = inlined_call_operand.hbm [shape: f32[16,1024], index: 0, kind: input, shape index: {}]   ;;  %s5054_s1 = inlined_call_operand.hbm [shape: f32[1024,512], index: 1, kind: input, shape index: {}]   ;;  %s5055_s2 = inlined_call_operand.hbm [shape: f32[1,512], index: 2, kind: input, shape index: {}]   ;;  %s5056_s3 = inlined_call_operand.hbm [shape: f32[512,256], index: 3, kind: input, shape index: {}]   ;;  %s5057_s4 = inlined_call_operand.hbm [shape: f32[1,256], index: 4, kind: input, shape index: {}]   ;;  %s5058_s5 = inlined_call_operand.hbm [shape: f32[16,256], index: 5, kind: output, shape index: {}]  }
   0x1   :  { %11 = vsyncpa [#allocation6], 0 }
   0x2   :  { %12 = vsyncpa [#allocation9], 0 }
   0x3   :  { %13 = vsyncpa [#allocation4], 0  ;;  %s31_s20 = sshll.u32 %s5054_s1, 4  ;;  %s32_s20 = int_to_ptr.hbm [resolvable:$true] %s31_s20 }
   0x4   :  { %17 = vsyncadd [#allocation3], 14336  ;;  %s4211_s21 = smov [#allocation5]   ;;  %s55_s25 = sshll.u32 %s5056_s3, 4  ;;  %s56_s25 = int_to_ptr.hbm [resolvable:$true] %s55_s25 }
   0x5   :  { %s33_s22 = sshll.u32 %s4211_s21, 4  ;;  %s4212_s26 = smov 512   ;;  %s34_s22 = int_to_ptr.vmem [resolvable:$true] %s33_s22 }
   0x6   :  { %s4213_s27 = smov 32   ;;  %s4214_s28 = smov [#allocation8]  }
   0x7   :  { %39 = dma.hbm_to_vmem [thread:$0]  %s32_s20, 65536, %s34_s22, [#allocation6], %s4212_s26, %s4212_s26, %s4213_s27  }
   0x8   :  { %s57_s29 = sshll.u32 %s4214_s28, 4  ;;  %s4215_s30 = smov 256   ;;  %s58_s29 = int_to_ptr.vmem [resolvable:$true] %s57_s29 }
   0x9   :  { %s4216_s6 = smov 16   ;;  %s18_s8 = sshll.u32 %s5053_s0, 4  ;;  %s19_s8 = int_to_ptr.hbm [resolvable:$true] %s18_s8 }
   0xa   :  { %63 = dma.hbm_to_vmem [thread:$0]  %s56_s25, 16384, %s58_s29, [#allocation9], %s4215_s30, %s4215_s30, %s4216_s6  }
   0xb   :  { %s4217_s9 = smov [#allocation2]   ;;  %s45_s12 = sshll.u32 %s5055_s2, 4  ;;  %s46_s12 = int_to_ptr.hbm [resolvable:$true] %s45_s12 }
   0xc   :  { %s20_s3 = sshll.u32 %s4217_s9, 4  ;;  %s4218_s13 = smov 1024   ;;  %s21_s3 = int_to_ptr.vmem [resolvable:$true] %s20_s3 }
   0xd   :  { %s4219_s14 = smov 64   ;;  %s4220_s15 = smov [#allocation7]  }
   0xe   :  { %26 = dma.hbm_to_vmem [thread:$0]  %s19_s8, 2048, %s21_s3, [#allocation3], %s4218_s13, %s4218_s13, %s4219_s14  }
   0xf   :  { %s47_s16 = sshll.u32 %s4220_s15, 4  ;;  %s69_s19 = sshll.u32 %s5057_s4, 4  ;;  %s48_s16 = int_to_ptr.vmem [resolvable:$true] %s47_s16  ;;  %s70_s19 = int_to_ptr.hbm [resolvable:$true] %s69_s19 }
  0x10   :  { %50 = dma.hbm_to_vmem [thread:$0]  %s46_s12, 64, %s48_s16, [#allocation6]  }
  0x11   :  { %s4221_s0 = smov [#allocation10]  }
  0x12   :  { %s71_s20 = sshll.u32 %s4221_s0, 4  ;;  %s72_s20 = int_to_ptr.vmem [resolvable:$true] %s71_s20 }
  0x13   :  { %74 = dma.hbm_to_vmem [thread:$0]  %s70_s19, 32, %s72_s20, [#allocation9]  }
  0x14   :  { %4203 = dma.done.wait [#allocation3], 16384  }
  0x15   :  { %4204 = vsyncadd [#allocation3], 4294950912 }
  0x16   :  { %4205 = dma.done.wait [#allocation6], 65600  }
  0x17   :  { %4206 = vsyncadd [#allocation6], 4294901696 }
  0x18   :  { %4207 = dma.done.wait [#allocation9], 16416  }
  0x19   :  { %4208 = vsyncadd [#allocation9], 4294950880  ;;  %v283_v0 = vld [vmem:[#allocation5 + $0x1e0] sm:$0xff] }
  0x1a   :  { %v347_v1 = vld [vmem:[#allocation5 + $0x3e0] sm:$0xff]  ;;  %745 = vmatpush.msra.mxu0 %v283_v0  ;;  %v96_v0 = vld [vmem:[#allocation2 + $0x8] sm:$0xff] }
  0x1b   :  { %v411_v2 = vld [vmem:[#allocation5 + $0x5e0] sm:$0xff]  ;;  %810 = vmatpush.msra.mxu1 %v347_v1  ;;  %v97_v1 = vld [vmem:[#allocation2 + $0x10] sm:$0xff] }
  0x1c   :  { %v279_v3 = vld [vmem:[#allocation5 + $0x1c0] sm:$0xff]  ;;  %875 = vmatpush.msra.mxu2 %v411_v2 }
  0x1d   :  { %v343_v4 = vld [vmem:[#allocation5 + $0x3c0] sm:$0xff]  ;;  %746 = vmatpush.msra.mxu0 %v279_v3 }
  0x1e   :  { %v407_v5 = vld [vmem:[#allocation5 + $0x5c0] sm:$0xff]  ;;  %811 = vmatpush.msra.mxu1 %v343_v4  ;;  %v98_v4 = vld [vmem:[#allocation2 + $0x18] sm:$0xff] }
  0x1f   :  { %v475_v6 = vld [vmem:[#allocation5 + $0x7e0] sm:$0xff]  ;;  %876 = vmatpush.msra.mxu2 %v407_v5 }
  0x20   :  { %v275_v7 = vld [vmem:[#allocation5 + $0x1a0] sm:$0xff]  ;;  %940 = vmatpush.msra.mxu3 %v475_v6 }
  0x21   :  { %v339_v8 = vld [vmem:[#allocation5 + $0x3a0] sm:$0xff]  ;;  %747 = vmatpush.msra.mxu0 %v275_v7 }
  0x22   :  { %v403_v9 = vld [vmem:[#allocation5 + $0x5a0] sm:$0xff]  ;;  %812 = vmatpush.msra.mxu1 %v339_v8 }
  0x23   :  { %v471_v10 = vld [vmem:[#allocation5 + $0x7c0] sm:$0xff]  ;;  %877 = vmatpush.msra.mxu2 %v403_v9 }
  0x24   :  { %v271_v11 = vld [vmem:[#allocation5 + $0x180] sm:$0xff]  ;;  %941 = vmatpush.msra.mxu3 %v471_v10 }
  0x25   :  { %v335_v12 = vld [vmem:[#allocation5 + $0x380] sm:$0xff]  ;;  %748 = vmatpush.msra.mxu0 %v271_v11 }
  0x26   :  { %v399_v13 = vld [vmem:[#allocation5 + $0x580] sm:$0xff]  ;;  %813 = vmatpush.msra.mxu1 %v335_v12 }
  0x27   :  { %v467_v14 = vld [vmem:[#allocation5 + $0x7a0] sm:$0xff]  ;;  %878 = vmatpush.msra.mxu2 %v399_v13 }
  0x28   :  { %v267_v15 = vld [vmem:[#allocation5 + $0x160] sm:$0xff]  ;;  %942 = vmatpush.msra.mxu3 %v467_v14 }
  0x29   :  { %v331_v16 = vld [vmem:[#allocation5 + $0x360] sm:$0xff]  ;;  %749 = vmatpush.msra.mxu0 %v267_v15 }
  0x2a   :  { %v395_v17 = vld [vmem:[#allocation5 + $0x560] sm:$0xff]  ;;  %814 = vmatpush.msra.mxu1 %v331_v16  ;;  %v104_v16 = vld [vmem:[#allocation2 + $0x48] sm:$0xff] }
  0x2b   :  { %v463_v18 = vld [vmem:[#allocation5 + $0x780] sm:$0xff]  ;;  %879 = vmatpush.msra.mxu2 %v395_v17  ;;  %v105_v17 = vld [vmem:[#allocation2 + $0x50] sm:$0xff] }
  0x2c   :  { %v263_v19 = vld [vmem:[#allocation5 + $0x140] sm:$0xff]  ;;  %943 = vmatpush.msra.mxu3 %v463_v18 }
  0x2d   :  { %v327_v20 = vld [vmem:[#allocation5 + $0x340] sm:$0xff]  ;;  %750 = vmatpush.msra.mxu0 %v263_v19  ;;  %v106_v19 = vld [vmem:[#allocation2 + $0x58] sm:$0xff] }
  0x2e   :  { %v391_v21 = vld [vmem:[#allocation5 + $0x540] sm:$0xff]  ;;  %815 = vmatpush.msra.mxu1 %v327_v20 }
  0x2f   :  { %v459_v22 = vld [vmem:[#allocation5 + $0x760] sm:$0xff]  ;;  %880 = vmatpush.msra.mxu2 %v391_v21 }
  0x30   :  { %v259_v23 = vld [vmem:[#allocation5 + $0x120] sm:$0xff]  ;;  %944 = vmatpush.msra.mxu3 %v459_v22 }
  0x31   :  { %v323_v24 = vld [vmem:[#allocation5 + $0x320] sm:$0xff]  ;;  %751 = vmatpush.msra.mxu0 %v259_v23 }
  0x32   :  { %v387_v25 = vld [vmem:[#allocation5 + $0x520] sm:$0xff]  ;;  %816 = vmatpush.msra.mxu1 %v323_v24 }
  0x33   :  { %v455_v26 = vld [vmem:[#allocation5 + $0x740] sm:$0xff]  ;;  %881 = vmatpush.msra.mxu2 %v387_v25 }
  0x34   :  { %v255_v27 = vld [vmem:[#allocation5 + $0x100] sm:$0xff]  ;;  %945 = vmatpush.msra.mxu3 %v455_v26 }
  0x35   :  { %v319_v28 = vld [vmem:[#allocation5 + $0x300] sm:$0xff]  ;;  %752 = vmatpush.msra.mxu0 %v255_v27 }
  0x36   :  { %v383_v29 = vld [vmem:[#allocation5 + $0x500] sm:$0xff]  ;;  %817 = vmatpush.msra.mxu1 %v319_v28 }
  0x37   :  { %v451_v30 = vld [vmem:[#allocation5 + $0x720] sm:$0xff]  ;;  %882 = vmatpush.msra.mxu2 %v383_v29 }
  0x38   :  { %v251_v31 = vld [vmem:[#allocation5 + $0xe0] sm:$0xff]  ;;  %946 = vmatpush.msra.mxu3 %v451_v30 }
  0x39   :  { %v315_v32 = vld [vmem:[#allocation5 + $0x2e0] sm:$0xff]  ;;  %753 = vmatpush.msra.mxu0 %v251_v31 }
  0x3a   :  { %v379_v33 = vld [vmem:[#allocation5 + $0x4e0] sm:$0xff]  ;;  %818 = vmatpush.msra.mxu1 %v315_v32  ;;  %v112_v32 = vld [vmem:[#allocation2 + $0x88] sm:$0xff] }
  0x3b   :  { %v447_v34 = vld [vmem:[#allocation5 + $0x700] sm:$0xff]  ;;  %883 = vmatpush.msra.mxu2 %v379_v33  ;;  %v113_v33 = vld [vmem:[#allocation2 + $0x90] sm:$0xff] }
  0x3c   :  { %v247_v35 = vld [vmem:[#allocation5 + $0xc0] sm:$0xff]  ;;  %947 = vmatpush.msra.mxu3 %v447_v34 }
  0x3d   :  { %v311_v36 = vld [vmem:[#allocation5 + $0x2c0] sm:$0xff]  ;;  %754 = vmatpush.msra.mxu0 %v247_v35  ;;  %v114_v35 = vld [vmem:[#allocation2 + $0x98] sm:$0xff] }
  0x3e   :  { %v375_v37 = vld [vmem:[#allocation5 + $0x4c0] sm:$0xff]  ;;  %819 = vmatpush.msra.mxu1 %v311_v36 }
  0x3f   :  { %v443_v38 = vld [vmem:[#allocation5 + $0x6e0] sm:$0xff]  ;;  %884 = vmatpush.msra.mxu2 %v375_v37 }
  0x40   :  { %v243_v39 = vld [vmem:[#allocation5 + $0xa0] sm:$0xff]  ;;  %948 = vmatpush.msra.mxu3 %v443_v38 }
  0x41   :  { %v307_v40 = vld [vmem:[#allocation5 + $0x2a0] sm:$0xff]  ;;  %755 = vmatpush.msra.mxu0 %v243_v39 }
  0x42   :  { %v371_v41 = vld [vmem:[#allocation5 + $0x4a0] sm:$0xff]  ;;  %820 = vmatpush.msra.mxu1 %v307_v40 }
  0x43   :  { %v439_v42 = vld [vmem:[#allocation5 + $0x6c0] sm:$0xff]  ;;  %885 = vmatpush.msra.mxu2 %v371_v41  ;;  %v120_v41 = vld [vmem:[#allocation2 + $0xc8] sm:$0xff] }
  0x44   :  { %v239_v43 = vld [vmem:[#allocation5 + $0x80] sm:$0xff]  ;;  %949 = vmatpush.msra.mxu3 %v439_v42  ;;  %v121_v42 = vld [vmem:[#allocation2 + $0xd0] sm:$0xff] }
  0x45   :  { %v303_v44 = vld [vmem:[#allocation5 + $0x280] sm:$0xff]  ;;  %756 = vmatpush.msra.mxu0 %v239_v43  ;;  %v122_v43 = vld [vmem:[#allocation2 + $0xd8] sm:$0xff] }
  0x46   :  { %v367_v45 = vld [vmem:[#allocation5 + $0x480] sm:$0xff]  ;;  %821 = vmatpush.msra.mxu1 %v303_v44 }
  0x47   :  { %v435_v46 = vld [vmem:[#allocation5 + $0x6a0] sm:$0xff]  ;;  %886 = vmatpush.msra.mxu2 %v367_v45 }
  0x48   :  { %v235_v47 = vld [vmem:[#allocation5 + $0x60] sm:$0xff]  ;;  %950 = vmatpush.msra.mxu3 %v435_v46 }
  0x49   :  { %v299_v48 = vld [vmem:[#allocation5 + $0x260] sm:$0xff]  ;;  %757 = vmatpush.msra.mxu0 %v235_v47 }
  0x4a   :  { %v363_v49 = vld [vmem:[#allocation5 + $0x460] sm:$0xff]  ;;  %822 = vmatpush.msra.mxu1 %v299_v48 }
  0x4b   :  { %v431_v50 = vld [vmem:[#allocation5 + $0x680] sm:$0xff]  ;;  %887 = vmatpush.msra.mxu2 %v363_v49  ;;  %v128_v49 = vld [vmem:[#allocation2 + $0x108] sm:$0xff] }
  0x4c   :  { %v231_v51 = vld [vmem:[#allocation5 + $0x40] sm:$0xff]  ;;  %951 = vmatpush.msra.mxu3 %v431_v50  ;;  %v129_v50 = vld [vmem:[#allocation2 + $0x110] sm:$0xff] }
  0x4d   :  { %v295_v52 = vld [vmem:[#allocation5 + $0x240] sm:$0xff]  ;;  %758 = vmatpush.msra.mxu0 %v231_v51  ;;  %v130_v51 = vld [vmem:[#allocation2 + $0x118] sm:$0xff] }
  0x4e   :  { %v359_v53 = vld [vmem:[#allocation5 + $0x440] sm:$0xff]  ;;  %823 = vmatpush.msra.mxu1 %v295_v52 }
  0x4f   :  { %v427_v54 = vld [vmem:[#allocation5 + $0x660] sm:$0xff]  ;;  %888 = vmatpush.msra.mxu2 %v359_v53 }
  0x50   :  { %v227_v55 = vld [vmem:[#allocation5 + $0x20] sm:$0xff]  ;;  %952 = vmatpush.msra.mxu3 %v427_v54 }
  0x51   :  { %v291_v56 = vld [vmem:[#allocation5 + $0x220] sm:$0xff]  ;;  %759 = vmatpush.msra.mxu0 %v227_v55 }
  0x52   :  { %v355_v57 = vld [vmem:[#allocation5 + $0x420] sm:$0xff]  ;;  %824 = vmatpush.msra.mxu1 %v291_v56 }
  0x53   :  { %v423_v58 = vld [vmem:[#allocation5 + $0x640] sm:$0xff]  ;;  %889 = vmatpush.msra.mxu2 %v355_v57  ;;  %v136_v57 = vld [vmem:[#allocation2 + $0x148] sm:$0xff] }
  0x54   :  { %v223_v59 = vld [vmem:[#allocation5] sm:$0xff]  ;;  %953 = vmatpush.msra.mxu3 %v423_v58  ;;  %v137_v58 = vld [vmem:[#allocation2 + $0x150] sm:$0xff] }
  0x55   :  { %v287_v60 = vld [vmem:[#allocation5 + $0x200] sm:$0xff]  ;;  %760 = vmatpush.msra.mxu0 %v223_v59  ;;  %v138_v59 = vld [vmem:[#allocation2 + $0x158] sm:$0xff] }
  0x56   :  { %v351_v61 = vld [vmem:[#allocation5 + $0x400] sm:$0xff]  ;;  %825 = vmatpush.msra.mxu1 %v287_v60 }
  0x57   :  { %v419_v62 = vld [vmem:[#allocation5 + $0x620] sm:$0xff]  ;;  %890 = vmatpush.msra.mxu2 %v351_v61  ;;  %826 = vmatmul.f32.vlgmr.msra.gmra.mxu1 %v96_v0 }
  0x58   :  { %v95_v63 = vld [vmem:[#allocation2] sm:$0xff]  ;;  %954 = vmatpush.msra.mxu3 %v419_v62  ;;  %891 = vmatmul.f32.vlgmr.msra.gmra.mxu2 %v97_v1  ;;  %v144_v1 = vld [vmem:[#allocation2 + $0x188] sm:$0xff] }
  0x59   :  { %v415_v2 = vld [vmem:[#allocation5 + $0x600] sm:$0xff]  ;;  %761 = vmatmul.f32.vlgmr.msra.gmra.mxu0 %v95_v63 }
  0x5a   :  { %v667_v3 = vld [vmem:[#allocation5 + $0xde0] sm:$0xff]  ;;  %955 = vmatpush.msra.mxu3 %v415_v2  ;;  %v145_v2 = vld [vmem:[#allocation2 + $0x190] sm:$0xff] }
  0x5b   :  { %v539_v5 = vld [vmem:[#allocation5 + $0x9e0] sm:$0xff]  ;;  %1135 = vmatpush.msrb.mxu2 %v667_v3  ;;  %956 = vmatmul.f32.vlgmr.msra.gmra.mxu3 %v98_v4  ;;  %v146_v3 = vld [vmem:[#allocation2 + $0x198] sm:$0xff] }
  0x5c   :  { %v731_v6 = vld [vmem:[#allocation5 + $0xfe0] sm:$0xff]  ;;  %1005 = vmatpush.msrb.mxu0 %v539_v5 }
  0x5d   :  { %v603_v7 = vld [vmem:[#allocation5 + $0xbe0] sm:$0xff]  ;;  %1200 = vmatpush.msrb.mxu3 %v731_v6 }
  0x5e   :  { %v663_v8 = vld [vmem:[#allocation5 + $0xdc0] sm:$0xff]  ;;  %1070 = vmatpush.msrb.mxu1 %v603_v7 }
  0x5f   :  { %v535_v9 = vld [vmem:[#allocation5 + $0x9c0] sm:$0xff]  ;;  %1136 = vmatpush.msrb.mxu2 %v663_v8  ;;  %829 = vmatmul.f32.gmra.mxu1 %v104_v16 }
  0x60   :  { %v727_v10 = vld [vmem:[#allocation5 + $0xfc0] sm:$0xff]  ;;  %1006 = vmatpush.msrb.mxu0 %v535_v9  ;;  %894 = vmatmul.f32.gmra.mxu2 %v105_v17  ;;  %v152_v9 = vld [vmem:[#allocation2 + $0x1c8] sm:$0xff] }
  0x61   :  { %v599_v11 = vld [vmem:[#allocation5 + $0xbc0] sm:$0xff]  ;;  %1201 = vmatpush.msrb.mxu3 %v727_v10  ;;  %v153_v10 = vld [vmem:[#allocation2 + $0x1d0] sm:$0xff]  ;;  %v160_v17 = vld [vmem:[#allocation2 + $0x208] sm:$0xff] }
  0x62   :  { %v659_v12 = vld [vmem:[#allocation5 + $0xda0] sm:$0xff]  ;;  %1071 = vmatpush.msrb.mxu1 %v599_v11  ;;  %v154_v11 = vld [vmem:[#allocation2 + $0x1d8] sm:$0xff] }
  0x63   :  { %v531_v13 = vld [vmem:[#allocation5 + $0x9a0] sm:$0xff]  ;;  %1137 = vmatpush.msrb.mxu2 %v659_v12  ;;  %959 = vmatmul.f32.gmra.mxu3 %v106_v19  ;;  %v162_v19 = vld [vmem:[#allocation2 + $0x218] sm:$0xff] }
  0x64   :  { %v723_v14 = vld [vmem:[#allocation5 + $0xfa0] sm:$0xff]  ;;  %1007 = vmatpush.msrb.mxu0 %v531_v13 }
  0x65   :  { %v103_v15 = vld [vmem:[#allocation2 + $0x40] sm:$0xff]  ;;  %1202 = vmatpush.msrb.mxu3 %v723_v14 }
  0x66   :  { %v595_v18 = vld [vmem:[#allocation5 + $0xba0] sm:$0xff]  ;;  %764 = vmatmul.f32.gmra.mxu0 %v103_v15 }
  0x67   :  { %v655_v20 = vld [vmem:[#allocation5 + $0xd80] sm:$0xff]  ;;  %1072 = vmatpush.msrb.mxu1 %v595_v18  ;;  %v161_v18 = vld [vmem:[#allocation2 + $0x210] sm:$0xff] }
  0x68   :  { %v527_v21 = vld [vmem:[#allocation5 + $0x980] sm:$0xff]  ;;  %1138 = vmatpush.msrb.mxu2 %v655_v20  ;;  %832 = vmatmul.f32.gmra.mxu1 %v112_v32 }
  0x69   :  { %v719_v22 = vld [vmem:[#allocation5 + $0xf80] sm:$0xff]  ;;  %1008 = vmatpush.msrb.mxu0 %v527_v21  ;;  %897 = vmatmul.f32.gmra.mxu2 %v113_v33  ;;  %v176_v33 = vld [vmem:[#allocation2 + $0x288] sm:$0xff] }
  0x6a   :  { %v591_v23 = vld [vmem:[#allocation5 + $0xb80] sm:$0xff]  ;;  %1203 = vmatpush.msrb.mxu3 %v719_v22 }
  0x6b   :  { %v651_v24 = vld [vmem:[#allocation5 + $0xd60] sm:$0xff]  ;;  %1073 = vmatpush.msrb.mxu1 %v591_v23  ;;  %962 = vmatmul.f32.gmra.mxu3 %v114_v35  ;;  %v178_v35 = vld [vmem:[#allocation2 + $0x298] sm:$0xff] }
  0x6c   :  { %v523_v25 = vld [vmem:[#allocation5 + $0x960] sm:$0xff]  ;;  %1139 = vmatpush.msrb.mxu2 %v651_v24 }
  0x6d   :  { %v715_v26 = vld [vmem:[#allocation5 + $0xf60] sm:$0xff]  ;;  %1009 = vmatpush.msrb.mxu0 %v523_v25  ;;  %v168_v25 = vld [vmem:[#allocation2 + $0x248] sm:$0xff] }
  0x6e   :  { %v587_v27 = vld [vmem:[#allocation5 + $0xb60] sm:$0xff]  ;;  %1204 = vmatpush.msrb.mxu3 %v715_v26  ;;  %v169_v26 = vld [vmem:[#allocation2 + $0x250] sm:$0xff] }
  0x6f   :  { %v647_v28 = vld [vmem:[#allocation5 + $0xd40] sm:$0xff]  ;;  %1074 = vmatpush.msrb.mxu1 %v587_v27  ;;  %v170_v27 = vld [vmem:[#allocation2 + $0x258] sm:$0xff] }
  0x70   :  { %v519_v29 = vld [vmem:[#allocation5 + $0x940] sm:$0xff]  ;;  %1140 = vmatpush.msrb.mxu2 %v647_v28  ;;  %835 = vmatmul.f32.gmra.mxu1 %v120_v41  ;;  %v184_v41 = vld [vmem:[#allocation2 + $0x2c8] sm:$0xff] }
  0x71   :  { %v711_v30 = vld [vmem:[#allocation5 + $0xf40] sm:$0xff]  ;;  %1010 = vmatpush.msrb.mxu0 %v519_v29  ;;  %900 = vmatmul.f32.gmra.mxu2 %v121_v42  ;;  %v185_v42 = vld [vmem:[#allocation2 + $0x2d0] sm:$0xff] }
  0x72   :  { %v111_v31 = vld [vmem:[#allocation2 + $0x80] sm:$0xff]  ;;  %1205 = vmatpush.msrb.mxu3 %v711_v30 }
  0x73   :  { %v583_v34 = vld [vmem:[#allocation5 + $0xb40] sm:$0xff]  ;;  %767 = vmatmul.f32.gmra.mxu0 %v111_v31  ;;  %965 = vmatmul.f32.gmra.mxu3 %v122_v43  ;;  %v186_v43 = vld [vmem:[#allocation2 + $0x2d8] sm:$0xff] }
  0x74   :  { %1075 = vmatpush.msrb.mxu1 %v583_v34  ;;  %v643_v36 = vld [vmem:[#allocation5 + $0xd20] sm:$0xff]  ;;  %v177_v34 = vld [vmem:[#allocation2 + $0x290] sm:$0xff] }
  0x75   :  { %1141 = vmatpush.msrb.mxu2 %v643_v36  ;;  %v515_v37 = vld [vmem:[#allocation5 + $0x920] sm:$0xff] }
  0x76   :  { %v707_v38 = vld [vmem:[#allocation5 + $0xf20] sm:$0xff]  ;;  %1011 = vmatpush.msrb.mxu0 %v515_v37 }
  0x77   :  { %v579_v39 = vld [vmem:[#allocation5 + $0xb20] sm:$0xff]  ;;  %1206 = vmatpush.msrb.mxu3 %v707_v38 }
  0x78   :  { %1076 = vmatpush.msrb.mxu1 %v579_v39  ;;  %v119_v40 = vld [vmem:[#allocation2 + $0xc0] sm:$0xff] }
  0x79   :  { %v639_v44 = vld [vmem:[#allocation5 + $0xd00] sm:$0xff]  ;;  %838 = vmatmul.f32.gmra.mxu1 %v128_v49  ;;  %903 = vmatmul.f32.gmra.mxu2 %v129_v50  ;;  %v192_v49 = vld [vmem:[#allocation2 + $0x308] sm:$0xff]  ;;  %v193_v50 = vld [vmem:[#allocation2 + $0x310] sm:$0xff] }
  0x7a   :  { %1142 = vmatpush.msrb.mxu2 %v639_v44  ;;  %v511_v45 = vld [vmem:[#allocation5 + $0x900] sm:$0xff] }
  0x7b   :  { %770 = vmatmul.f32.gmra.mxu0 %v119_v40  ;;  %v703_v46 = vld [vmem:[#allocation5 + $0xf00] sm:$0xff]  ;;  %968 = vmatmul.f32.gmra.mxu3 %v130_v51  ;;  %v194_v51 = vld [vmem:[#allocation2 + $0x318] sm:$0xff] }
  0x7c   :  { %v575_v47 = vld [vmem:[#allocation5 + $0xb00] sm:$0xff]  ;;  %1012 = vmatpush.msrb.mxu0 %v511_v45  ;;  %1207 = vmatpush.msrb.mxu3 %v703_v46 }
  0x7d   :  { %1077 = vmatpush.msrb.mxu1 %v575_v47  ;;  %v127_v48 = vld [vmem:[#allocation2 + $0x100] sm:$0xff] }
  0x7e   :  { %v635_v52 = vld [vmem:[#allocation5 + $0xce0] sm:$0xff] }
  0x7f   :  { %1143 = vmatpush.msrb.mxu2 %v635_v52  ;;  %v507_v53 = vld [vmem:[#allocation5 + $0x8e0] sm:$0xff]  ;;  %v412_v52 = vld [vmem:[#allocation5 + $0x5e8] sm:$0xff] }
  0x80   :  { %v699_v54 = vld [vmem:[#allocation5 + $0xee0] sm:$0xff]  ;;  %1013 = vmatpush.msrb.mxu0 %v507_v53  ;;  %v284_v53 = vld [vmem:[#allocation5 + $0x1e8] sm:$0xff] }
  0x81   :  { %v571_v55 = vld [vmem:[#allocation5 + $0xae0] sm:$0xff]  ;;  %1208 = vmatpush.msrb.mxu3 %v699_v54  ;;  %841 = vmatmul.f32.gmra.mxu1 %v136_v57  ;;  %v476_v54 = vld [vmem:[#allocation5 + $0x7e8] sm:$0xff] }
  0x82   :  { %1078 = vmatpush.msrb.mxu1 %v571_v55  ;;  %v135_v56 = vld [vmem:[#allocation2 + $0x140] sm:$0xff]  ;;  %906 = vmatmul.f32.gmra.mxu2 %v137_v58  ;;  %v348_v57 = vld [vmem:[#allocation5 + $0x3e8] sm:$0xff]  ;;  %v201_v58 = vld [vmem:[#allocation2 + $0x350] sm:$0xff] }
  0x83   :  { %773 = vmatmul.f32.gmra.mxu0 %v127_v48  ;;  %v631_v60 = vld [vmem:[#allocation5 + $0xcc0] sm:$0xff]  ;;  %971 = vmatmul.f32.gmra.mxu3 %v138_v59  ;;  %v202_v59 = vld [vmem:[#allocation2 + $0x358] sm:$0xff] }
  0x84   :  { %1144 = vmatpush.msrb.mxu2 %v631_v60  ;;  %v503_v61 = vld [vmem:[#allocation5 + $0x8c0] sm:$0xff]  ;;  %v408_v60 = vld [vmem:[#allocation5 + $0x5c8] sm:$0xff] }
  0x85   :  { %v695_v62 = vld [vmem:[#allocation5 + $0xec0] sm:$0xff]  ;;  %1014 = vmatpush.msrb.mxu0 %v503_v61  ;;  %v280_v61 = vld [vmem:[#allocation5 + $0x1c8] sm:$0xff] }
  0x86   :  { %v567_v63 = vld [vmem:[#allocation5 + $0xac0] sm:$0xff]  ;;  %1209 = vmatpush.msrb.mxu3 %v695_v62  ;;  %v472_v62 = vld [vmem:[#allocation5 + $0x7c8] sm:$0xff] }
  0x87   :  { %1079 = vmatpush.msrb.mxu1 %v567_v63  ;;  %v143_v0 = vld [vmem:[#allocation2 + $0x180] sm:$0xff] }
  0x88   :  { %v627_v4 = vld [vmem:[#allocation5 + $0xca0] sm:$0xff] }
  0x89   :  { %844 = vmatmul.f32.gmra.mxu1 %v144_v1  ;;  %1145 = vmatpush.msrb.mxu2 %v627_v4  ;;  %v499_v5 = vld [vmem:[#allocation5 + $0x8a0] sm:$0xff]  ;;  %v344_v1 = vld [vmem:[#allocation5 + $0x3c8] sm:$0xff] }
  0x8a   :  { %909 = vmatmul.f32.gmra.mxu2 %v145_v2  ;;  %v691_v6 = vld [vmem:[#allocation5 + $0xea0] sm:$0xff]  ;;  %1015 = vmatpush.msrb.mxu0 %v499_v5  ;;  %v209_v2 = vld [vmem:[#allocation2 + $0x390] sm:$0xff]  ;;  %v404_v4 = vld [vmem:[#allocation5 + $0x5a8] sm:$0xff] }
  0x8b   :  { %776 = vmatmul.f32.gmra.mxu0 %v135_v56  ;;  %974 = vmatmul.f32.gmra.mxu3 %v146_v3  ;;  %v563_v7 = vld [vmem:[#allocation5 + $0xaa0] sm:$0xff]  ;;  %v200_v56 = vld [vmem:[#allocation2 + $0x348] sm:$0xff]  ;;  %v210_v3 = vld [vmem:[#allocation2 + $0x398] sm:$0xff] }
  0x8c   :  { %1210 = vmatpush.msrb.mxu3 %v691_v6  ;;  %1080 = vmatpush.msrb.mxu1 %v563_v7  ;;  %v151_v8 = vld [vmem:[#allocation2 + $0x1c0] sm:$0xff]  ;;  %v276_v5 = vld [vmem:[#allocation5 + $0x1a8] sm:$0xff] }
  0x8d   :  { %v623_v12 = vld [vmem:[#allocation5 + $0xc80] sm:$0xff]  ;;  %v468_v6 = vld [vmem:[#allocation5 + $0x7a8] sm:$0xff] }
  0x8e   :  { %1146 = vmatpush.msrb.mxu2 %v623_v12  ;;  %v495_v13 = vld [vmem:[#allocation5 + $0x880] sm:$0xff] }
  0x8f   :  { %v687_v14 = vld [vmem:[#allocation5 + $0xe80] sm:$0xff]  ;;  %1016 = vmatpush.msrb.mxu0 %v495_v13  ;;  %v400_v13 = vld [vmem:[#allocation5 + $0x588] sm:$0xff] }
  0x90   :  { %v559_v15 = vld [vmem:[#allocation5 + $0xa80] sm:$0xff]  ;;  %1211 = vmatpush.msrb.mxu3 %v687_v14 }
  0x91   :  { %847 = vmatmul.f32.gmra.mxu1 %v152_v9  ;;  %v159_v16 = vld [vmem:[#allocation2 + $0x200] sm:$0xff]  ;;  %v340_v9 = vld [vmem:[#allocation5 + $0x3a8] sm:$0xff] }
  0x92   :  { %912 = vmatmul.f32.gmra.mxu2 %v153_v10  ;;  %1081 = vmatpush.msrb.mxu1 %v559_v15  ;;  %v619_v20 = vld [vmem:[#allocation5 + $0xc60] sm:$0xff]  ;;  %v217_v10 = vld [vmem:[#allocation2 + $0x3d0] sm:$0xff]  ;;  %v272_v15 = vld [vmem:[#allocation5 + $0x188] sm:$0xff] }
  0x93   :  { %779 = vmatmul.f32.gmra.mxu0 %v143_v0  ;;  %977 = vmatmul.f32.gmra.mxu3 %v154_v11  ;;  %v491_v21 = vld [vmem:[#allocation5 + $0x860] sm:$0xff]  ;;  %v208_v0 = vld [vmem:[#allocation2 + $0x388] sm:$0xff]  ;;  %v218_v11 = vld [vmem:[#allocation2 + $0x3d8] sm:$0xff] }
  0x94   :  { %1147 = vmatpush.msrb.mxu2 %v619_v20  ;;  %v683_v22 = vld [vmem:[#allocation5 + $0xe60] sm:$0xff]  ;;  %1017 = vmatpush.msrb.mxu0 %v491_v21  ;;  %v100_v20 = vld [vmem:[#allocation2 + $0x28] sm:$0xff] }
  0x95   :  { %v555_v23 = vld [vmem:[#allocation5 + $0xa60] sm:$0xff]  ;;  %1212 = vmatpush.msrb.mxu3 %v683_v22  ;;  %v336_v21 = vld [vmem:[#allocation5 + $0x388] sm:$0xff] }
  0x96   :  { %1082 = vmatpush.msrb.mxu1 %v555_v23  ;;  %v167_v24 = vld [vmem:[#allocation2 + $0x240] sm:$0xff]  ;;  %v101_v23 = vld [vmem:[#allocation2 + $0x30] sm:$0xff] }
  0x97   :  { %v615_v28 = vld [vmem:[#allocation5 + $0xc40] sm:$0xff] }
  0x98   :  { %1148 = vmatpush.msrb.mxu2 %v615_v28  ;;  %v487_v29 = vld [vmem:[#allocation5 + $0x840] sm:$0xff]  ;;  %v460_v28 = vld [vmem:[#allocation5 + $0x768] sm:$0xff] }
  0x99   :  { %850 = vmatmul.f32.gmra.mxu1 %v160_v17  ;;  %v679_v30 = vld [vmem:[#allocation5 + $0xe40] sm:$0xff]  ;;  %1018 = vmatpush.msrb.mxu0 %v487_v29 }
  0x9a   :  { %915 = vmatmul.f32.gmra.mxu2 %v161_v18  ;;  %v551_v31 = vld [vmem:[#allocation5 + $0xa40] sm:$0xff]  ;;  %1213 = vmatpush.msrb.mxu3 %v679_v30 }
  0x9b   :  { %782 = vmatmul.f32.gmra.mxu0 %v151_v8  ;;  %980 = vmatmul.f32.gmra.mxu3 %v162_v19  ;;  %v175_v32 = vld [vmem:[#allocation2 + $0x280] sm:$0xff]  ;;  %v216_v8 = vld [vmem:[#allocation2 + $0x3c8] sm:$0xff] }
  0x9c   :  { %1083 = vmatpush.msrb.mxu1 %v551_v31  ;;  %v611_v36 = vld [vmem:[#allocation5 + $0xc20] sm:$0xff] }
  0x9d   :  { %1149 = vmatpush.msrb.mxu2 %v611_v36  ;;  %v483_v37 = vld [vmem:[#allocation5 + $0x820] sm:$0xff] }
  0x9e   :  { %v675_v38 = vld [vmem:[#allocation5 + $0xe20] sm:$0xff]  ;;  %1019 = vmatpush.msrb.mxu0 %v483_v37 }
  0x9f   :  { %v547_v39 = vld [vmem:[#allocation5 + $0xa20] sm:$0xff]  ;;  %1214 = vmatpush.msrb.mxu3 %v675_v38  ;;  %v109_v38 = vld [vmem:[#allocation2 + $0x70] sm:$0xff] }
  0xa0   :  { %1084 = vmatpush.msrb.mxu1 %v547_v39  ;;  %v183_v40 = vld [vmem:[#allocation2 + $0x2c0] sm:$0xff] }
  0xa1   :  { %853 = vmatmul.f32.gmra.mxu1 %v168_v25  ;;  %v607_v44 = vld [vmem:[#allocation5 + $0xc00] sm:$0xff] }
  0xa2   :  { %918 = vmatmul.f32.gmra.mxu2 %v169_v26  ;;  %v479_v45 = vld [vmem:[#allocation5 + $0x800] sm:$0xff]  ;;  %v396_v26 = vld [vmem:[#allocation5 + $0x568] sm:$0xff] }
  0xa3   :  { %785 = vmatmul.f32.gmra.mxu0 %v159_v16  ;;  %983 = vmatmul.f32.gmra.mxu3 %v170_v27  ;;  %v671_v46 = vld [vmem:[#allocation5 + $0xe00] sm:$0xff]  ;;  %v464_v16 = vld [vmem:[#allocation5 + $0x788] sm:$0xff] }
  0xa4   :  { %1150 = vmatpush.msrb.mxu2 %v607_v44  ;;  %v543_v47 = vld [vmem:[#allocation5 + $0xa00] sm:$0xff]  ;;  %1020 = vmatpush.msrb.mxu0 %v479_v45  ;;  %v268_v27 = vld [vmem:[#allocation5 + $0x168] sm:$0xff] }
  0xa5   :  { %1215 = vmatpush.msrb.mxu3 %v671_v46  ;;  %1085 = vmatpush.msrb.mxu1 %v543_v47  ;;  %v191_v48 = vld [vmem:[#allocation2 + $0x300] sm:$0xff]  ;;  %v456_v44 = vld [vmem:[#allocation5 + $0x748] sm:$0xff] }
  0xa6   :  { %1395 = vmatpush.msra.mxu2 %v412_v52  ;;  %1265 = vmatpush.msra.mxu0 %v284_v53  ;;  %v199_v55 = vld [vmem:[#allocation2 + $0x340] sm:$0xff] }
  0xa7   :  { %1460 = vmatpush.msra.mxu3 %v476_v54  ;;  %1330 = vmatpush.msra.mxu1 %v348_v57  ;;  %v207_v63 = vld [vmem:[#allocation2 + $0x380] sm:$0xff]  ;;  %v117_v54 = vld [vmem:[#allocation2 + $0xb0] sm:$0xff] }
  0xa8   :  { %1396 = vmatpush.msra.mxu2 %v408_v60  ;;  %1266 = vmatpush.msra.mxu0 %v280_v61  ;;  %v215_v7 = vld [vmem:[#allocation2 + $0x3c0] sm:$0xff]  ;;  %v452_v60 = vld [vmem:[#allocation5 + $0x728] sm:$0xff] }
  0xa9   :  { %856 = vmatmul.f32.gmra.mxu1 %v176_v33  ;;  %1461 = vmatpush.msra.mxu3 %v472_v62  ;;  %v735_v12 = vld [vmem:[#allocation7] sm:$0xf] }
  0xaa   :  { %921 = vmatmul.f32.gmra.mxu2 %v177_v34  ;;  %1331 = vmatpush.msra.mxu1 %v344_v1  ;;  %v4271_v14 = vperm.slane %v735_v12, 0  ;;  %v99_v19 = vld [vmem:[#allocation2 + $0x20] sm:$0xff]  ;;  %v108_v34 = vld [vmem:[#allocation2 + $0x68] sm:$0xff] }
  0xab   :  { %788 = vmatmul.f32.gmra.mxu0 %v167_v24  ;;  %986 = vmatmul.f32.gmra.mxu3 %v178_v35  ;;  %v102_v24 = vld [vmem:[#allocation2 + $0x38] sm:$0xff]  ;;  %v107_v33 = vld [vmem:[#allocation2 + $0x60] sm:$0xff]  ;;  %v332_v35 = vld [vmem:[#allocation5 + $0x368] sm:$0xff] }
  0xac   :  { %1397 = vmatpush.msra.mxu2 %v404_v4  ;;  %1267 = vmatpush.msra.mxu0 %v276_v5  ;;  %v123_v1 = vld [vmem:[#allocation2 + $0xe0] sm:$0xff]  ;;  %v448_v12 = vld [vmem:[#allocation5 + $0x708] sm:$0xff] }
  0xad   :  { %1462 = vmatpush.msra.mxu3 %v468_v6  ;;  %1332 = vmatpush.msra.mxu1 %v340_v9  ;;  %v125_v6 = vld [vmem:[#allocation2 + $0xf0] sm:$0xff] }
  0xae   :  { %1398 = vmatpush.msra.mxu2 %v400_v13  ;;  %1268 = vmatpush.msra.mxu0 %v272_v15 }
  0xaf   :  { %1463 = vmatpush.msra.mxu3 %v464_v16  ;;  %1333 = vmatpush.msra.mxu1 %v336_v21 }
  0xb0   :  { %1399 = vmatpush.msra.mxu2 %v396_v26  ;;  %1269 = vmatpush.msra.mxu0 %v268_v27  ;;  %v380_v27 = vld [vmem:[#allocation5 + $0x4e8] sm:$0xff] }
  0xb1   :  { %859 = vmatmul.f32.gmra.mxu1 %v184_v41  ;;  %1464 = vmatpush.msra.mxu3 %v460_v28  ;;  %v252_v28 = vld [vmem:[#allocation5 + $0xe8] sm:$0xff] }
  0xb2   :  { %924 = vmatmul.f32.gmra.mxu2 %v185_v42  ;;  %1334 = vmatpush.msra.mxu1 %v332_v35  ;;  %v392_v42 = vld [vmem:[#allocation5 + $0x548] sm:$0xff] }
  0xb3   :  { %791 = vmatmul.f32.gmra.mxu0 %v175_v32  ;;  %989 = vmatmul.f32.gmra.mxu3 %v186_v43  ;;  %v264_v43 = vld [vmem:[#allocation5 + $0x148] sm:$0xff] }
  0xb4   :  { %1400 = vmatpush.msra.mxu2 %v392_v42  ;;  %1270 = vmatpush.msra.mxu0 %v264_v43  ;;  %v140_v35 = vld [vmem:[#allocation2 + $0x168] sm:$0xff]  ;;  %v142_v42 = vld [vmem:[#allocation2 + $0x178] sm:$0xff] }
  0xb5   :  { %1465 = vmatpush.msra.mxu3 %v456_v44  ;;  %v376_v44 = vld [vmem:[#allocation5 + $0x4c8] sm:$0xff] }
  0xb7   :  { %1466 = vmatpush.msra.mxu3 %v452_v60 }
  0xb9   :  { %862 = vmatmul.f32.gmra.mxu1 %v192_v49  ;;  %v115_v49 = vld [vmem:[#allocation2 + $0xa0] sm:$0xff]  ;;  %1467 = vmatpush.msra.mxu3 %v448_v12  ;;  %v158_v12 = vld [vmem:[#allocation2 + $0x1f8] sm:$0xff] }
  0xba   :  { %927 = vmatmul.f32.gmra.mxu2 %v193_v50  ;;  %v116_v50 = vld [vmem:[#allocation2 + $0xa8] sm:$0xff] }
  0xbb   :  { %794 = vmatmul.f32.gmra.mxu0 %v183_v40  ;;  %992 = vmatmul.f32.gmra.mxu3 %v194_v51  ;;  %v110_v40 = vld [vmem:[#allocation2 + $0x78] sm:$0xff]  ;;  %v328_v51 = vld [vmem:[#allocation5 + $0x348] sm:$0xff] }
  0xbc   :  { %1335 = vmatpush.msra.mxu1 %v328_v51  ;;  %v147_v51 = vld [vmem:[#allocation2 + $0x1a0] sm:$0xff] }
  0xc1   :  { %865 = vmatmul.f32.gmra.mxu1 %v200_v56  ;;  %v118_v56 = vld [vmem:[#allocation2 + $0xb8] sm:$0xff] }
  0xc2   :  { %930 = vmatmul.f32.gmra.mxu2 %v201_v58  ;;  %v388_v58 = vld [vmem:[#allocation5 + $0x528] sm:$0xff] }
  0xc3   :  { %797 = vmatmul.f32.gmra.mxu0 %v191_v48  ;;  %995 = vmatmul.f32.gmra.mxu3 %v202_v59  ;;  %v260_v59 = vld [vmem:[#allocation5 + $0x128] sm:$0xff] }
  0xc4   :  { %1401 = vmatpush.msra.mxu2 %v388_v58  ;;  %1271 = vmatpush.msra.mxu0 %v260_v59  ;;  %v150_v59 = vld [vmem:[#allocation2 + $0x1b8] sm:$0xff] }
  0xc9   :  { %868 = vmatmul.f32.gmra.mxu1 %v208_v0 }
  0xca   :  { %933 = vmatmul.f32.gmra.mxu2 %v209_v2  ;;  %v124_v2 = vld [vmem:[#allocation2 + $0xe8] sm:$0xff] }
  0xcb   :  { %800 = vmatmul.f32.gmra.mxu0 %v199_v55  ;;  %998 = vmatmul.f32.gmra.mxu3 %v210_v3  ;;  %v324_v3 = vld [vmem:[#allocation5 + $0x328] sm:$0xff] }
  0xcc   :  { %1336 = vmatpush.msra.mxu1 %v324_v3 }
  0xd1   :  { %871 = vmatmul.f32.gmra.mxu1 %v216_v8  ;;  %v126_v8 = vld [vmem:[#allocation2 + $0xf8] sm:$0xff] }
  0xd2   :  { %936 = vmatmul.f32.gmra.mxu2 %v217_v10  ;;  %v384_v10 = vld [vmem:[#allocation5 + $0x508] sm:$0xff] }
  0xd3   :  { %803 = vmatmul.f32.gmra.mxu0 %v207_v63  ;;  %1001 = vmatmul.f32.gmra.mxu3 %v218_v11  ;;  %v256_v11 = vld [vmem:[#allocation5 + $0x108] sm:$0xff] }
  0xd4   :  { %v827_v18 = vpop.f32.mrf.mxu1  ;;  %1402 = vmatpush.msra.mxu2 %v384_v10  ;;  %1272 = vmatpush.msra.mxu0 %v256_v11  ;;  %v157_v10 = vld [vmem:[#allocation2 + $0x1f0] sm:$0xff] }
  0xd6   :  { %v762_v17 = vpop.f32.mrf.mxu0  ;;  %1403 = vmatpush.msra.mxu2 %v380_v27  ;;  %1273 = vmatpush.msra.mxu0 %v252_v28  ;;  %v165_v28 = vld [vmem:[#allocation2 + $0x230] sm:$0xff] }
  0xd7   :  { %v763_v22 = vadd.f32 %v762_v17, %v4271_v14 }
  0xd8   :  { %1404 = vmatpush.msra.mxu2 %v376_v44 }
  0xd9   :  { %1086 = vmatmul.f32.vlgmr.msrb.gmra.mxu1 %v100_v20  ;;  %v828_v25 = vadd.f32 %v827_v18, %v763_v22  ;;  %v131_v18 = vld [vmem:[#allocation2 + $0x120] sm:$0xff]  ;;  %v320_v20 = vld [vmem:[#allocation5 + $0x308] sm:$0xff] }
  0xda   :  { %1151 = vmatmul.f32.vlgmr.msrb.gmra.mxu2 %v101_v23  ;;  %v133_v23 = vld [vmem:[#allocation2 + $0x130] sm:$0xff]  ;;  %1337 = vmatpush.msra.mxu1 %v320_v20 }
  0xdb   :  { %806 = vmatmul.f32.gmra.mxu0 %v215_v7  ;;  %1216 = vmatmul.f32.vlgmr.msrb.gmra.mxu3 %v102_v24  ;;  %v892_v29 = vpop.f32.mrf.mxu2 }
  0xdc   :  { %v893_v30 = vadd.f32 %v892_v29, %v828_v25  ;;  %v830_v32 = vpop.f32.mrf.mxu1  ;;  %v134_v25 = vld [vmem:[#allocation2 + $0x138] sm:$0xff]  ;;  %v444_v29 = vld [vmem:[#allocation5 + $0x6e8] sm:$0xff] }
  0xdd   :  { %1468 = vmatpush.msra.mxu3 %v444_v29 }
  0xde   :  { %v957_v37 = vpop.f32.mrf.mxu3 }
  0xdf   :  { %v4275_v39 = vadd.f32 %v957_v37, %v893_v30 }
  0xe1   :  { %1089 = vmatmul.f32.gmra.mxu1 %v108_v34  ;;  %v139_v34 = vld [vmem:[#allocation2 + $0x160] sm:$0xff] }
  0xe2   :  { %1154 = vmatmul.f32.gmra.mxu2 %v109_v38 }
  0xe3   :  { %1021 = vmatmul.f32.vlgmr.msrb.gmra.mxu0 %v99_v19  ;;  %v765_v31 = vpop.f32.mrf.mxu0  ;;  %1219 = vmatmul.f32.gmra.mxu3 %v110_v40  ;;  %v895_v45 = vpop.f32.mrf.mxu2  ;;  %v132_v19 = vld [vmem:[#allocation2 + $0x128] sm:$0xff]  ;;  %v141_v40 = vld [vmem:[#allocation2 + $0x170] sm:$0xff] }
  0xe4   :  { %v766_v36 = vadd.f32 %v765_v31, %v4271_v14 }
  0xe5   :  { %v833_v48 = vpop.f32.mrf.mxu1 }
  0xe6   :  { %v831_v41 = vadd.f32 %v830_v32, %v766_v36  ;;  %v960_v53 = vpop.f32.mrf.mxu3  ;;  %v316_v36 = vld [vmem:[#allocation5 + $0x2e8] sm:$0xff] }
  0xe7   :  { %1338 = vmatpush.msra.mxu1 %v316_v36 }
  0xe8   :  { %v896_v46 = vadd.f32 %v895_v45, %v831_v41  ;;  %v248_v45 = vld [vmem:[#allocation5 + $0xc8] sm:$0xff] }
  0xe9   :  { %1092 = vmatmul.f32.gmra.mxu1 %v116_v50  ;;  %1274 = vmatpush.msra.mxu0 %v248_v45 }
  0xea   :  { %v4278_v55 = vadd.f32 %v960_v53, %v896_v46  ;;  %1157 = vmatmul.f32.gmra.mxu2 %v117_v54  ;;  %v440_v46 = vld [vmem:[#allocation5 + $0x6c8] sm:$0xff] }
  0xeb   :  { %1024 = vmatmul.f32.gmra.mxu0 %v107_v33  ;;  %1222 = vmatmul.f32.gmra.mxu3 %v118_v56  ;;  %v312_v53 = vld [vmem:[#allocation5 + $0x2c8] sm:$0xff] }
  0xec   :  { %v898_v61 = vpop.f32.mrf.mxu2  ;;  %1469 = vmatpush.msra.mxu3 %v440_v46  ;;  %1339 = vmatpush.msra.mxu1 %v312_v53  ;;  %v173_v46 = vld [vmem:[#allocation2 + $0x270] sm:$0xff] }
  0xed   :  { %v836_v0 = vpop.f32.mrf.mxu1 }
  0xee   :  { %v963_v5 = vpop.f32.mrf.mxu3 }
  0xf0   :  { %v768_v47 = vpop.f32.mrf.mxu0 }
  0xf1   :  { %v769_v52 = vadd.f32 %v768_v47, %v4271_v14  ;;  %1095 = vmatmul.f32.gmra.mxu1 %v124_v2 }
  0xf2   :  { %1160 = vmatmul.f32.gmra.mxu2 %v125_v6  ;;  %v308_v6 = vld [vmem:[#allocation5 + $0x2a8] sm:$0xff] }
  0xf3   :  { %1027 = vmatmul.f32.gmra.mxu0 %v115_v49  ;;  %v834_v57 = vadd.f32 %v833_v48, %v769_v52  ;;  %1225 = vmatmul.f32.gmra.mxu3 %v126_v8  ;;  %v148_v52 = vld [vmem:[#allocation2 + $0x1a8] sm:$0xff] }
  0xf4   :  { %v901_v13 = vpop.f32.mrf.mxu2  ;;  %1340 = vmatpush.msra.mxu1 %v308_v6  ;;  %v420_v6 = vld [vmem:[#allocation5 + $0x628] sm:$0xff] }
  0xf5   :  { %v899_v62 = vadd.f32 %v898_v61, %v834_v57  ;;  %v149_v57 = vld [vmem:[#allocation2 + $0x1b0] sm:$0xff]  ;;  %v372_v61 = vld [vmem:[#allocation5 + $0x4a8] sm:$0xff] }
  0xf6   :  { %v839_v17 = vpop.f32.mrf.mxu1  ;;  %v966_v22 = vpop.f32.mrf.mxu3  ;;  %1405 = vmatpush.msra.mxu2 %v372_v61  ;;  %v296_v61 = vld [vmem:[#allocation5 + $0x248] sm:$0xff] }
  0xf7   :  { %v4281_v7 = vadd.f32 %v963_v5, %v899_v62  ;;  %v244_v62 = vld [vmem:[#allocation5 + $0xa8] sm:$0xff] }
  0xf8   :  { %v771_v63 = vpop.f32.mrf.mxu0  ;;  %1275 = vmatpush.msra.mxu0 %v244_v62  ;;  %v156_v5 = vld [vmem:[#allocation2 + $0x1e8] sm:$0xff] }
  0xf9   :  { %v772_v4 = vadd.f32 %v771_v63, %v4271_v14  ;;  %1098 = vmatmul.f32.gmra.mxu1 %v132_v19  ;;  %v436_v63 = vld [vmem:[#allocation5 + $0x6a8] sm:$0xff] }
  0xfa   :  { %1163 = vmatmul.f32.gmra.mxu2 %v133_v23  ;;  %1470 = vmatpush.msra.mxu3 %v436_v63  ;;  %v164_v23 = vld [vmem:[#allocation2 + $0x228] sm:$0xff] }
  0xfb   :  { %1030 = vmatmul.f32.gmra.mxu0 %v123_v1  ;;  %v837_v9 = vadd.f32 %v836_v0, %v772_v4  ;;  %1228 = vmatmul.f32.gmra.mxu3 %v134_v25  ;;  %v155_v4 = vld [vmem:[#allocation2 + $0x1e0] sm:$0xff]  ;;  %v304_v25 = vld [vmem:[#allocation5 + $0x288] sm:$0xff] }
  0xfc   :  { %v904_v30 = vpop.f32.mrf.mxu2  ;;  %1341 = vmatpush.msra.mxu1 %v304_v25  ;;  %v224_v25 = vld [vmem:[#allocation5 + $0x8] sm:$0xff] }
  0xfd   :  { %v902_v15 = vadd.f32 %v901_v13, %v837_v9 }
  0xfe   :  { %v842_v33 = vpop.f32.mrf.mxu1  ;;  %v969_v38 = vpop.f32.mrf.mxu3 }
  0xff   :  { %v4284_v24 = vadd.f32 %v966_v22, %v902_v15  ;;  %v368_v15 = vld [vmem:[#allocation5 + $0x488] sm:$0xff]  ;;  %v163_v22 = vld [vmem:[#allocation2 + $0x220] sm:$0xff] }
 0x100   :  { %v774_v16 = vpop.f32.mrf.mxu0  ;;  %1406 = vmatpush.msra.mxu2 %v368_v15  ;;  %v188_v15 = vld [vmem:[#allocation2 + $0x2e8] sm:$0xff] }
 0x101   :  { %v775_v21 = vadd.f32 %v774_v16, %v4271_v14  ;;  %1101 = vmatmul.f32.gmra.mxu1 %v140_v35  ;;  %v240_v16 = vld [vmem:[#allocation5 + $0x88] sm:$0xff] }
 0x102   :  { %1166 = vmatmul.f32.gmra.mxu2 %v141_v40  ;;  %1276 = vmatpush.msra.mxu0 %v240_v16  ;;  %v171_v40 = vld [vmem:[#allocation2 + $0x260] sm:$0xff]  ;;  %v292_v16 = vld [vmem:[#allocation5 + $0x228] sm:$0xff] }
 0x103   :  { %1033 = vmatmul.f32.gmra.mxu0 %v131_v18  ;;  %v840_v26 = vadd.f32 %v839_v17, %v775_v21  ;;  %1231 = vmatmul.f32.gmra.mxu3 %v142_v42  ;;  %v432_v17 = vld [vmem:[#allocation5 + $0x688] sm:$0xff] }
 0x104   :  { %1471 = vmatpush.msra.mxu3 %v432_v17  ;;  %v172_v42 = vld [vmem:[#allocation2 + $0x268] sm:$0xff] }
 0x105   :  { %v905_v31 = vadd.f32 %v904_v30, %v840_v26  ;;  %v907_v47 = vpop.f32.mrf.mxu2  ;;  %v166_v30 = vld [vmem:[#allocation2 + $0x238] sm:$0xff] }
 0x106   :  { %v845_v50 = vpop.f32.mrf.mxu1  ;;  %v972_v56 = vpop.f32.mrf.mxu3 }
 0x107   :  { %v4287_v41 = vadd.f32 %v969_v38, %v905_v31 }
 0x108   :  { %v777_v32 = vpop.f32.mrf.mxu0 }
 0x109   :  { %v778_v37 = vadd.f32 %v777_v32, %v4271_v14  ;;  %1104 = vmatmul.f32.gmra.mxu1 %v148_v52  ;;  %v364_v32 = vld [vmem:[#allocation5 + $0x468] sm:$0xff] }
 0x10a   :  { %1169 = vmatmul.f32.gmra.mxu2 %v149_v57  ;;  %v424_v52 = vld [vmem:[#allocation5 + $0x648] sm:$0xff] }
 0x10b   :  { %1036 = vmatmul.f32.gmra.mxu0 %v139_v34  ;;  %v843_v43 = vadd.f32 %v842_v33, %v778_v37  ;;  %1234 = vmatmul.f32.gmra.mxu3 %v150_v59  ;;  %v236_v33 = vld [vmem:[#allocation5 + $0x68] sm:$0xff]  ;;  %v179_v59 = vld [vmem:[#allocation2 + $0x2a0] sm:$0xff] }
 0x10c   :  { %1407 = vmatpush.msra.mxu2 %v364_v32  ;;  %v428_v34 = vld [vmem:[#allocation5 + $0x668] sm:$0xff]  ;;  %1277 = vmatpush.msra.mxu0 %v236_v33  ;;  %v195_v32 = vld [vmem:[#allocation2 + $0x320] sm:$0xff] }
 0x10d   :  { %v908_v48 = vadd.f32 %v907_v47, %v843_v43  ;;  %v910_v0 = vpop.f32.mrf.mxu2  ;;  %1472 = vmatpush.msra.mxu3 %v428_v34  ;;  %v300_v43 = vld [vmem:[#allocation5 + $0x268] sm:$0xff] }
 0x10e   :  { %v848_v3 = vpop.f32.mrf.mxu1  ;;  %v975_v9 = vpop.f32.mrf.mxu3  ;;  %1342 = vmatpush.msra.mxu1 %v300_v43  ;;  %v196_v33 = vld [vmem:[#allocation2 + $0x328] sm:$0xff] }
 0x10f   :  { %v4290_v58 = vadd.f32 %v972_v56, %v908_v48  ;;  %v174_v48 = vld [vmem:[#allocation2 + $0x278] sm:$0xff]  ;;  %1473 = vmatpush.msra.mxu3 %v424_v52  ;;  %v288_v34 = vld [vmem:[#allocation5 + $0x208] sm:$0xff] }
 0x110   :  { %v780_v49 = vpop.f32.mrf.mxu0  ;;  %1343 = vmatpush.msra.mxu1 %v296_v61  ;;  %v668_v43 = vld [vmem:[#allocation5 + $0xde8] sm:$0xff] }
 0x111   :  { %v781_v54 = vadd.f32 %v780_v49, %v4271_v14  ;;  %1107 = vmatmul.f32.gmra.mxu1 %v156_v5  ;;  %v228_v5 = vld [vmem:[#allocation5 + $0x28] sm:$0xff]  ;;  %1474 = vmatpush.msra.mxu3 %v420_v6  ;;  %v211_v6 = vld [vmem:[#allocation2 + $0x3a0] sm:$0xff] }
 0x112   :  { %1172 = vmatmul.f32.gmra.mxu2 %v157_v10  ;;  %1344 = vmatpush.msra.mxu1 %v292_v16  ;;  %v204_v52 = vld [vmem:[#allocation2 + $0x368] sm:$0xff]  ;;  %v214_v16 = vld [vmem:[#allocation2 + $0x3b8] sm:$0xff] }
 0x113   :  { %1039 = vmatmul.f32.gmra.mxu0 %v147_v51  ;;  %v846_v60 = vadd.f32 %v845_v50, %v781_v54  ;;  %1237 = vmatmul.f32.gmra.mxu3 %v158_v12  ;;  %v360_v50 = vld [vmem:[#allocation5 + $0x448] sm:$0xff] }
 0x114   :  { %1408 = vmatpush.msra.mxu2 %v360_v50  ;;  %v232_v51 = vld [vmem:[#allocation5 + $0x48] sm:$0xff]  ;;  %1345 = vmatpush.msra.mxu1 %v288_v34 }
 0x115   :  { %v911_v1 = vadd.f32 %v910_v0, %v846_v60  ;;  %v913_v18 = vpop.f32.mrf.mxu2  ;;  %1278 = vmatpush.msra.mxu0 %v232_v51  ;;  %v180_v60 = vld [vmem:[#allocation2 + $0x2a8] sm:$0xff]  ;;  %v181_v0 = vld [vmem:[#allocation2 + $0x2b0] sm:$0xff]  ;;  %v203_v51 = vld [vmem:[#allocation2 + $0x360] sm:$0xff] }
 0x116   :  { %v851_v21 = vpop.f32.mrf.mxu1  ;;  %v978_v27 = vpop.f32.mrf.mxu3 }
 0x117   :  { %v4293_v11 = vadd.f32 %v975_v9, %v911_v1  ;;  %1279 = vmatpush.msra.mxu0 %v228_v5 }
 0x118   :  { %v783_v2 = vpop.f32.mrf.mxu0 }
 0x119   :  { %v784_v8 = vadd.f32 %v783_v2, %v4271_v14  ;;  %1110 = vmatmul.f32.gmra.mxu1 %v164_v23  ;;  %v182_v2 = vld [vmem:[#allocation2 + $0x2b8] sm:$0xff]  ;;  %v352_v23 = vld [vmem:[#allocation5 + $0x408] sm:$0xff]  ;;  %1280 = vmatpush.msra.mxu0 %v224_v25 }
 0x11a   :  { %1175 = vmatmul.f32.gmra.mxu2 %v165_v28 }
 0x11b   :  { %1042 = vmatmul.f32.gmra.mxu0 %v155_v4  ;;  %v849_v13 = vadd.f32 %v848_v3, %v784_v8  ;;  %1240 = vmatmul.f32.gmra.mxu3 %v166_v30  ;;  %v356_v4 = vld [vmem:[#allocation5 + $0x428] sm:$0xff] }
 0x11c   :  { %1409 = vmatpush.msra.mxu2 %v356_v4 }
 0x11d   :  { %v914_v19 = vadd.f32 %v913_v18, %v849_v13  ;;  %v916_v35 = vpop.f32.mrf.mxu2  ;;  %v187_v13 = vld [vmem:[#allocation2 + $0x2e0] sm:$0xff] }
 0x11e   :  { %v854_v38 = vpop.f32.mrf.mxu1  ;;  %v981_v45 = vpop.f32.mrf.mxu3  ;;  %1410 = vmatpush.msra.mxu2 %v352_v23 }
 0x11f   :  { %v4296_v29 = vadd.f32 %v978_v27, %v914_v19  ;;  %v189_v19 = vld [vmem:[#allocation2 + $0x2f0] sm:$0xff] }
 0x120   :  { %v786_v20 = vpop.f32.mrf.mxu0  ;;  %1655 = vmatpush.msrb.mxu2 %v668_v43 }
 0x121   :  { %v787_v26 = vadd.f32 %v786_v20, %v4271_v14  ;;  %1113 = vmatmul.f32.gmra.mxu1 %v172_v42 }
 0x122   :  { %1178 = vmatmul.f32.gmra.mxu2 %v173_v46 }
 0x123   :  { %1045 = vmatmul.f32.gmra.mxu0 %v163_v22  ;;  %v852_v31 = vadd.f32 %v851_v21, %v787_v26  ;;  %1243 = vmatmul.f32.gmra.mxu3 %v174_v48  ;;  %v190_v21 = vld [vmem:[#allocation2 + $0x2f8] sm:$0xff]  ;;  %v416_v26 = vld [vmem:[#allocation5 + $0x608] sm:$0xff] }
 0x124   :  { %1475 = vmatpush.msra.mxu3 %v416_v26 }
 0x125   :  { %v917_v36 = vadd.f32 %v916_v35, %v852_v31  ;;  %v919_v53 = vpop.f32.mrf.mxu2 }
 0x126   :  { %v857_v57 = vpop.f32.mrf.mxu1  ;;  %v984_v63 = vpop.f32.mrf.mxu3 }
 0x127   :  { %v4299_v47 = vadd.f32 %v981_v45, %v917_v36  ;;  %v732_v45 = vld [vmem:[#allocation5 + $0xfe8] sm:$0xff] }
 0x128   :  { %v789_v37 = vpop.f32.mrf.mxu0  ;;  %1720 = vmatpush.msrb.mxu3 %v732_v45 }
 0x129   :  { %v790_v44 = vadd.f32 %v789_v37, %v4271_v14  ;;  %1116 = vmatmul.f32.gmra.mxu1 %v180_v60  ;;  %v197_v37 = vld [vmem:[#allocation2 + $0x330] sm:$0xff]  ;;  %v206_v60 = vld [vmem:[#allocation2 + $0x378] sm:$0xff] }
 0x12a   :  { %1181 = vmatmul.f32.gmra.mxu2 %v181_v0  ;;  %v728_v0 = vld [vmem:[#allocation5 + $0xfc8] sm:$0xff] }
 0x12b   :  { %1048 = vmatmul.f32.gmra.mxu0 %v171_v40  ;;  %v855_v49 = vadd.f32 %v854_v38, %v790_v44  ;;  %1246 = vmatmul.f32.gmra.mxu3 %v182_v2  ;;  %v198_v40 = vld [vmem:[#allocation2 + $0x338] sm:$0xff]  ;;  %v540_v44 = vld [vmem:[#allocation5 + $0x9e8] sm:$0xff] }
 0x12c   :  { %1525 = vmatpush.msrb.mxu0 %v540_v44  ;;  %1721 = vmatpush.msrb.mxu3 %v728_v0 }
 0x12d   :  { %v920_v54 = vadd.f32 %v919_v53, %v855_v49  ;;  %v922_v8 = vpop.f32.mrf.mxu2  ;;  %v604_v53 = vld [vmem:[#allocation5 + $0xbe8] sm:$0xff] }
 0x12e   :  { %v860_v12 = vpop.f32.mrf.mxu1  ;;  %v987_v18 = vpop.f32.mrf.mxu3  ;;  %1590 = vmatpush.msrb.mxu1 %v604_v53  ;;  %v3673_v53 = vld [vmem:[#allocation2 + $0x8] sm:$0xff] }
 0x12f   :  { %v4302_v1 = vadd.f32 %v984_v63, %v920_v54  ;;  %v536_v63 = vld [vmem:[#allocation5 + $0x9c8] sm:$0xff] }
 0x130   :  { %v792_v56 = vpop.f32.mrf.mxu0  ;;  %1526 = vmatpush.msrb.mxu0 %v536_v63 }
 0x131   :  { %v793_v62 = vadd.f32 %v792_v56, %v4271_v14  ;;  %1119 = vmatmul.f32.gmra.mxu1 %v188_v15 }
 0x132   :  { %1184 = vmatmul.f32.gmra.mxu2 %v189_v19  ;;  %v532_v19 = vld [vmem:[#allocation5 + $0x9a8] sm:$0xff] }
 0x133   :  { %1051 = vmatmul.f32.gmra.mxu0 %v179_v59  ;;  %v858_v3 = vadd.f32 %v857_v57, %v793_v62  ;;  %1249 = vmatmul.f32.gmra.mxu3 %v190_v21  ;;  %v205_v57 = vld [vmem:[#allocation2 + $0x370] sm:$0xff]  ;;  %v664_v62 = vld [vmem:[#allocation5 + $0xdc8] sm:$0xff] }
 0x134   :  { %1656 = vmatpush.msrb.mxu2 %v664_v62  ;;  %v724_v21 = vld [vmem:[#allocation5 + $0xfa8] sm:$0xff]  ;;  %1527 = vmatpush.msrb.mxu0 %v532_v19 }
 0x135   :  { %v923_v9 = vadd.f32 %v922_v8, %v858_v3  ;;  %v925_v27 = vpop.f32.mrf.mxu2  ;;  %v212_v8 = vld [vmem:[#allocation2 + $0x3a8] sm:$0xff]  ;;  %1722 = vmatpush.msrb.mxu3 %v724_v21 }
 0x136   :  { %v863_v31 = vpop.f32.mrf.mxu1  ;;  %v990_v36 = vpop.f32.mrf.mxu3 }
 0x137   :  { %v4305_v20 = vadd.f32 %v987_v18, %v923_v9  ;;  %v600_v9 = vld [vmem:[#allocation5 + $0xbc8] sm:$0xff] }
 0x138   :  { %v795_v10 = vpop.f32.mrf.mxu0  ;;  %1591 = vmatpush.msrb.mxu1 %v600_v9  ;;  %v660_v18 = vld [vmem:[#allocation5 + $0xda8] sm:$0xff] }
 0x139   :  { %v796_v17 = vadd.f32 %v795_v10, %v4271_v14  ;;  %1122 = vmatmul.f32.gmra.mxu1 %v196_v33  ;;  %1657 = vmatpush.msrb.mxu2 %v660_v18  ;;  %v221_v33 = vld [vmem:[#allocation2 + $0x3f0] sm:$0xff]  ;;  %v3677_v9 = vld [vmem:[#allocation2 + $0x48] sm:$0xff] }
 0x13a   :  { %1187 = vmatmul.f32.gmra.mxu2 %v197_v37  ;;  %v656_v37 = vld [vmem:[#allocation5 + $0xd88] sm:$0xff] }
 0x13b   :  { %1054 = vmatmul.f32.gmra.mxu0 %v187_v13  ;;  %v861_v22 = vadd.f32 %v860_v12, %v796_v17  ;;  %1252 = vmatmul.f32.gmra.mxu3 %v198_v40  ;;  %v213_v13 = vld [vmem:[#allocation2 + $0x3b0] sm:$0xff]  ;;  %v528_v40 = vld [vmem:[#allocation5 + $0x988] sm:$0xff] }
 0x13c   :  { %1658 = vmatpush.msrb.mxu2 %v656_v37  ;;  %1528 = vmatpush.msrb.mxu0 %v528_v40 }
 0x13d   :  { %v926_v28 = vadd.f32 %v925_v27, %v861_v22  ;;  %v928_v46 = vpop.f32.mrf.mxu2  ;;  %v219_v27 = vld [vmem:[#allocation2 + $0x3e0] sm:$0xff] }
 0x13e   :  { %v866_v50 = vpop.f32.mrf.mxu1  ;;  %v993_v56 = vpop.f32.mrf.mxu3 }
 0x13f   :  { %v4308_v38 = vadd.f32 %v990_v36, %v926_v28  ;;  %v220_v28 = vld [vmem:[#allocation2 + $0x3e8] sm:$0xff] }
 0x140   :  { %v798_v30 = vpop.f32.mrf.mxu0 }
 0x141   :  { %v799_v35 = vadd.f32 %v798_v30, %v4271_v14  ;;  %1125 = vmatmul.f32.gmra.mxu1 %v204_v52  ;;  %v596_v30 = vld [vmem:[#allocation5 + $0xba8] sm:$0xff]  ;;  %v3672_v52 = vld [vmem:[#allocation2] sm:$0xff] }
 0x142   :  { %1190 = vmatmul.f32.gmra.mxu2 %v205_v57  ;;  %1592 = vmatpush.msrb.mxu1 %v596_v30  ;;  %v652_v57 = vld [vmem:[#allocation5 + $0xd68] sm:$0xff] }
 0x143   :  { %1057 = vmatmul.f32.gmra.mxu0 %v195_v32  ;;  %v864_v42 = vadd.f32 %v863_v31, %v799_v35  ;;  %1255 = vmatmul.f32.gmra.mxu3 %v206_v60  ;;  %v222_v35 = vld [vmem:[#allocation2 + $0x3f8] sm:$0xff]  ;;  %v524_v60 = vld [vmem:[#allocation5 + $0x968] sm:$0xff] }
 0x144   :  { %1659 = vmatpush.msrb.mxu2 %v652_v57  ;;  %1529 = vmatpush.msrb.mxu0 %v524_v60  ;;  %v3681_v30 = vld [vmem:[#allocation2 + $0x88] sm:$0xff] }
 0x145   :  { %v929_v48 = vadd.f32 %v928_v46, %v864_v42  ;;  %v931_v2 = vpop.f32.mrf.mxu2  ;;  %v720_v42 = vld [vmem:[#allocation5 + $0xf88] sm:$0xff] }
 0x146   :  { %v869_v5 = vpop.f32.mrf.mxu1  ;;  %v996_v12 = vpop.f32.mrf.mxu3  ;;  %1723 = vmatpush.msrb.mxu3 %v720_v42  ;;  %v592_v46 = vld [vmem:[#allocation5 + $0xb88] sm:$0xff] }
 0x147   :  { %v4311_v59 = vadd.f32 %v993_v56, %v929_v48  ;;  %1593 = vmatpush.msrb.mxu1 %v592_v46  ;;  %v3675_v56 = vld [vmem:[#allocation2 + $0x18] sm:$0xff] }
 0x148   :  { %v801_v49 = vpop.f32.mrf.mxu0 }
 0x149   :  { %v802_v54 = vadd.f32 %v801_v49, %v4271_v14  ;;  %1128 = vmatmul.f32.gmra.mxu1 %v212_v8  ;;  %v3676_v8 = vld [vmem:[#allocation2 + $0x40] sm:$0xff] }
 0x14a   :  { %1193 = vmatmul.f32.gmra.mxu2 %v213_v13  ;;  %v648_v13 = vld [vmem:[#allocation5 + $0xd48] sm:$0xff] }
 0x14b   :  { %1060 = vmatmul.f32.gmra.mxu0 %v203_v51  ;;  %v867_v61 = vadd.f32 %v866_v50, %v802_v54  ;;  %1258 = vmatmul.f32.gmra.mxu3 %v214_v16  ;;  %v3674_v54 = vld [vmem:[#allocation2 + $0x10] sm:$0xff]  ;;  %v520_v16 = vld [vmem:[#allocation5 + $0x948] sm:$0xff] }
 0x14c   :  { %1660 = vmatpush.msrb.mxu2 %v648_v13  ;;  %1530 = vmatpush.msrb.mxu0 %v520_v16 }
 0x14d   :  { %v932_v3 = vadd.f32 %v931_v2, %v867_v61  ;;  %v934_v22 = vpop.f32.mrf.mxu2  ;;  %v716_v61 = vld [vmem:[#allocation5 + $0xf68] sm:$0xff] }
 0x14e   :  { %v872_v26 = vpop.f32.mrf.mxu1  ;;  %v999_v32 = vpop.f32.mrf.mxu3  ;;  %1724 = vmatpush.msrb.mxu3 %v716_v61  ;;  %v588_v2 = vld [vmem:[#allocation5 + $0xb68] sm:$0xff] }
 0x14f   :  { %v4314_v15 = vadd.f32 %v996_v12, %v932_v3  ;;  %1594 = vmatpush.msrb.mxu1 %v588_v2  ;;  %v3679_v12 = vld [vmem:[#allocation2 + $0x58] sm:$0xff] }
 0x150   :  { %v804_v4 = vpop.f32.mrf.mxu0 }
 0x151   :  { %v805_v10 = vadd.f32 %v804_v4, %v4271_v14  ;;  %1131 = vmatmul.f32.gmra.mxu1 %v220_v28  ;;  %v3680_v28 = vld [vmem:[#allocation2 + $0x80] sm:$0xff] }
 0x152   :  { %1196 = vmatmul.f32.gmra.mxu2 %v221_v33  ;;  %v644_v33 = vld [vmem:[#allocation5 + $0xd28] sm:$0xff] }
 0x153   :  { %1063 = vmatmul.f32.gmra.mxu0 %v211_v6  ;;  %v870_v17 = vadd.f32 %v869_v5, %v805_v10  ;;  %1261 = vmatmul.f32.gmra.mxu3 %v222_v35  ;;  %v3678_v10 = vld [vmem:[#allocation2 + $0x50] sm:$0xff]  ;;  %v516_v35 = vld [vmem:[#allocation5 + $0x928] sm:$0xff] }
 0x154   :  { %1661 = vmatpush.msrb.mxu2 %v644_v33  ;;  %1531 = vmatpush.msrb.mxu0 %v516_v35 }
 0x155   :  { %v935_v23 = vadd.f32 %v934_v22, %v870_v17  ;;  %v937_v43 = vpop.f32.mrf.mxu2  ;;  %v712_v17 = vld [vmem:[#allocation5 + $0xf48] sm:$0xff] }
 0x156   :  { %v1002_v48 = vpop.f32.mrf.mxu3  ;;  %1725 = vmatpush.msrb.mxu3 %v712_v17  ;;  %v584_v22 = vld [vmem:[#allocation5 + $0xb48] sm:$0xff] }
 0x157   :  { %v4317_v34 = vadd.f32 %v999_v32, %v935_v23  ;;  %1595 = vmatpush.msrb.mxu1 %v584_v22  ;;  %v3683_v32 = vld [vmem:[#allocation2 + $0x98] sm:$0xff] }
 0x158   :  { %v807_v25 = vpop.f32.mrf.mxu0 }
 0x159   :  { %v808_v31 = vadd.f32 %v807_v25, %v4271_v14  ;;  %v1087_v14 = vpop.f32.mrf.mxu1  ;;  %1346 = vmatmul.f32.vlgmr.msra.gmra.mxu1 %v3673_v53  ;;  %v640_v53 = vld [vmem:[#allocation5 + $0xd08] sm:$0xff] }
 0x15a   :  { %1411 = vmatmul.f32.vlgmr.msra.gmra.mxu2 %v3674_v54  ;;  %v512_v54 = vld [vmem:[#allocation5 + $0x908] sm:$0xff] }
 0x15b   :  { %1066 = vmatmul.f32.gmra.mxu0 %v219_v27  ;;  %v873_v36 = vadd.f32 %v872_v26, %v808_v31  ;;  %1476 = vmatmul.f32.vlgmr.msra.gmra.mxu3 %v3675_v56  ;;  %v3682_v31 = vld [vmem:[#allocation2 + $0x90] sm:$0xff]  ;;  %v704_v56 = vld [vmem:[#allocation5 + $0xf08] sm:$0xff] }
 0x15c   :  { %1662 = vmatpush.msrb.mxu2 %v640_v53  ;;  %1532 = vmatpush.msrb.mxu0 %v512_v54 }
 0x15d   :  { %v938_v44 = vadd.f32 %v937_v43, %v873_v36  ;;  %v1152_v62 = vpop.f32.mrf.mxu2  ;;  %v708_v36 = vld [vmem:[#allocation5 + $0xf28] sm:$0xff] }
 0x15e   :  { %v1217_v4 = vpop.f32.mrf.mxu3  ;;  %1726 = vmatpush.msrb.mxu3 %v708_v36  ;;  %v580_v43 = vld [vmem:[#allocation5 + $0xb28] sm:$0xff] }
 0x15f   :  { %v4320_v50 = vadd.f32 %v1002_v48, %v938_v44  ;;  %1596 = vmatpush.msrb.mxu1 %v580_v43  ;;  %v3684_v48 = vld [vmem:[#allocation2 + $0xc0] sm:$0xff] }
 0x160   :  { %v1022_v45 = vpop.f32.mrf.mxu0  ;;  %1727 = vmatpush.msrb.mxu3 %v704_v56 }
 0x161   :  { %v1023_v49 = vadd.f32 %v1022_v45, %v4275_v39  ;;  %v1090_v0 = vpop.f32.mrf.mxu1  ;;  %1349 = vmatmul.f32.gmra.mxu1 %v3677_v9  ;;  %v636_v9 = vld [vmem:[#allocation5 + $0xce8] sm:$0xff] }
 0x162   :  { %1414 = vmatmul.f32.gmra.mxu2 %v3678_v10  ;;  %v508_v10 = vld [vmem:[#allocation5 + $0x8e8] sm:$0xff] }
 0x163   :  { %v1088_v51 = vadd.f32 %v1087_v14, %v1023_v49  ;;  %1281 = vmatmul.f32.vlgmr.msra.gmra.mxu0 %v3672_v52  ;;  %1479 = vmatmul.f32.gmra.mxu3 %v3679_v12  ;;  %v3685_v49 = vld [vmem:[#allocation2 + $0xc8] sm:$0xff]  ;;  %v3687_v52 = vld [vmem:[#allocation2 + $0xd8] sm:$0xff] }
 0x164   :  { %v700_v12 = vld [vmem:[#allocation5 + $0xee8] sm:$0xff]  ;;  %1663 = vmatpush.msrb.mxu2 %v636_v9  ;;  %1533 = vmatpush.msrb.mxu0 %v508_v10 }
 0x165   :  { %v1153_v63 = vadd.f32 %v1152_v62, %v1088_v51  ;;  %v1155_v18 = vpop.f32.mrf.mxu2  ;;  %v3686_v51 = vld [vmem:[#allocation2 + $0xd0] sm:$0xff]  ;;  %v576_v62 = vld [vmem:[#allocation5 + $0xb08] sm:$0xff]  ;;  %1728 = vmatpush.msrb.mxu3 %v700_v12 }
 0x166   :  { %v1220_v25 = vpop.f32.mrf.mxu3  ;;  %1597 = vmatpush.msrb.mxu1 %v576_v62 }
 0x167   :  { %v4323_v5 = vadd.f32 %v1217_v4, %v1153_v63  ;;  %v3689_v4 = vld [vmem:[#allocation2 + $0x108] sm:$0xff] }
 0x168   :  { %v1025_v39 = vpop.f32.mrf.mxu0 }
 0x169   :  { %v1026_v3 = vadd.f32 %v1025_v39, %v4278_v55  ;;  %v1093_v21 = vpop.f32.mrf.mxu1  ;;  %1352 = vmatmul.f32.gmra.mxu1 %v3681_v30  ;;  %v632_v30 = vld [vmem:[#allocation5 + $0xcc8] sm:$0xff] }
 0x16a   :  { %1417 = vmatmul.f32.gmra.mxu2 %v3682_v31  ;;  %v504_v31 = vld [vmem:[#allocation5 + $0x8c8] sm:$0xff] }
 0x16b   :  { %v1091_v6 = vadd.f32 %v1090_v0, %v1026_v3  ;;  %1284 = vmatmul.f32.gmra.mxu0 %v3676_v8  ;;  %1482 = vmatmul.f32.gmra.mxu3 %v3683_v32  ;;  %v3688_v3 = vld [vmem:[#allocation2 + $0x100] sm:$0xff]  ;;  %v3691_v8 = vld [vmem:[#allocation2 + $0x118] sm:$0xff]  ;;  %v696_v32 = vld [vmem:[#allocation5 + $0xec8] sm:$0xff] }
 0x16c   :  { %1664 = vmatpush.msrb.mxu2 %v632_v30  ;;  %1534 = vmatpush.msrb.mxu0 %v504_v31 }
 0x16d   :  { %v1156_v55 = vadd.f32 %v1155_v18, %v1091_v6  ;;  %v1158_v37 = vpop.f32.mrf.mxu2  ;;  %v3690_v6 = vld [vmem:[#allocation2 + $0x110] sm:$0xff]  ;;  %v572_v18 = vld [vmem:[#allocation5 + $0xae8] sm:$0xff]  ;;  %1729 = vmatpush.msrb.mxu3 %v696_v32 }
 0x16e   :  { %v1223_v45 = vpop.f32.mrf.mxu3  ;;  %1598 = vmatpush.msrb.mxu1 %v572_v18 }
 0x16f   :  { %v4326_v26 = vadd.f32 %v1220_v25, %v1156_v55  ;;  %v3693_v25 = vld [vmem:[#allocation2 + $0x148] sm:$0xff] }
 0x170   :  { %v1028_v19 = vpop.f32.mrf.mxu0 }
 0x171   :  { %v1029_v23 = vadd.f32 %v1028_v19, %v4281_v7  ;;  %v1096_v42 = vpop.f32.mrf.mxu1  ;;  %1355 = vmatmul.f32.gmra.mxu1 %v3685_v49  ;;  %v628_v49 = vld [vmem:[#allocation5 + $0xca8] sm:$0xff] }
 0x172   :  { %1420 = vmatmul.f32.gmra.mxu2 %v3686_v51  ;;  %v500_v51 = vld [vmem:[#allocation5 + $0x8a8] sm:$0xff] }
 0x173   :  { %v1094_v27 = vadd.f32 %v1093_v21, %v1029_v23  ;;  %1287 = vmatmul.f32.gmra.mxu0 %v3680_v28  ;;  %1485 = vmatmul.f32.gmra.mxu3 %v3687_v52  ;;  %v3692_v23 = vld [vmem:[#allocation2 + $0x140] sm:$0xff]  ;;  %v3695_v28 = vld [vmem:[#allocation2 + $0x158] sm:$0xff]  ;;  %v692_v52 = vld [vmem:[#allocation5 + $0xea8] sm:$0xff] }
 0x174   :  { %1665 = vmatpush.msrb.mxu2 %v628_v49  ;;  %1535 = vmatpush.msrb.mxu0 %v500_v51 }
 0x175   :  { %v1159_v7 = vadd.f32 %v1158_v37, %v1094_v27  ;;  %v1161_v57 = vpop.f32.mrf.mxu2  ;;  %v3694_v27 = vld [vmem:[#allocation2 + $0x150] sm:$0xff]  ;;  %v568_v37 = vld [vmem:[#allocation5 + $0xac8] sm:$0xff]  ;;  %1730 = vmatpush.msrb.mxu3 %v692_v52 }
 0x176   :  { %v1226_v39 = vpop.f32.mrf.mxu3  ;;  %1599 = vmatpush.msrb.mxu1 %v568_v37 }
 0x177   :  { %v4329_v14 = vadd.f32 %v1223_v45, %v1159_v7  ;;  %v3697_v45 = vld [vmem:[#allocation2 + $0x188] sm:$0xff] }
 0x178   :  { %v1031_v40 = vpop.f32.mrf.mxu0 }
 0x179   :  { %v1032_v44 = vadd.f32 %v1031_v40, %v4284_v24  ;;  %v1099_v61 = vpop.f32.mrf.mxu1  ;;  %1358 = vmatmul.f32.gmra.mxu1 %v3689_v4  ;;  %v624_v4 = vld [vmem:[#allocation5 + $0xc88] sm:$0xff] }
 0x17a   :  { %1423 = vmatmul.f32.gmra.mxu2 %v3690_v6  ;;  %v496_v6 = vld [vmem:[#allocation5 + $0x888] sm:$0xff] }
 0x17b   :  { %v1097_v46 = vadd.f32 %v1096_v42, %v1032_v44  ;;  %1290 = vmatmul.f32.gmra.mxu0 %v3684_v48  ;;  %1488 = vmatmul.f32.gmra.mxu3 %v3691_v8  ;;  %v3696_v44 = vld [vmem:[#allocation2 + $0x180] sm:$0xff]  ;;  %v3699_v48 = vld [vmem:[#allocation2 + $0x198] sm:$0xff]  ;;  %v688_v8 = vld [vmem:[#allocation5 + $0xe88] sm:$0xff] }
 0x17c   :  { %1666 = vmatpush.msrb.mxu2 %v624_v4  ;;  %1536 = vmatpush.msrb.mxu0 %v496_v6 }
 0x17d   :  { %v1162_v24 = vadd.f32 %v1161_v57, %v1097_v46  ;;  %v1164_v13 = vpop.f32.mrf.mxu2  ;;  %v3698_v46 = vld [vmem:[#allocation2 + $0x190] sm:$0xff]  ;;  %v564_v57 = vld [vmem:[#allocation5 + $0xaa8] sm:$0xff]  ;;  %1731 = vmatpush.msrb.mxu3 %v688_v8 }
 0x17e   :  { %v1229_v19 = vpop.f32.mrf.mxu3  ;;  %1600 = vmatpush.msrb.mxu1 %v564_v57 }
 0x17f   :  { %v4332_v0 = vadd.f32 %v1226_v39, %v1162_v24  ;;  %v3701_v39 = vld [vmem:[#allocation2 + $0x1c8] sm:$0xff] }
 0x180   :  { %v1034_v60 = vpop.f32.mrf.mxu0 }
 0x181   :  { %v1035_v63 = vadd.f32 %v1034_v60, %v4287_v41  ;;  %v1102_v17 = vpop.f32.mrf.mxu1  ;;  %1361 = vmatmul.f32.gmra.mxu1 %v3693_v25  ;;  %v620_v25 = vld [vmem:[#allocation5 + $0xc68] sm:$0xff] }
 0x182   :  { %1426 = vmatmul.f32.gmra.mxu2 %v3694_v27  ;;  %v492_v27 = vld [vmem:[#allocation5 + $0x868] sm:$0xff] }
 0x183   :  { %v1100_v2 = vadd.f32 %v1099_v61, %v1035_v63  ;;  %1293 = vmatmul.f32.gmra.mxu0 %v3688_v3  ;;  %1491 = vmatmul.f32.gmra.mxu3 %v3695_v28  ;;  %v3700_v63 = vld [vmem:[#allocation2 + $0x1c0] sm:$0xff]  ;;  %v3703_v3 = vld [vmem:[#allocation2 + $0x1d8] sm:$0xff]  ;;  %v684_v28 = vld [vmem:[#allocation5 + $0xe68] sm:$0xff] }
 0x184   :  { %1667 = vmatpush.msrb.mxu2 %v620_v25  ;;  %1537 = vmatpush.msrb.mxu0 %v492_v27 }
 0x185   :  { %v1165_v41 = vadd.f32 %v1164_v13, %v1100_v2  ;;  %v1167_v33 = vpop.f32.mrf.mxu2  ;;  %v3702_v2 = vld [vmem:[#allocation2 + $0x1d0] sm:$0xff]  ;;  %v560_v13 = vld [vmem:[#allocation5 + $0xa88] sm:$0xff]  ;;  %1732 = vmatpush.msrb.mxu3 %v684_v28 }
 0x186   :  { %v1232_v40 = vpop.f32.mrf.mxu3  ;;  %1601 = vmatpush.msrb.mxu1 %v560_v13 }
 0x187   :  { %v4335_v21 = vadd.f32 %v1229_v19, %v1165_v41  ;;  %v3705_v19 = vld [vmem:[#allocation2 + $0x208] sm:$0xff] }
 0x188   :  { %v1037_v16 = vpop.f32.mrf.mxu0 }
 0x189   :  { %v1038_v55 = vadd.f32 %v1037_v16, %v4290_v58  ;;  %v1105_v36 = vpop.f32.mrf.mxu1  ;;  %1364 = vmatmul.f32.gmra.mxu1 %v3697_v45  ;;  %v616_v45 = vld [vmem:[#allocation5 + $0xc48] sm:$0xff] }
 0x18a   :  { %1429 = vmatmul.f32.gmra.mxu2 %v3698_v46  ;;  %v488_v46 = vld [vmem:[#allocation5 + $0x848] sm:$0xff] }
 0x18b   :  { %v1103_v22 = vadd.f32 %v1102_v17, %v1038_v55  ;;  %1296 = vmatmul.f32.gmra.mxu0 %v3692_v23  ;;  %1494 = vmatmul.f32.gmra.mxu3 %v3699_v48  ;;  %v3704_v55 = vld [vmem:[#allocation2 + $0x200] sm:$0xff]  ;;  %v3707_v23 = vld [vmem:[#allocation2 + $0x218] sm:$0xff]  ;;  %v680_v48 = vld [vmem:[#allocation5 + $0xe48] sm:$0xff] }
 0x18c   :  { %1668 = vmatpush.msrb.mxu2 %v616_v45  ;;  %1538 = vmatpush.msrb.mxu0 %v488_v46 }
 0x18d   :  { %v1168_v58 = vadd.f32 %v1167_v33, %v1103_v22  ;;  %v1170_v53 = vpop.f32.mrf.mxu2  ;;  %v3706_v22 = vld [vmem:[#allocation2 + $0x210] sm:$0xff]  ;;  %v556_v33 = vld [vmem:[#allocation5 + $0xa68] sm:$0xff]  ;;  %1733 = vmatpush.msrb.mxu3 %v680_v48 }
 0x18e   :  { %v1235_v60 = vpop.f32.mrf.mxu3  ;;  %1602 = vmatpush.msrb.mxu1 %v556_v33 }
 0x18f   :  { %v4338_v42 = vadd.f32 %v1232_v40, %v1168_v58  ;;  %v3709_v40 = vld [vmem:[#allocation2 + $0x248] sm:$0xff] }
 0x190   :  { %v1040_v35 = vpop.f32.mrf.mxu0 }
 0x191   :  { %v1041_v7 = vadd.f32 %v1040_v35, %v4293_v11  ;;  %v1108_v56 = vpop.f32.mrf.mxu1  ;;  %1367 = vmatmul.f32.gmra.mxu1 %v3701_v39  ;;  %v612_v39 = vld [vmem:[#allocation5 + $0xc28] sm:$0xff] }
 0x192   :  { %1432 = vmatmul.f32.gmra.mxu2 %v3702_v2  ;;  %v484_v2 = vld [vmem:[#allocation5 + $0x828] sm:$0xff] }
 0x193   :  { %v1106_v43 = vadd.f32 %v1105_v36, %v1041_v7  ;;  %1299 = vmatmul.f32.gmra.mxu0 %v3696_v44  ;;  %1497 = vmatmul.f32.gmra.mxu3 %v3703_v3  ;;  %v3708_v7 = vld [vmem:[#allocation2 + $0x240] sm:$0xff]  ;;  %v3711_v44 = vld [vmem:[#allocation2 + $0x258] sm:$0xff]  ;;  %v676_v3 = vld [vmem:[#allocation5 + $0xe28] sm:$0xff] }
 0x194   :  { %1669 = vmatpush.msrb.mxu2 %v612_v39  ;;  %1539 = vmatpush.msrb.mxu0 %v484_v2 }
 0x195   :  { %v1171_v11 = vadd.f32 %v1170_v53, %v1106_v43  ;;  %v1173_v9 = vpop.f32.mrf.mxu2  ;;  %v3710_v43 = vld [vmem:[#allocation2 + $0x250] sm:$0xff]  ;;  %v552_v53 = vld [vmem:[#allocation5 + $0xa48] sm:$0xff]  ;;  %1734 = vmatpush.msrb.mxu3 %v676_v3 }
 0x196   :  { %v1238_v16 = vpop.f32.mrf.mxu3  ;;  %1603 = vmatpush.msrb.mxu1 %v552_v53 }
 0x197   :  { %v4341_v61 = vadd.f32 %v1235_v60, %v1171_v11  ;;  %v3713_v60 = vld [vmem:[#allocation2 + $0x288] sm:$0xff] }
 0x198   :  { %v1043_v54 = vpop.f32.mrf.mxu0 }
 0x199   :  { %v1044_v24 = vadd.f32 %v1043_v54, %v4296_v29  ;;  %v1111_v12 = vpop.f32.mrf.mxu1  ;;  %1370 = vmatmul.f32.gmra.mxu1 %v3705_v19  ;;  %v608_v19 = vld [vmem:[#allocation5 + $0xc08] sm:$0xff] }
 0x19a   :  { %1435 = vmatmul.f32.gmra.mxu2 %v3706_v22  ;;  %v480_v22 = vld [vmem:[#allocation5 + $0x808] sm:$0xff] }
 0x19b   :  { %v1109_v62 = vadd.f32 %v1108_v56, %v1044_v24  ;;  %1302 = vmatmul.f32.gmra.mxu0 %v3700_v63  ;;  %1500 = vmatmul.f32.gmra.mxu3 %v3707_v23  ;;  %v3712_v24 = vld [vmem:[#allocation2 + $0x280] sm:$0xff]  ;;  %v3715_v63 = vld [vmem:[#allocation2 + $0x298] sm:$0xff]  ;;  %v672_v23 = vld [vmem:[#allocation5 + $0xe08] sm:$0xff] }
 0x19c   :  { %1670 = vmatpush.msrb.mxu2 %v608_v19  ;;  %1540 = vmatpush.msrb.mxu0 %v480_v22 }
 0x19d   :  { %v1174_v29 = vadd.f32 %v1173_v9, %v1109_v62  ;;  %v1176_v30 = vpop.f32.mrf.mxu2  ;;  %v3714_v62 = vld [vmem:[#allocation2 + $0x290] sm:$0xff]  ;;  %v548_v9 = vld [vmem:[#allocation5 + $0xa28] sm:$0xff]  ;;  %1735 = vmatpush.msrb.mxu3 %v672_v23 }
 0x19e   :  { %v1241_v35 = vpop.f32.mrf.mxu3  ;;  %1604 = vmatpush.msrb.mxu1 %v548_v9 }
 0x19f   :  { %v4344_v17 = vadd.f32 %v1238_v16, %v1174_v29  ;;  %v3717_v16 = vld [vmem:[#allocation2 + $0x2c8] sm:$0xff] }
 0x1a0   :  { %v1046_v10 = vpop.f32.mrf.mxu0 }
 0x1a1   :  { %v1047_v41 = vadd.f32 %v1046_v10, %v4299_v47  ;;  %v1114_v32 = vpop.f32.mrf.mxu1  ;;  %1373 = vmatmul.f32.gmra.mxu1 %v3709_v40  ;;  %v413_v40 = vld [vmem:[#allocation5 + $0x5f0] sm:$0xff] }
 0x1a2   :  { %1438 = vmatmul.f32.gmra.mxu2 %v3710_v43  ;;  %v285_v43 = vld [vmem:[#allocation5 + $0x1f0] sm:$0xff] }
 0x1a3   :  { %v1112_v18 = vadd.f32 %v1111_v12, %v1047_v41  ;;  %1305 = vmatmul.f32.gmra.mxu0 %v3704_v55  ;;  %1503 = vmatmul.f32.gmra.mxu3 %v3711_v44  ;;  %v3716_v41 = vld [vmem:[#allocation2 + $0x2c0] sm:$0xff]  ;;  %v3719_v55 = vld [vmem:[#allocation2 + $0x2d8] sm:$0xff]  ;;  %v477_v44 = vld [vmem:[#allocation5 + $0x7f0] sm:$0xff] }
 0x1a4   :  { %1915 = vmatpush.msra.mxu2 %v413_v40  ;;  %1785 = vmatpush.msra.mxu0 %v285_v43  ;;  %v273_v40 = vld [vmem:[#allocation5 + $0x190] sm:$0xff] }
 0x1a5   :  { %v1177_v47 = vadd.f32 %v1176_v30, %v1112_v18  ;;  %v1179_v49 = vpop.f32.mrf.mxu2  ;;  %v3718_v18 = vld [vmem:[#allocation2 + $0x2d0] sm:$0xff]  ;;  %v544_v30 = vld [vmem:[#allocation5 + $0xa08] sm:$0xff]  ;;  %1980 = vmatpush.msra.mxu3 %v477_v44 }
 0x1a6   :  { %v1244_v54 = vpop.f32.mrf.mxu3  ;;  %1605 = vmatpush.msrb.mxu1 %v544_v30 }
 0x1a7   :  { %v4347_v36 = vadd.f32 %v1241_v35, %v1177_v47  ;;  %v3721_v35 = vld [vmem:[#allocation2 + $0x308] sm:$0xff] }
 0x1a8   :  { %v1049_v31 = vpop.f32.mrf.mxu0 }
 0x1a9   :  { %v1050_v58 = vadd.f32 %v1049_v31, %v4302_v1  ;;  %v1117_v52 = vpop.f32.mrf.mxu1  ;;  %1376 = vmatmul.f32.gmra.mxu1 %v3713_v60  ;;  %v3727_v60 = vld [vmem:[#allocation2 + $0x358] sm:$0xff] }
 0x1aa   :  { %1441 = vmatmul.f32.gmra.mxu2 %v3714_v62  ;;  %v281_v62 = vld [vmem:[#allocation5 + $0x1d0] sm:$0xff] }
 0x1ab   :  { %v1115_v37 = vadd.f32 %v1114_v32, %v1050_v58  ;;  %1308 = vmatmul.f32.gmra.mxu0 %v3708_v7  ;;  %1506 = vmatmul.f32.gmra.mxu3 %v3715_v63  ;;  %v3720_v58 = vld [vmem:[#allocation2 + $0x300] sm:$0xff]  ;;  %v3723_v7 = vld [vmem:[#allocation2 + $0x318] sm:$0xff]  ;;  %v473_v63 = vld [vmem:[#allocation5 + $0x7d0] sm:$0xff] }
 0x1ac   :  { %1786 = vmatpush.msra.mxu0 %v281_v62  ;;  %1981 = vmatpush.msra.mxu3 %v473_v63  ;;  %v461_v62 = vld [vmem:[#allocation5 + $0x770] sm:$0xff] }
 0x1ad   :  { %v1180_v1 = vadd.f32 %v1179_v49, %v1115_v37  ;;  %v1182_v4 = vpop.f32.mrf.mxu2  ;;  %v3722_v37 = vld [vmem:[#allocation2 + $0x310] sm:$0xff] }
 0x1ae   :  { %v1247_v10 = vpop.f32.mrf.mxu3  ;;  %v349_v49 = vld [vmem:[#allocation5 + $0x3f0] sm:$0xff] }
 0x1af   :  { %v4350_v56 = vadd.f32 %v1244_v54, %v1180_v1  ;;  %1850 = vmatpush.msra.mxu1 %v349_v49  ;;  %v3725_v54 = vld [vmem:[#allocation2 + $0x348] sm:$0xff] }
 0x1b0   :  { %v1052_v51 = vpop.f32.mrf.mxu0 }
 0x1b1   :  { %v1053_v11 = vadd.f32 %v1052_v51, %v4305_v20  ;;  %v1120_v8 = vpop.f32.mrf.mxu1  ;;  %1379 = vmatmul.f32.gmra.mxu1 %v3717_v16  ;;  %v3731_v16 = vld [vmem:[#allocation2 + $0x398] sm:$0xff] }
 0x1b2   :  { %1444 = vmatmul.f32.gmra.mxu2 %v3718_v18  ;;  %v277_v18 = vld [vmem:[#allocation5 + $0x1b0] sm:$0xff] }
 0x1b3   :  { %v1118_v57 = vadd.f32 %v1117_v52, %v1053_v11  ;;  %1311 = vmatmul.f32.gmra.mxu0 %v3712_v24  ;;  %1509 = vmatmul.f32.gmra.mxu3 %v3719_v55  ;;  %v3724_v11 = vld [vmem:[#allocation2 + $0x340] sm:$0xff]  ;;  %v409_v24 = vld [vmem:[#allocation5 + $0x5d0] sm:$0xff] }
 0x1b4   :  { %1916 = vmatpush.msra.mxu2 %v409_v24  ;;  %v469_v55 = vld [vmem:[#allocation5 + $0x7b0] sm:$0xff]  ;;  %1787 = vmatpush.msra.mxu0 %v277_v18  ;;  %v3740_v24 = vld [vmem:[#allocation2 + $0x38] sm:$0xff] }
 0x1b5   :  { %v1183_v20 = vadd.f32 %v1182_v4, %v1118_v57  ;;  %v1185_v25 = vpop.f32.mrf.mxu2  ;;  %v3726_v57 = vld [vmem:[#allocation2 + $0x350] sm:$0xff]  ;;  %1982 = vmatpush.msra.mxu3 %v469_v55 }
 0x1b6   :  { %v1250_v31 = vpop.f32.mrf.mxu3  ;;  %v345_v4 = vld [vmem:[#allocation5 + $0x3d0] sm:$0xff]  ;;  %1788 = vmatpush.msra.mxu0 %v273_v40 }
 0x1b7   :  { %v4353_v12 = vadd.f32 %v1247_v10, %v1183_v20  ;;  %1851 = vmatpush.msra.mxu1 %v345_v4  ;;  %v3729_v10 = vld [vmem:[#allocation2 + $0x388] sm:$0xff]  ;;  %v265_v18 = vld [vmem:[#allocation5 + $0x150] sm:$0xff] }
 0x1b8   :  { %v1055_v6 = vpop.f32.mrf.mxu0  ;;  %v457_v55 = vld [vmem:[#allocation5 + $0x750] sm:$0xff] }
 0x1b9   :  { %v1056_v29 = vadd.f32 %v1055_v6, %v4308_v38  ;;  %v1123_v28 = vpop.f32.mrf.mxu1  ;;  %1382 = vmatmul.f32.gmra.mxu1 %v3721_v35  ;;  %v3735_v35 = vld [vmem:[#allocation2 + $0x3d8] sm:$0xff]  ;;  %v261_v40 = vld [vmem:[#allocation5 + $0x130] sm:$0xff] }
 0x1ba   :  { %1447 = vmatmul.f32.gmra.mxu2 %v3722_v37  ;;  %v3736_v37 = vld [vmem:[#allocation7] sm:$0xf] }
 0x1bb   :  { %v1121_v13 = vadd.f32 %v1120_v8, %v1056_v29  ;;  %1314 = vmatmul.f32.gmra.mxu0 %v3716_v41  ;;  %1512 = vmatmul.f32.gmra.mxu3 %v3723_v7  ;;  %v3728_v29 = vld [vmem:[#allocation2 + $0x380] sm:$0xff]  ;;  %v405_v41 = vld [vmem:[#allocation5 + $0x5b0] sm:$0xff]  ;;  %v4367_v7 = vperm.slane %v3736_v37, 1  ;;  %v3748_v37 = vld [vmem:[#allocation2 + $0xb8] sm:$0xff] }
 0x1bc   :  { %1917 = vmatpush.msra.mxu2 %v405_v41  ;;  %v393_v41 = vld [vmem:[#allocation5 + $0x550] sm:$0xff] }
 0x1bd   :  { %v1186_v38 = vadd.f32 %v1185_v25, %v1121_v13  ;;  %v1188_v45 = vpop.f32.mrf.mxu2  ;;  %v3730_v13 = vld [vmem:[#allocation2 + $0x390] sm:$0xff] }
 0x1be   :  { %v1253_v51 = vpop.f32.mrf.mxu3  ;;  %v341_v25 = vld [vmem:[#allocation5 + $0x3b0] sm:$0xff] }
 0x1bf   :  { %v4356_v32 = vadd.f32 %v1250_v31, %v1186_v38  ;;  %1852 = vmatpush.msra.mxu1 %v341_v25  ;;  %v3733_v31 = vld [vmem:[#allocation2 + $0x3c8] sm:$0xff]  ;;  %v329_v25 = vld [vmem:[#allocation5 + $0x350] sm:$0xff] }
 0x1c0   :  { %v1058_v27 = vpop.f32.mrf.mxu0 }
 0x1c1   :  { %v1059_v47 = vadd.f32 %v1058_v27, %v4311_v59  ;;  %5090 = vst [vmem:[#allocation16_spill] sm:$0xff] %v4356_v32  ;;  %v1126_v48 = vpop.f32.mrf.mxu1  ;;  %1385 = vmatmul.f32.gmra.mxu1 %v3725_v54  ;;  %v3739_v54 = vld [vmem:[#allocation2 + $0x30] sm:$0xff] }
 0x1c2   :  { %1450 = vmatmul.f32.gmra.mxu2 %v3726_v57  ;;  %v397_v57 = vld [vmem:[#allocation5 + $0x570] sm:$0xff] }
 0x1c3   :  { %v1124_v33 = vadd.f32 %v1123_v28, %v1059_v47  ;;  %1317 = vmatmul.f32.gmra.mxu0 %v3720_v58  ;;  %1515 = vmatmul.f32.gmra.mxu3 %v3727_v60  ;;  %v3732_v47 = vld [vmem:[#allocation2 + $0x3c0] sm:$0xff]  ;;  %v401_v58 = vld [vmem:[#allocation5 + $0x590] sm:$0xff] }
 0x1c4   :  { %1918 = vmatpush.msra.mxu2 %v401_v58  ;;  %v269_v60 = vld [vmem:[#allocation5 + $0x170] sm:$0xff] }
 0x1c5   :  { %v1189_v59 = vadd.f32 %v1188_v45, %v1124_v33  ;;  %v3734_v33 = vld [vmem:[#allocation2 + $0x3d0] sm:$0xff]  ;;  %1789 = vmatpush.msra.mxu0 %v269_v60  ;;  %v3752_v60 = vld [vmem:[#allocation2 + $0xf8] sm:$0xff] }
 0x1c6   :  { %v1256_v6 = vpop.f32.mrf.mxu3  ;;  %1919 = vmatpush.msra.mxu2 %v397_v57  ;;  %v3747_v58 = vld [vmem:[#allocation2 + $0xb0] sm:$0xff] }
 0x1c7   :  { %v4359_v52 = vadd.f32 %v1253_v51, %v1189_v59  ;;  %v3737_v51 = vld [vmem:[#allocation2 + $0x20] sm:$0xff]  ;;  %1790 = vmatpush.msra.mxu0 %v265_v18  ;;  %v3751_v57 = vld [vmem:[#allocation2 + $0xf0] sm:$0xff] }
 0x1c8   :  { %v1061_v46 = vpop.f32.mrf.mxu0  ;;  %1920 = vmatpush.msra.mxu2 %v393_v41  ;;  %v381_v18 = vld [vmem:[#allocation5 + $0x4f0] sm:$0xff] }
 0x1c9   :  { %v1062_v1 = vadd.f32 %v1061_v46, %v4314_v15  ;;  %5091 = vst [vmem:[#allocation17_spill] sm:$0xff] %v4359_v52  ;;  %v1191_v15 = vpop.f32.mrf.mxu2  ;;  %v1129_v3 = vpop.f32.mrf.mxu1  ;;  %1388 = vmatmul.f32.gmra.mxu1 %v3729_v10  ;;  %v337_v46 = vld [vmem:[#allocation5 + $0x390] sm:$0xff]  ;;  %1791 = vmatpush.msra.mxu0 %v261_v40 }
 0x1ca   :  { %1453 = vmatmul.f32.gmra.mxu2 %v3730_v13  ;;  %1853 = vmatpush.msra.mxu1 %v337_v46  ;;  %v3743_v13 = vld [vmem:[#allocation2 + $0x70] sm:$0xff] }
 0x1cb   :  { %v1127_v53 = vadd.f32 %v1126_v48, %v1062_v1  ;;  %1320 = vmatmul.f32.gmra.mxu0 %v3724_v11  ;;  %1518 = vmatmul.f32.gmra.mxu3 %v3731_v16  ;;  %v3744_v16 = vld [vmem:[#allocation2 + $0x78] sm:$0xff]  ;;  %v325_v46 = vld [vmem:[#allocation5 + $0x330] sm:$0xff] }
 0x1cc   :  { %v3759_v40 = vld [vmem:[#allocation2 + $0x170] sm:$0xff] }
 0x1cd   :  { %v1192_v39 = vadd.f32 %v1191_v15, %v1127_v53  ;;  %v3738_v53 = vld [vmem:[#allocation2 + $0x28] sm:$0xff]  ;;  %v2987_v32 = vld [vmem:[#allocation8 + $0x110] sm:$0xff] }
 0x1ce   :  { %v1259_v27 = vpop.f32.mrf.mxu3 }
 0x1cf   :  { %v4362_v8 = vadd.f32 %v1256_v6, %v1192_v39 }
 0x1d0   :  { %v1064_v2 = vpop.f32.mrf.mxu0 }
 0x1d1   :  { %v1065_v20 = vadd.f32 %v1064_v2, %v4317_v34  ;;  %5092 = vst [vmem:[#allocation18_spill] sm:$0xff] %v4362_v8  ;;  %v1194_v34 = vpop.f32.mrf.mxu2  ;;  %v1132_v23 = vpop.f32.mrf.mxu1  ;;  %1391 = vmatmul.f32.gmra.mxu1 %v3733_v31  ;;  %v3746_v31 = vld [vmem:[#allocation2 + $0xa8] sm:$0xff] }
 0x1d2   :  { %1456 = vmatmul.f32.gmra.mxu2 %v3734_v33 }
 0x1d3   :  { %v1130_v9 = vadd.f32 %v1129_v3, %v1065_v20  ;;  %1323 = vmatmul.f32.gmra.mxu0 %v3728_v29  ;;  %1521 = vmatmul.f32.gmra.mxu3 %v3735_v35  ;;  %v333_v3 = vld [vmem:[#allocation5 + $0x370] sm:$0xff]  ;;  %v3742_v29 = vld [vmem:[#allocation2 + $0x68] sm:$0xff] }
 0x1d4   :  { %1854 = vmatpush.msra.mxu1 %v333_v3  ;;  %v389_v35 = vld [vmem:[#allocation5 + $0x530] sm:$0xff] }
 0x1d5   :  { %v1195_v19 = vadd.f32 %v1194_v34, %v1130_v9  ;;  %v3741_v9 = vld [vmem:[#allocation2 + $0x60] sm:$0xff]  ;;  %1921 = vmatpush.msra.mxu2 %v389_v35  ;;  %v3758_v35 = vld [vmem:[#allocation2 + $0x168] sm:$0xff] }
 0x1d6   :  { %v1262_v48 = vpop.f32.mrf.mxu3  ;;  %1855 = vmatpush.msra.mxu1 %v329_v25 }
 0x1d7   :  { %v4365_v28 = vadd.f32 %v1259_v27, %v1195_v19 }
 0x1d8   :  { %v1067_v22 = vpop.f32.mrf.mxu0  ;;  %1856 = vmatpush.msra.mxu1 %v325_v46 }
 0x1d9   :  { %v1068_v38 = vadd.f32 %v1067_v22, %v4320_v50  ;;  %5093 = vst [vmem:[#allocation19_spill] sm:$0xff] %v4365_v28  ;;  %v465_v50 = vld [vmem:[#allocation5 + $0x790] sm:$0xff]  ;;  %v1197_v43 = vpop.f32.mrf.mxu2  ;;  %v1347_v59 = vpop.f32.mrf.mxu1  ;;  %1606 = vmatmul.f32.vlgmr.msrb.gmra.mxu1 %v3738_v53  ;;  %v3749_v53 = vld [vmem:[#allocation2 + $0xe0] sm:$0xff] }
 0x1da   :  { %1983 = vmatpush.msra.mxu3 %v465_v50  ;;  %1671 = vmatmul.f32.vlgmr.msrb.gmra.mxu2 %v3739_v54  ;;  %v453_v50 = vld [vmem:[#allocation5 + $0x730] sm:$0xff] }
 0x1db   :  { %v1133_v30 = vadd.f32 %v1132_v23, %v1068_v38  ;;  %1326 = vmatmul.f32.gmra.mxu0 %v3732_v47  ;;  %1736 = vmatmul.f32.vlgmr.msrb.gmra.mxu3 %v3740_v24  ;;  %v3745_v47 = vld [vmem:[#allocation2 + $0xa0] sm:$0xff]  ;;  %v385_v24 = vld [vmem:[#allocation5 + $0x510] sm:$0xff] }
 0x1dc   :  { %1984 = vmatpush.msra.mxu3 %v461_v62  ;;  %1922 = vmatpush.msra.mxu2 %v385_v24  ;;  %v257_v62 = vld [vmem:[#allocation5 + $0x110] sm:$0xff]  ;;  %v3761_v24 = vld [vmem:[#allocation2 + $0x1a0] sm:$0xff] }
 0x1dd   :  { %v1198_v44 = vadd.f32 %v1197_v43, %v1133_v30  ;;  %1792 = vmatpush.msra.mxu0 %v257_v62 }
 0x1de   :  { %v1477_v20 = vpop.f32.mrf.mxu3  ;;  %1985 = vmatpush.msra.mxu3 %v457_v55  ;;  %v3756_v55 = vld [vmem:[#allocation2 + $0x138] sm:$0xff]  ;;  %1923 = vmatpush.msra.mxu2 %v381_v18 }
 0x1df   :  { %v4370_v1 = vadd.f32 %v1262_v48, %v1198_v44 }
 0x1e0   :  { %v1282_v45 = vpop.f32.mrf.mxu0  ;;  %1986 = vmatpush.msra.mxu3 %v453_v50  ;;  %v377_v50 = vld [vmem:[#allocation5 + $0x4d0] sm:$0xff] }
 0x1e1   :  { %v1283_v49 = vadd.f32 %v1282_v45, %v4367_v7  ;;  %5094 = vst [vmem:[#allocation20_spill] sm:$0xff] %v4370_v1  ;;  %v1412_v63 = vpop.f32.mrf.mxu2  ;;  %v1350_v2 = vpop.f32.mrf.mxu1  ;;  %1609 = vmatmul.f32.gmra.mxu1 %v3742_v29  ;;  %1924 = vmatpush.msra.mxu2 %v377_v50 }
 0x1e2   :  { %1674 = vmatmul.f32.gmra.mxu2 %v3743_v13  ;;  %v3754_v13 = vld [vmem:[#allocation2 + $0x128] sm:$0xff] }
 0x1e3   :  { %1541 = vmatmul.f32.vlgmr.msrb.gmra.mxu0 %v3737_v51  ;;  %v1348_v11 = vadd.f32 %v1347_v59, %v1283_v49  ;;  %1739 = vmatmul.f32.gmra.mxu3 %v3744_v16  ;;  %v3755_v16 = vld [vmem:[#allocation2 + $0x130] sm:$0xff] }
 0x1e5   :  { %v1413_v15 = vadd.f32 %v1412_v63, %v1348_v11  ;;  %v3750_v11 = vld [vmem:[#allocation2 + $0xe8] sm:$0xff]  ;;  %v449_v63 = vld [vmem:[#allocation5 + $0x710] sm:$0xff] }
 0x1e6   :  { %v1480_v27 = vpop.f32.mrf.mxu3  ;;  %1987 = vmatpush.msra.mxu3 %v449_v63  ;;  %v3763_v63 = vld [vmem:[#allocation2 + $0x1b0] sm:$0xff] }
 0x1e7   :  { %v4373_v6 = vadd.f32 %v1477_v20, %v1413_v15 }
 0x1e8   :  { %v1285_v39 = vpop.f32.mrf.mxu0 }
 0x1e9   :  { %v1286_v4 = vadd.f32 %v1285_v39, %v4367_v7  ;;  %v1415_v34 = vpop.f32.mrf.mxu2  ;;  %v1353_v23 = vpop.f32.mrf.mxu1  ;;  %1612 = vmatmul.f32.gmra.mxu1 %v3746_v31 }
 0x1ea   :  { %1677 = vmatmul.f32.gmra.mxu2 %v3747_v58  ;;  %v3757_v58 = vld [vmem:[#allocation2 + $0x160] sm:$0xff] }
 0x1eb   :  { %1544 = vmatmul.f32.gmra.mxu0 %v3741_v9  ;;  %v1351_v10 = vadd.f32 %v1350_v2, %v1286_v4  ;;  %1742 = vmatmul.f32.gmra.mxu3 %v3748_v37  ;;  %v321_v4 = vld [vmem:[#allocation5 + $0x310] sm:$0xff] }
 0x1ec   :  { %1857 = vmatpush.msra.mxu1 %v321_v4 }
 0x1ed   :  { %v1416_v19 = vadd.f32 %v1415_v34, %v1351_v10  ;;  %v3753_v10 = vld [vmem:[#allocation2 + $0x120] sm:$0xff]  ;;  %v253_v34 = vld [vmem:[#allocation5 + $0xf0] sm:$0xff] }
 0x1ee   :  { %v1483_v49 = vpop.f32.mrf.mxu3  ;;  %1793 = vmatpush.msra.mxu0 %v253_v34  ;;  %v3766_v34 = vld [vmem:[#allocation2 + $0x1e8] sm:$0xff] }
 0x1ef   :  { %v4376_v30 = vadd.f32 %v1480_v27, %v1416_v19  ;;  %v445_v19 = vld [vmem:[#allocation5 + $0x6f0] sm:$0xff] }
 0x1f0   :  { %v1288_v22 = vpop.f32.mrf.mxu0  ;;  %1988 = vmatpush.msra.mxu3 %v445_v19  ;;  %v317_v27 = vld [vmem:[#allocation5 + $0x2f0] sm:$0xff] }
 0x1f1   :  { %v1289_v38 = vadd.f32 %v1288_v22, %v4367_v7  ;;  %v1418_v43 = vpop.f32.mrf.mxu2  ;;  %v1356_v59 = vpop.f32.mrf.mxu1  ;;  %1615 = vmatmul.f32.gmra.mxu1 %v3750_v11 }
 0x1f2   :  { %1680 = vmatmul.f32.gmra.mxu2 %v3751_v57  ;;  %1858 = vmatpush.msra.mxu1 %v317_v27  ;;  %v433_v27 = vld [vmem:[#allocation5 + $0x690] sm:$0xff] }
 0x1f3   :  { %1547 = vmatmul.f32.gmra.mxu0 %v3745_v47  ;;  %v1354_v33 = vadd.f32 %v1353_v23, %v1289_v38  ;;  %1745 = vmatmul.f32.gmra.mxu3 %v3752_v60  ;;  %v3762_v60 = vld [vmem:[#allocation2 + $0x1a8] sm:$0xff] }
 0x1f5   :  { %v1419_v44 = vadd.f32 %v1418_v43, %v1354_v33  ;;  %v3760_v43 = vld [vmem:[#allocation2 + $0x178] sm:$0xff] }
 0x1f6   :  { %v1486_v9 = vpop.f32.mrf.mxu3 }
 0x1f7   :  { %v4379_v51 = vadd.f32 %v1483_v49, %v1419_v44  ;;  %v249_v44 = vld [vmem:[#allocation5 + $0xd0] sm:$0xff] }
 0x1f8   :  { %v1291_v45 = vpop.f32.mrf.mxu0  ;;  %1794 = vmatpush.msra.mxu0 %v249_v44  ;;  %v3769_v44 = vld [vmem:[#allocation2 + $0x220] sm:$0xff] }
 0x1f9   :  { %v1292_v48 = vadd.f32 %v1291_v45, %v4367_v7  ;;  %v1421_v15 = vpop.f32.mrf.mxu2  ;;  %v1359_v3 = vpop.f32.mrf.mxu1  ;;  %1618 = vmatmul.f32.gmra.mxu1 %v3754_v13  ;;  %v441_v45 = vld [vmem:[#allocation5 + $0x6d0] sm:$0xff] }
 0x1fa   :  { %1683 = vmatmul.f32.gmra.mxu2 %v3755_v16  ;;  %1989 = vmatpush.msra.mxu3 %v441_v45  ;;  %v309_v13 = vld [vmem:[#allocation5 + $0x2b0] sm:$0xff]  ;;  %v3770_v45 = vld [vmem:[#allocation2 + $0x228] sm:$0xff] }
 0x1fb   :  { %1550 = vmatmul.f32.gmra.mxu0 %v3749_v53  ;;  %v1357_v54 = vadd.f32 %v1356_v59, %v1292_v48  ;;  %1748 = vmatmul.f32.gmra.mxu3 %v3756_v55  ;;  %v313_v53 = vld [vmem:[#allocation5 + $0x2d0] sm:$0xff]  ;;  %v3765_v55 = vld [vmem:[#allocation2 + $0x1e0] sm:$0xff] }
 0x1fc   :  { %1859 = vmatpush.msra.mxu1 %v313_v53  ;;  %v237_v53 = vld [vmem:[#allocation5 + $0x70] sm:$0xff] }
 0x1fd   :  { %v1422_v39 = vadd.f32 %v1421_v15, %v1357_v54  ;;  %v373_v15 = vld [vmem:[#allocation5 + $0x4b0] sm:$0xff] }
 0x1fe   :  { %v1489_v31 = vpop.f32.mrf.mxu3  ;;  %1925 = vmatpush.msra.mxu2 %v373_v15  ;;  %1860 = vmatpush.msra.mxu1 %v309_v13  ;;  %v3776_v13 = vld [vmem:[#allocation2 + $0x278] sm:$0xff] }
 0x1ff   :  { %v4382_v29 = vadd.f32 %v1486_v9, %v1422_v39  ;;  %v3764_v39 = vld [vmem:[#allocation2 + $0x1b8] sm:$0xff] }
 0x200   :  { %v1294_v2 = vpop.f32.mrf.mxu0 }
 0x201   :  { %v1295_v20 = vadd.f32 %v1294_v2, %v4367_v7  ;;  %v1424_v22 = vpop.f32.mrf.mxu2  ;;  %v1362_v38 = vpop.f32.mrf.mxu1  ;;  %1621 = vmatmul.f32.gmra.mxu1 %v3758_v35  ;;  %v245_v2 = vld [vmem:[#allocation5 + $0xb0] sm:$0xff] }
 0x202   :  { %1686 = vmatmul.f32.gmra.mxu2 %v3759_v40  ;;  %1795 = vmatpush.msra.mxu0 %v245_v2 }
 0x203   :  { %1553 = vmatmul.f32.gmra.mxu0 %v3753_v10  ;;  %v1360_v41 = vadd.f32 %v1359_v3, %v1295_v20  ;;  %1751 = vmatmul.f32.gmra.mxu3 %v3760_v43  ;;  %v437_v3 = vld [vmem:[#allocation5 + $0x6b0] sm:$0xff] }
 0x204   :  { %1990 = vmatpush.msra.mxu3 %v437_v3  ;;  %v3773_v3 = vld [vmem:[#allocation2 + $0x260] sm:$0xff] }
 0x205   :  { %v1425_v23 = vadd.f32 %v1424_v22, %v1360_v41  ;;  %v3767_v22 = vld [vmem:[#allocation2 + $0x1f0] sm:$0xff] }
 0x206   :  { %v1492_v54 = vpop.f32.mrf.mxu3  ;;  %1991 = vmatpush.msra.mxu3 %v433_v27 }
 0x207   :  { %v4385_v33 = vadd.f32 %v1489_v31, %v1425_v23  ;;  %v369_v23 = vld [vmem:[#allocation5 + $0x490] sm:$0xff] }
 0x208   :  { %v1297_v25 = vpop.f32.mrf.mxu0  ;;  %1926 = vmatpush.msra.mxu2 %v369_v23  ;;  %v297_v23 = vld [vmem:[#allocation5 + $0x250] sm:$0xff] }
 0x209   :  { %v1298_v47 = vadd.f32 %v1297_v25, %v4367_v7  ;;  %v1427_v59 = vpop.f32.mrf.mxu2  ;;  %v1365_v49 = vpop.f32.mrf.mxu1  ;;  %1624 = vmatmul.f32.gmra.mxu1 %v3762_v60  ;;  %v3768_v25 = vld [vmem:[#allocation2 + $0x1f8] sm:$0xff] }
 0x20a   :  { %1689 = vmatmul.f32.gmra.mxu2 %v3763_v63  ;;  %v301_v63 = vld [vmem:[#allocation5 + $0x270] sm:$0xff] }
 0x20b   :  { %1556 = vmatmul.f32.gmra.mxu0 %v3757_v58  ;;  %v1363_v37 = vadd.f32 %v1362_v38, %v1298_v47  ;;  %1754 = vmatmul.f32.gmra.mxu3 %v3764_v39  ;;  %v241_v38 = vld [vmem:[#allocation5 + $0x90] sm:$0xff] }
 0x20c   :  { %1796 = vmatpush.msra.mxu0 %v241_v38 }
 0x20d   :  { %v1428_v46 = vadd.f32 %v1427_v59, %v1363_v37  ;;  %v305_v37 = vld [vmem:[#allocation5 + $0x290] sm:$0xff] }
 0x20e   :  { %v1495_v16 = vpop.f32.mrf.mxu3  ;;  %1861 = vmatpush.msra.mxu1 %v305_v37  ;;  %1797 = vmatpush.msra.mxu0 %v237_v53  ;;  %v357_v37 = vld [vmem:[#allocation5 + $0x430] sm:$0xff] }
 0x20f   :  { %v4388_v57 = vadd.f32 %v1492_v54, %v1428_v46  ;;  %v3771_v46 = vld [vmem:[#allocation2 + $0x230] sm:$0xff] }
 0x210   :  { %v1300_v48 = vpop.f32.mrf.mxu0  ;;  %1862 = vmatpush.msra.mxu1 %v301_v63  ;;  %v3783_v63 = vld [vmem:[#allocation2 + $0x2f0] sm:$0xff] }
 0x211   :  { %v1301_v11 = vadd.f32 %v1300_v48, %v4367_v7  ;;  %v1430_v4 = vpop.f32.mrf.mxu2  ;;  %v1368_v10 = vpop.f32.mrf.mxu1  ;;  %1627 = vmatmul.f32.gmra.mxu1 %v3766_v34  ;;  %v365_v48 = vld [vmem:[#allocation5 + $0x470] sm:$0xff] }
 0x212   :  { %1692 = vmatmul.f32.gmra.mxu2 %v3767_v22  ;;  %1863 = vmatpush.msra.mxu1 %v297_v23 }
 0x213   :  { %1559 = vmatmul.f32.gmra.mxu0 %v3761_v24  ;;  %v1366_v62 = vadd.f32 %v1365_v49, %v1301_v11  ;;  %1757 = vmatmul.f32.gmra.mxu3 %v3768_v25  ;;  %v3772_v49 = vld [vmem:[#allocation2 + $0x238] sm:$0xff]  ;;  %v429_v11 = vld [vmem:[#allocation5 + $0x670] sm:$0xff] }
 0x214   :  { %1927 = vmatpush.msra.mxu2 %v365_v48  ;;  %1992 = vmatpush.msra.mxu3 %v429_v11 }
 0x215   :  { %v1431_v20 = vadd.f32 %v1430_v4, %v1366_v62  ;;  %v3774_v4 = vld [vmem:[#allocation2 + $0x268] sm:$0xff] }
 0x216   :  { %v1498_v50 = vpop.f32.mrf.mxu3 }
 0x217   :  { %v4391_v18 = vadd.f32 %v1495_v16, %v1431_v20  ;;  %v425_v16 = vld [vmem:[#allocation5 + $0x650] sm:$0xff] }
 0x218   :  { %v1303_v9 = vpop.f32.mrf.mxu0  ;;  %1993 = vmatpush.msra.mxu3 %v425_v16 }
 0x219   :  { %v1304_v41 = vadd.f32 %v1303_v9, %v4367_v7  ;;  %v1433_v47 = vpop.f32.mrf.mxu2  ;;  %v1371_v35 = vpop.f32.mrf.mxu1  ;;  %1630 = vmatmul.f32.gmra.mxu1 %v3770_v45  ;;  %v3775_v9 = vld [vmem:[#allocation2 + $0x270] sm:$0xff] }
 0x21a   :  { %1695 = vmatmul.f32.gmra.mxu2 %v3771_v46 }
 0x21b   :  { %1562 = vmatmul.f32.gmra.mxu0 %v3765_v55  ;;  %v1369_v19 = vadd.f32 %v1368_v10, %v1304_v41  ;;  %1760 = vmatmul.f32.gmra.mxu3 %v3772_v49  ;;  %v361_v10 = vld [vmem:[#allocation5 + $0x450] sm:$0xff] }
 0x21c   :  { %1928 = vmatpush.msra.mxu2 %v361_v10  ;;  %v233_v41 = vld [vmem:[#allocation5 + $0x50] sm:$0xff] }
 0x21d   :  { %v1434_v31 = vadd.f32 %v1433_v47, %v1369_v19  ;;  %1798 = vmatpush.msra.mxu0 %v233_v41  ;;  %v3777_v47 = vld [vmem:[#allocation2 + $0x2a0] sm:$0xff]  ;;  %v293_v49 = vld [vmem:[#allocation5 + $0x230] sm:$0xff] }
 0x21e   :  { %v1501_v39 = vpop.f32.mrf.mxu3  ;;  %1929 = vmatpush.msra.mxu2 %v357_v37  ;;  %1864 = vmatpush.msra.mxu1 %v293_v49  ;;  %v289_v41 = vld [vmem:[#allocation5 + $0x210] sm:$0xff]  ;;  %v3790_v49 = vld [vmem:[#allocation2 + $0x368] sm:$0xff] }
 0x21f   :  { %v4394_v43 = vadd.f32 %v1498_v50, %v1434_v31  ;;  %v3778_v31 = vld [vmem:[#allocation2 + $0x2a8] sm:$0xff]  ;;  %v229_v50 = vld [vmem:[#allocation5 + $0x30] sm:$0xff] }
 0x220   :  { %v1306_v58 = vpop.f32.mrf.mxu0  ;;  %1799 = vmatpush.msra.mxu0 %v229_v50  ;;  %1865 = vmatpush.msra.mxu1 %v289_v41  ;;  %v3793_v41 = vld [vmem:[#allocation2 + $0x3a0] sm:$0xff] }
 0x221   :  { %v1307_v40 = vadd.f32 %v1306_v58, %v4367_v7  ;;  %v1436_v54 = vpop.f32.mrf.mxu2  ;;  %v1374_v62 = vpop.f32.mrf.mxu1  ;;  %1633 = vmatmul.f32.gmra.mxu1 %v3774_v4  ;;  %v417_v4 = vld [vmem:[#allocation5 + $0x610] sm:$0xff] }
 0x222   :  { %1698 = vmatmul.f32.gmra.mxu2 %v3775_v9 }
 0x223   :  { %1565 = vmatmul.f32.gmra.mxu0 %v3769_v44  ;;  %v1372_v59 = vadd.f32 %v1371_v35, %v1307_v40  ;;  %1763 = vmatmul.f32.gmra.mxu3 %v3776_v13  ;;  %v3779_v35 = vld [vmem:[#allocation2 + $0x2b0] sm:$0xff]  ;;  %v3780_v40 = vld [vmem:[#allocation2 + $0x2b8] sm:$0xff] }
 0x224   :  { %v421_v44 = vld [vmem:[#allocation5 + $0x630] sm:$0xff] }
 0x225   :  { %v1437_v24 = vadd.f32 %v1436_v54, %v1372_v59  ;;  %1994 = vmatpush.msra.mxu3 %v421_v44  ;;  %v605_v44 = vld [vmem:[#allocation5 + $0xbf0] sm:$0xff] }
 0x226   :  { %v1504_v38 = vpop.f32.mrf.mxu3  ;;  %2110 = vmatpush.msrb.mxu1 %v605_v44 }
 0x227   :  { %v4397_v2 = vadd.f32 %v1501_v39, %v1437_v24  ;;  %v3781_v24 = vld [vmem:[#allocation2 + $0x2e0] sm:$0xff]  ;;  %v3784_v39 = vld [vmem:[#allocation2 + $0x2f8] sm:$0xff]  ;;  %1995 = vmatpush.msra.mxu3 %v417_v4 }
 0x228   :  { %v1309_v60 = vpop.f32.mrf.mxu0 }
 0x229   :  { %v1310_v15 = vadd.f32 %v1309_v60, %v4367_v7  ;;  %v1439_v55 = vpop.f32.mrf.mxu2  ;;  %v1377_v22 = vpop.f32.mrf.mxu1  ;;  %1636 = vmatmul.f32.gmra.mxu1 %v3778_v31  ;;  %v3782_v60 = vld [vmem:[#allocation2 + $0x2e8] sm:$0xff]  ;;  %v541_v31 = vld [vmem:[#allocation5 + $0x9f0] sm:$0xff] }
 0x22a   :  { %1701 = vmatmul.f32.gmra.mxu2 %v3779_v35 }
 0x22b   :  { %1568 = vmatmul.f32.gmra.mxu0 %v3773_v3  ;;  %v1375_v20 = vadd.f32 %v1374_v62, %v1310_v15  ;;  %1766 = vmatmul.f32.gmra.mxu3 %v3780_v40  ;;  %v353_v15 = vld [vmem:[#allocation5 + $0x410] sm:$0xff] }
 0x22c   :  { %1930 = vmatpush.msra.mxu2 %v353_v15  ;;  %v225_v3 = vld [vmem:[#allocation5 + $0x10] sm:$0xff] }
 0x22d   :  { %v1440_v34 = vadd.f32 %v1439_v55, %v1375_v20  ;;  %1800 = vmatpush.msra.mxu0 %v225_v3 }
 0x22e   :  { %v1507_v11 = vpop.f32.mrf.mxu3 }
 0x22f   :  { %v4400_v27 = vadd.f32 %v1504_v38, %v1440_v34  ;;  %v669_v38 = vld [vmem:[#allocation5 + $0xdf0] sm:$0xff]  ;;  %2045 = vmatpush.msrb.mxu0 %v541_v31 }
 0x230   :  { %v1312_v19 = vpop.f32.mrf.mxu0  ;;  %2175 = vmatpush.msrb.mxu2 %v669_v38  ;;  %v725_v38 = vld [vmem:[#allocation5 + $0xfb0] sm:$0xff] }
 0x231   :  { %v1313_v25 = vadd.f32 %v1312_v19, %v4367_v7  ;;  %v1442_v45 = vpop.f32.mrf.mxu2  ;;  %v1380_v48 = vpop.f32.mrf.mxu1  ;;  %1639 = vmatmul.f32.gmra.mxu1 %v3782_v60  ;;  %v3785_v19 = vld [vmem:[#allocation2 + $0x320] sm:$0xff]  ;;  %v665_v60 = vld [vmem:[#allocation5 + $0xdd0] sm:$0xff] }
 0x232   :  { %1704 = vmatmul.f32.gmra.mxu2 %v3783_v63  ;;  %v729_v63 = vld [vmem:[#allocation5 + $0xfd0] sm:$0xff] }
 0x233   :  { %1571 = vmatmul.f32.gmra.mxu0 %v3777_v47  ;;  %v1378_v58 = vadd.f32 %v1377_v22, %v1313_v25  ;;  %1769 = vmatmul.f32.gmra.mxu3 %v3784_v39  ;;  %v3786_v22 = vld [vmem:[#allocation2 + $0x328] sm:$0xff]  ;;  %v3787_v25 = vld [vmem:[#allocation2 + $0x330] sm:$0xff]  ;;  %v3788_v47 = vld [vmem:[#allocation2 + $0x338] sm:$0xff] }
 0x234   :  { %2176 = vmatpush.msrb.mxu2 %v665_v60  ;;  %v721_v60 = vld [vmem:[#allocation5 + $0xf90] sm:$0xff] }
 0x235   :  { %v1443_v59 = vadd.f32 %v1442_v45, %v1378_v58  ;;  %v733_v58 = vld [vmem:[#allocation5 + $0xff0] sm:$0xff] }
 0x236   :  { %v1510_v55 = vpop.f32.mrf.mxu3  ;;  %2240 = vmatpush.msrb.mxu3 %v733_v58 }
 0x237   :  { %v4403_v54 = vadd.f32 %v1507_v11, %v1443_v59  ;;  %v3791_v11 = vld [vmem:[#allocation2 + $0x370] sm:$0xff] }
 0x238   :  { %v1315_v46 = vpop.f32.mrf.mxu0  ;;  %2241 = vmatpush.msrb.mxu3 %v729_v63 }
 0x239   :  { %v1316_v53 = vadd.f32 %v1315_v46, %v4367_v7  ;;  %v1445_v20 = vpop.f32.mrf.mxu2  ;;  %v1383_v13 = vpop.f32.mrf.mxu1  ;;  %1642 = vmatmul.f32.gmra.mxu1 %v3786_v22  ;;  %v3796_v22 = vld [vmem:[#allocation2 + $0x3b8] sm:$0xff] }
 0x23a   :  { %1707 = vmatmul.f32.gmra.mxu2 %v3787_v25  ;;  %v533_v25 = vld [vmem:[#allocation5 + $0x9b0] sm:$0xff]  ;;  %2242 = vmatpush.msrb.mxu3 %v725_v38 }
 0x23b   :  { %1574 = vmatmul.f32.gmra.mxu0 %v3781_v24  ;;  %v1381_v62 = vadd.f32 %v1380_v48, %v1316_v53  ;;  %1772 = vmatmul.f32.gmra.mxu3 %v3788_v47  ;;  %v3789_v48 = vld [vmem:[#allocation2 + $0x360] sm:$0xff]  ;;  %v3792_v24 = vld [vmem:[#allocation2 + $0x378] sm:$0xff] }
 0x23c   :  { %2243 = vmatpush.msrb.mxu3 %v721_v60 }
 0x23d   :  { %v1446_v9 = vadd.f32 %v1445_v20, %v1381_v62  ;;  %v537_v62 = vld [vmem:[#allocation5 + $0x9d0] sm:$0xff] }
 0x23e   :  { %v1513_v59 = vpop.f32.mrf.mxu3  ;;  %2046 = vmatpush.msrb.mxu0 %v537_v62  ;;  %v601_v20 = vld [vmem:[#allocation5 + $0xbd0] sm:$0xff] }
 0x23f   :  { %v4406_v34 = vadd.f32 %v1510_v55, %v1446_v9  ;;  %2111 = vmatpush.msrb.mxu1 %v601_v20 }
 0x240   :  { %v1318_v10 = vpop.f32.mrf.mxu0  ;;  %2047 = vmatpush.msrb.mxu0 %v533_v25 }
 0x241   :  { %v1319_v16 = vadd.f32 %v1318_v10, %v4367_v7  ;;  %v1448_v35 = vpop.f32.mrf.mxu2  ;;  %v1386_v50 = vpop.f32.mrf.mxu1  ;;  %1645 = vmatmul.f32.gmra.mxu1 %v3790_v49  ;;  %v3799_v49 = vld [vmem:[#allocation2 + $0x3f0] sm:$0xff] }
 0x242   :  { %1710 = vmatmul.f32.gmra.mxu2 %v3791_v11  ;;  %v657_v11 = vld [vmem:[#allocation5 + $0xd90] sm:$0xff] }
 0x243   :  { %1577 = vmatmul.f32.gmra.mxu0 %v3785_v19  ;;  %v1384_v23 = vadd.f32 %v1383_v13, %v1319_v16  ;;  %1775 = vmatmul.f32.gmra.mxu3 %v3792_v24  ;;  %v3794_v16 = vld [vmem:[#allocation2 + $0x3a8] sm:$0xff]  ;;  %v3795_v19 = vld [vmem:[#allocation2 + $0x3b0] sm:$0xff] }
 0x244   :  { %v529_v24 = vld [vmem:[#allocation5 + $0x990] sm:$0xff] }
 0x245   :  { %v1449_v37 = vadd.f32 %v1448_v35, %v1384_v23  ;;  %v661_v23 = vld [vmem:[#allocation5 + $0xdb0] sm:$0xff]  ;;  %2048 = vmatpush.msrb.mxu0 %v529_v24 }
 0x246   :  { %v1516_v10 = vpop.f32.mrf.mxu3  ;;  %2177 = vmatpush.msrb.mxu2 %v661_v23  ;;  %v717_v23 = vld [vmem:[#allocation5 + $0xf70] sm:$0xff] }
 0x247   :  { %v4409_v46 = vadd.f32 %v1513_v59, %v1449_v37  ;;  %v597_v37 = vld [vmem:[#allocation5 + $0xbb0] sm:$0xff]  ;;  %v3798_v59 = vld [vmem:[#allocation2 + $0x3e8] sm:$0xff]  ;;  %2244 = vmatpush.msrb.mxu3 %v717_v23 }
 0x248   :  { %v1321_v40 = vpop.f32.mrf.mxu0  ;;  %2112 = vmatpush.msrb.mxu1 %v597_v37  ;;  %2178 = vmatpush.msrb.mxu2 %v657_v11  ;;  %v713_v11 = vld [vmem:[#allocation5 + $0xf50] sm:$0xff] }
 0x249   :  { %v1322_v45 = vadd.f32 %v1321_v40, %v4367_v7  ;;  %v1451_v15 = vpop.f32.mrf.mxu2  ;;  %v1389_v4 = vpop.f32.mrf.mxu1  ;;  %1648 = vmatmul.f32.gmra.mxu1 %v3794_v16  ;;  %v3803_v16 = vld [vmem:[#allocation2 + $0x10] sm:$0xff]  ;;  %2245 = vmatpush.msrb.mxu3 %v713_v11 }
 0x24a   :  { %1713 = vmatmul.f32.gmra.mxu2 %v3795_v19  ;;  %v653_v19 = vld [vmem:[#allocation5 + $0xd70] sm:$0xff] }
 0x24b   :  { %1580 = vmatmul.f32.gmra.mxu0 %v3789_v48  ;;  %v1387_v53 = vadd.f32 %v1386_v50, %v1322_v45  ;;  %1778 = vmatmul.f32.gmra.mxu3 %v3796_v22  ;;  %v3797_v45 = vld [vmem:[#allocation2 + $0x3e0] sm:$0xff]  ;;  %v525_v22 = vld [vmem:[#allocation5 + $0x970] sm:$0xff] }
 0x24c   :  { %2179 = vmatpush.msrb.mxu2 %v653_v19  ;;  %2049 = vmatpush.msrb.mxu0 %v525_v22  ;;  %v709_v19 = vld [vmem:[#allocation5 + $0xf30] sm:$0xff] }
 0x24d   :  { %v1452_v39 = vadd.f32 %v1451_v15, %v1387_v53  ;;  %v3800_v53 = vld [vmem:[#allocation2 + $0x3f8] sm:$0xff]  ;;  %2246 = vmatpush.msrb.mxu3 %v709_v19 }
 0x24e   :  { %v1519_v50 = vpop.f32.mrf.mxu3 }
 0x24f   :  { %v4412_v13 = vadd.f32 %v1516_v10, %v1452_v39  ;;  %v593_v39 = vld [vmem:[#allocation5 + $0xb90] sm:$0xff]  ;;  %v3801_v10 = vld [vmem:[#allocation2] sm:$0xff] }
 0x250   :  { %v1324_v3 = vpop.f32.mrf.mxu0  ;;  %2113 = vmatpush.msrb.mxu1 %v593_v39 }
 0x251   :  { %v1325_v9 = vadd.f32 %v1324_v3, %v4367_v7  ;;  %v1454_v47 = vpop.f32.mrf.mxu2  ;;  %v1392_v35 = vpop.f32.mrf.mxu1  ;;  %1651 = vmatmul.f32.gmra.mxu1 %v3798_v59  ;;  %v3807_v59 = vld [vmem:[#allocation2 + $0x50] sm:$0xff] }
 0x252   :  { %1716 = vmatmul.f32.gmra.mxu2 %v3799_v49  ;;  %v649_v49 = vld [vmem:[#allocation5 + $0xd50] sm:$0xff] }
 0x253   :  { %1583 = vmatmul.f32.gmra.mxu0 %v3793_v41  ;;  %v1390_v55 = vadd.f32 %v1389_v4, %v1325_v9  ;;  %1781 = vmatmul.f32.gmra.mxu3 %v3800_v53  ;;  %v3802_v41 = vld [vmem:[#allocation2 + $0x8] sm:$0xff]  ;;  %v521_v53 = vld [vmem:[#allocation5 + $0x950] sm:$0xff] }
 0x254   :  { %2180 = vmatpush.msrb.mxu2 %v649_v49  ;;  %2050 = vmatpush.msrb.mxu0 %v521_v53  ;;  %v705_v49 = vld [vmem:[#allocation5 + $0xf10] sm:$0xff] }
 0x255   :  { %v1455_v31 = vadd.f32 %v1454_v47, %v1390_v55  ;;  %v3804_v55 = vld [vmem:[#allocation2 + $0x18] sm:$0xff]  ;;  %2247 = vmatpush.msrb.mxu3 %v705_v49 }
 0x256   :  { %v1522_v3 = vpop.f32.mrf.mxu3 }
 0x257   :  { %v4415_v44 = vadd.f32 %v1519_v50, %v1455_v31  ;;  %v589_v31 = vld [vmem:[#allocation5 + $0xb70] sm:$0xff]  ;;  %v3805_v50 = vld [vmem:[#allocation2 + $0x40] sm:$0xff] }
 0x258   :  { %v1327_v58 = vpop.f32.mrf.mxu0  ;;  %2114 = vmatpush.msrb.mxu1 %v589_v31 }
 0x259   :  { %v1328_v40 = vadd.f32 %v1327_v58, %v4367_v7  ;;  %v1457_v62 = vpop.f32.mrf.mxu2  ;;  %v1607_v15 = vpop.f32.mrf.mxu1  ;;  %1866 = vmatmul.f32.vlgmr.msra.gmra.mxu1 %v3802_v41  ;;  %v3812_v41 = vld [vmem:[#allocation2 + $0x98] sm:$0xff] }
 0x25a   :  { %1931 = vmatmul.f32.vlgmr.msra.gmra.mxu2 %v3803_v16  ;;  %v645_v16 = vld [vmem:[#allocation5 + $0xd30] sm:$0xff] }
 0x25b   :  { %1586 = vmatmul.f32.gmra.mxu0 %v3797_v45  ;;  %v1393_v48 = vadd.f32 %v1392_v35, %v1328_v40  ;;  %1996 = vmatmul.f32.vlgmr.msra.gmra.mxu3 %v3804_v55  ;;  %v3806_v45 = vld [vmem:[#allocation2 + $0x48] sm:$0xff]  ;;  %v517_v55 = vld [vmem:[#allocation5 + $0x930] sm:$0xff] }
 0x25c   :  { %2181 = vmatpush.msrb.mxu2 %v645_v16  ;;  %2051 = vmatpush.msrb.mxu0 %v517_v55  ;;  %v701_v16 = vld [vmem:[#allocation5 + $0xef0] sm:$0xff] }
 0x25d   :  { %v1458_v7 = vadd.f32 %v1457_v62, %v1393_v48  ;;  %v3808_v48 = vld [vmem:[#allocation2 + $0x58] sm:$0xff]  ;;  %2248 = vmatpush.msrb.mxu3 %v701_v16 }
 0x25e   :  { %v1737_v35 = vpop.f32.mrf.mxu3 }
 0x25f   :  { %v4418_v20 = vadd.f32 %v1522_v3, %v1458_v7  ;;  %v585_v7 = vld [vmem:[#allocation5 + $0xb50] sm:$0xff] }
 0x260   :  { %v1542_v63 = vpop.f32.mrf.mxu0  ;;  %2115 = vmatpush.msrb.mxu1 %v585_v7 }
 0x261   :  { %v1543_v4 = vadd.f32 %v1542_v63, %v4373_v6  ;;  %v1672_v25 = vpop.f32.mrf.mxu2  ;;  %v1610_v47 = vpop.f32.mrf.mxu1  ;;  %1869 = vmatmul.f32.gmra.mxu1 %v3806_v45  ;;  %v3816_v45 = vld [vmem:[#allocation2 + $0xd8] sm:$0xff] }
 0x262   :  { %1934 = vmatmul.f32.gmra.mxu2 %v3807_v59  ;;  %v641_v59 = vld [vmem:[#allocation5 + $0xd10] sm:$0xff] }
 0x263   :  { %v1608_v9 = vadd.f32 %v1607_v15, %v1543_v4  ;;  %1801 = vmatmul.f32.vlgmr.msra.gmra.mxu0 %v3801_v10  ;;  %1999 = vmatmul.f32.gmra.mxu3 %v3808_v48  ;;  %v3809_v4 = vld [vmem:[#allocation2 + $0x80] sm:$0xff]  ;;  %v3811_v10 = vld [vmem:[#allocation2 + $0x90] sm:$0xff] }
 0x264   :  { %v513_v48 = vld [vmem:[#allocation5 + $0x910] sm:$0xff]  ;;  %2182 = vmatpush.msrb.mxu2 %v641_v59 }
 0x265   :  { %v1673_v38 = vadd.f32 %v1672_v25, %v1608_v9  ;;  %v3810_v9 = vld [vmem:[#allocation2 + $0x88] sm:$0xff]  ;;  %2052 = vmatpush.msrb.mxu0 %v513_v48  ;;  %v697_v59 = vld [vmem:[#allocation5 + $0xed0] sm:$0xff] }
 0x266   :  { %v1740_v15 = vpop.f32.mrf.mxu3  ;;  %2249 = vmatpush.msrb.mxu3 %v697_v59 }
 0x267   :  { %v4421_v37 = vadd.f32 %v1737_v35, %v1673_v38  ;;  %v581_v38 = vld [vmem:[#allocation5 + $0xb30] sm:$0xff]  ;;  %v3813_v35 = vld [vmem:[#allocation2 + $0xc0] sm:$0xff] }
 0x268   :  { %v1545_v6 = vpop.f32.mrf.mxu0  ;;  %2116 = vmatpush.msrb.mxu1 %v581_v38 }
 0x269   :  { %v1546_v58 = vadd.f32 %v1545_v6, %v4376_v30  ;;  %v1675_v24 = vpop.f32.mrf.mxu2  ;;  %v1613_v62 = vpop.f32.mrf.mxu1  ;;  %1872 = vmatmul.f32.gmra.mxu1 %v3810_v9  ;;  %v3820_v9 = vld [vmem:[#allocation2 + $0x118] sm:$0xff] }
 0x26a   :  { %1937 = vmatmul.f32.gmra.mxu2 %v3811_v10  ;;  %v637_v10 = vld [vmem:[#allocation5 + $0xcf0] sm:$0xff] }
 0x26b   :  { %v1611_v40 = vadd.f32 %v1610_v47, %v1546_v58  ;;  %1804 = vmatmul.f32.gmra.mxu0 %v3805_v50  ;;  %2002 = vmatmul.f32.gmra.mxu3 %v3812_v41  ;;  %v3815_v50 = vld [vmem:[#allocation2 + $0xd0] sm:$0xff] }
 0x26c   :  { %v509_v41 = vld [vmem:[#allocation5 + $0x8f0] sm:$0xff]  ;;  %2183 = vmatpush.msrb.mxu2 %v637_v10 }
 0x26d   :  { %v1676_v30 = vadd.f32 %v1675_v24, %v1611_v40  ;;  %v3814_v40 = vld [vmem:[#allocation2 + $0xc8] sm:$0xff]  ;;  %2053 = vmatpush.msrb.mxu0 %v509_v41  ;;  %v693_v10 = vld [vmem:[#allocation5 + $0xeb0] sm:$0xff] }
 0x26e   :  { %v1743_v47 = vpop.f32.mrf.mxu3  ;;  %2250 = vmatpush.msrb.mxu3 %v693_v10 }
 0x26f   :  { %v4424_v39 = vadd.f32 %v1740_v15, %v1676_v30  ;;  %v577_v30 = vld [vmem:[#allocation5 + $0xb10] sm:$0xff]  ;;  %v3817_v15 = vld [vmem:[#allocation2 + $0x100] sm:$0xff] }
 0x270   :  { %v1548_v60 = vpop.f32.mrf.mxu0  ;;  %2117 = vmatpush.msrb.mxu1 %v577_v30 }
 0x271   :  { %v1549_v63 = vadd.f32 %v1548_v60, %v4379_v51  ;;  %v1678_v22 = vpop.f32.mrf.mxu2  ;;  %v1616_v25 = vpop.f32.mrf.mxu1  ;;  %1875 = vmatmul.f32.gmra.mxu1 %v3814_v40  ;;  %v3824_v40 = vld [vmem:[#allocation2 + $0x158] sm:$0xff] }
 0x272   :  { %1940 = vmatmul.f32.gmra.mxu2 %v3815_v50  ;;  %v633_v50 = vld [vmem:[#allocation5 + $0xcd0] sm:$0xff] }
 0x273   :  { %v1614_v3 = vadd.f32 %v1613_v62, %v1549_v63  ;;  %1807 = vmatmul.f32.gmra.mxu0 %v3809_v4  ;;  %2005 = vmatmul.f32.gmra.mxu3 %v3816_v45  ;;  %v3819_v4 = vld [vmem:[#allocation2 + $0x110] sm:$0xff] }
 0x274   :  { %v505_v45 = vld [vmem:[#allocation5 + $0x8d0] sm:$0xff]  ;;  %2184 = vmatpush.msrb.mxu2 %v633_v50 }
 0x275   :  { %v1679_v51 = vadd.f32 %v1678_v22, %v1614_v3  ;;  %v3818_v3 = vld [vmem:[#allocation2 + $0x108] sm:$0xff]  ;;  %2054 = vmatpush.msrb.mxu0 %v505_v45  ;;  %v689_v50 = vld [vmem:[#allocation5 + $0xe90] sm:$0xff] }
 0x276   :  { %v1746_v62 = vpop.f32.mrf.mxu3  ;;  %2251 = vmatpush.msrb.mxu3 %v689_v50 }
 0x277   :  { %v4427_v31 = vadd.f32 %v1743_v47, %v1679_v51  ;;  %v573_v51 = vld [vmem:[#allocation5 + $0xaf0] sm:$0xff]  ;;  %v3821_v47 = vld [vmem:[#allocation2 + $0x140] sm:$0xff] }
 0x278   :  { %v1551_v23 = vpop.f32.mrf.mxu0  ;;  %2118 = vmatpush.msrb.mxu1 %v573_v51 }
 0x279   :  { %v1552_v6 = vadd.f32 %v1551_v23, %v4382_v29  ;;  %v1681_v53 = vpop.f32.mrf.mxu2  ;;  %v1619_v24 = vpop.f32.mrf.mxu1  ;;  %1878 = vmatmul.f32.gmra.mxu1 %v3818_v3  ;;  %v3828_v3 = vld [vmem:[#allocation2 + $0x198] sm:$0xff] }
 0x27a   :  { %1943 = vmatmul.f32.gmra.mxu2 %v3819_v4  ;;  %v629_v4 = vld [vmem:[#allocation5 + $0xcb0] sm:$0xff] }
 0x27b   :  { %v1617_v58 = vadd.f32 %v1616_v25, %v1552_v6  ;;  %1810 = vmatmul.f32.gmra.mxu0 %v3813_v35  ;;  %2008 = vmatmul.f32.gmra.mxu3 %v3820_v9  ;;  %v3823_v35 = vld [vmem:[#allocation2 + $0x150] sm:$0xff] }
 0x27c   :  { %v501_v9 = vld [vmem:[#allocation5 + $0x8b0] sm:$0xff]  ;;  %2185 = vmatpush.msrb.mxu2 %v629_v4 }
 0x27d   :  { %v1682_v29 = vadd.f32 %v1681_v53, %v1617_v58  ;;  %v3822_v58 = vld [vmem:[#allocation2 + $0x148] sm:$0xff]  ;;  %2055 = vmatpush.msrb.mxu0 %v501_v9  ;;  %v685_v4 = vld [vmem:[#allocation5 + $0xe70] sm:$0xff] }
 0x27e   :  { %v1749_v25 = vpop.f32.mrf.mxu3  ;;  %2252 = vmatpush.msrb.mxu3 %v685_v4 }
 0x27f   :  { %v4430_v7 = vadd.f32 %v1746_v62, %v1682_v29  ;;  %v569_v29 = vld [vmem:[#allocation5 + $0xad0] sm:$0xff]  ;;  %v3825_v62 = vld [vmem:[#allocation2 + $0x180] sm:$0xff] }
 0x280   :  { %v1554_v11 = vpop.f32.mrf.mxu0  ;;  %2119 = vmatpush.msrb.mxu1 %v569_v29 }
 0x281   :  { %v1555_v60 = vadd.f32 %v1554_v11, %v4385_v33  ;;  %v1684_v55 = vpop.f32.mrf.mxu2  ;;  %v1622_v22 = vpop.f32.mrf.mxu1  ;;  %1881 = vmatmul.f32.gmra.mxu1 %v3822_v58  ;;  %v3832_v58 = vld [vmem:[#allocation2 + $0x1d8] sm:$0xff] }
 0x282   :  { %1946 = vmatmul.f32.gmra.mxu2 %v3823_v35  ;;  %v625_v35 = vld [vmem:[#allocation5 + $0xc90] sm:$0xff] }
 0x283   :  { %v1620_v63 = vadd.f32 %v1619_v24, %v1555_v60  ;;  %1813 = vmatmul.f32.gmra.mxu0 %v3817_v15  ;;  %2011 = vmatmul.f32.gmra.mxu3 %v3824_v40  ;;  %v3827_v15 = vld [vmem:[#allocation2 + $0x190] sm:$0xff] }
 0x284   :  { %v497_v40 = vld [vmem:[#allocation5 + $0x890] sm:$0xff]  ;;  %2186 = vmatpush.msrb.mxu2 %v625_v35 }
 0x285   :  { %v1685_v33 = vadd.f32 %v1684_v55, %v1620_v63  ;;  %v3826_v63 = vld [vmem:[#allocation2 + $0x188] sm:$0xff]  ;;  %2056 = vmatpush.msrb.mxu0 %v497_v40  ;;  %v681_v35 = vld [vmem:[#allocation5 + $0xe50] sm:$0xff] }
 0x286   :  { %v1752_v24 = vpop.f32.mrf.mxu3  ;;  %2253 = vmatpush.msrb.mxu3 %v681_v35 }
 0x287   :  { %v4433_v38 = vadd.f32 %v1749_v25, %v1685_v33  ;;  %v565_v33 = vld [vmem:[#allocation5 + $0xab0] sm:$0xff]  ;;  %v3829_v25 = vld [vmem:[#allocation2 + $0x1c0] sm:$0xff] }
 0x288   :  { %v1557_v19 = vpop.f32.mrf.mxu0  ;;  %2120 = vmatpush.msrb.mxu1 %v565_v33 }
 0x289   :  { %v1558_v23 = vadd.f32 %v1557_v19, %v4388_v57  ;;  %v1687_v48 = vpop.f32.mrf.mxu2  ;;  %v1625_v53 = vpop.f32.mrf.mxu1  ;;  %1884 = vmatmul.f32.gmra.mxu1 %v3826_v63  ;;  %v3836_v63 = vld [vmem:[#allocation2 + $0x218] sm:$0xff] }
 0x28a   :  { %1949 = vmatmul.f32.gmra.mxu2 %v3827_v15  ;;  %v621_v15 = vld [vmem:[#allocation5 + $0xc70] sm:$0xff] }
 0x28b   :  { %v1623_v6 = vadd.f32 %v1622_v22, %v1558_v23  ;;  %1816 = vmatmul.f32.gmra.mxu0 %v3821_v47  ;;  %2014 = vmatmul.f32.gmra.mxu3 %v3828_v3  ;;  %v3831_v47 = vld [vmem:[#allocation2 + $0x1d0] sm:$0xff] }
 0x28c   :  { %v493_v3 = vld [vmem:[#allocation5 + $0x870] sm:$0xff]  ;;  %2187 = vmatpush.msrb.mxu2 %v621_v15 }
 0x28d   :  { %v1688_v57 = vadd.f32 %v1687_v48, %v1623_v6  ;;  %v3830_v6 = vld [vmem:[#allocation2 + $0x1c8] sm:$0xff]  ;;  %2057 = vmatpush.msrb.mxu0 %v493_v3  ;;  %v677_v15 = vld [vmem:[#allocation5 + $0xe30] sm:$0xff] }
 0x28e   :  { %v1755_v22 = vpop.f32.mrf.mxu3  ;;  %2254 = vmatpush.msrb.mxu3 %v677_v15 }
 0x28f   :  { %v4436_v30 = vadd.f32 %v1752_v24, %v1688_v57  ;;  %v561_v57 = vld [vmem:[#allocation5 + $0xa90] sm:$0xff]  ;;  %v3833_v24 = vld [vmem:[#allocation2 + $0x200] sm:$0xff] }
 0x290   :  { %v1560_v49 = vpop.f32.mrf.mxu0  ;;  %2121 = vmatpush.msrb.mxu1 %v561_v57 }
 0x291   :  { %v1561_v11 = vadd.f32 %v1560_v49, %v4391_v18  ;;  %v1690_v41 = vpop.f32.mrf.mxu2  ;;  %v1628_v55 = vpop.f32.mrf.mxu1  ;;  %1887 = vmatmul.f32.gmra.mxu1 %v3830_v6  ;;  %v3840_v6 = vld [vmem:[#allocation2 + $0x258] sm:$0xff] }
 0x292   :  { %1952 = vmatmul.f32.gmra.mxu2 %v3831_v47  ;;  %v617_v47 = vld [vmem:[#allocation5 + $0xc50] sm:$0xff] }
 0x293   :  { %v1626_v60 = vadd.f32 %v1625_v53, %v1561_v11  ;;  %1819 = vmatmul.f32.gmra.mxu0 %v3825_v62  ;;  %2017 = vmatmul.f32.gmra.mxu3 %v3832_v58  ;;  %v3835_v62 = vld [vmem:[#allocation2 + $0x210] sm:$0xff] }
 0x294   :  { %v489_v58 = vld [vmem:[#allocation5 + $0x850] sm:$0xff]  ;;  %2188 = vmatpush.msrb.mxu2 %v617_v47 }
 0x295   :  { %v1691_v18 = vadd.f32 %v1690_v41, %v1626_v60  ;;  %v3834_v60 = vld [vmem:[#allocation2 + $0x208] sm:$0xff]  ;;  %2058 = vmatpush.msrb.mxu0 %v489_v58  ;;  %v673_v47 = vld [vmem:[#allocation5 + $0xe10] sm:$0xff] }
 0x296   :  { %v1758_v53 = vpop.f32.mrf.mxu3  ;;  %2255 = vmatpush.msrb.mxu3 %v673_v47 }
 0x297   :  { %v4439_v51 = vadd.f32 %v1755_v22, %v1691_v18  ;;  %v557_v18 = vld [vmem:[#allocation5 + $0xa70] sm:$0xff]  ;;  %v3837_v22 = vld [vmem:[#allocation2 + $0x240] sm:$0xff] }
 0x298   :  { %v1563_v16 = vpop.f32.mrf.mxu0  ;;  %2122 = vmatpush.msrb.mxu1 %v557_v18 }
 0x299   :  { %v1564_v19 = vadd.f32 %v1563_v16, %v4394_v43  ;;  %v1693_v45 = vpop.f32.mrf.mxu2  ;;  %v1631_v48 = vpop.f32.mrf.mxu1  ;;  %1890 = vmatmul.f32.gmra.mxu1 %v3834_v60  ;;  %v3844_v60 = vld [vmem:[#allocation2 + $0x298] sm:$0xff] }
 0x29a   :  { %1955 = vmatmul.f32.gmra.mxu2 %v3835_v62  ;;  %v613_v62 = vld [vmem:[#allocation5 + $0xc30] sm:$0xff] }
 0x29b   :  { %v1629_v23 = vadd.f32 %v1628_v55, %v1564_v19  ;;  %1822 = vmatmul.f32.gmra.mxu0 %v3829_v25  ;;  %2020 = vmatmul.f32.gmra.mxu3 %v3836_v63  ;;  %v3839_v25 = vld [vmem:[#allocation2 + $0x250] sm:$0xff] }
 0x29c   :  { %v485_v63 = vld [vmem:[#allocation5 + $0x830] sm:$0xff]  ;;  %2189 = vmatpush.msrb.mxu2 %v613_v62  ;;  %v478_v62 = vld [vmem:[#allocation5 + $0x7f8] sm:$0xff] }
 0x29d   :  { %v1694_v43 = vadd.f32 %v1693_v45, %v1629_v23  ;;  %v3838_v23 = vld [vmem:[#allocation2 + $0x248] sm:$0xff]  ;;  %2059 = vmatpush.msrb.mxu0 %v485_v63  ;;  %2500 = vmatpush.msra.mxu3 %v478_v62 }
 0x29e   :  { %v1761_v55 = vpop.f32.mrf.mxu3 }
 0x29f   :  { %v4442_v29 = vadd.f32 %v1758_v53, %v1694_v43  ;;  %v553_v43 = vld [vmem:[#allocation5 + $0xa50] sm:$0xff]  ;;  %v3841_v53 = vld [vmem:[#allocation2 + $0x280] sm:$0xff] }
 0x2a0   :  { %v1566_v59 = vpop.f32.mrf.mxu0  ;;  %2123 = vmatpush.msrb.mxu1 %v553_v43 }
 0x2a1   :  { %v1567_v49 = vadd.f32 %v1566_v59, %v4397_v2  ;;  %v1696_v9 = vpop.f32.mrf.mxu2  ;;  %v1634_v41 = vpop.f32.mrf.mxu1  ;;  %1893 = vmatmul.f32.gmra.mxu1 %v3838_v23  ;;  %v3848_v23 = vld [vmem:[#allocation2 + $0x2d8] sm:$0xff] }
 0x2a2   :  { %1958 = vmatmul.f32.gmra.mxu2 %v3839_v25  ;;  %v609_v25 = vld [vmem:[#allocation5 + $0xc10] sm:$0xff] }
 0x2a3   :  { %v1632_v11 = vadd.f32 %v1631_v48, %v1567_v49  ;;  %1825 = vmatmul.f32.gmra.mxu0 %v3833_v24  ;;  %2023 = vmatmul.f32.gmra.mxu3 %v3840_v6  ;;  %v3843_v24 = vld [vmem:[#allocation2 + $0x290] sm:$0xff] }
 0x2a4   :  { %v481_v6 = vld [vmem:[#allocation5 + $0x810] sm:$0xff]  ;;  %2190 = vmatpush.msrb.mxu2 %v609_v25  ;;  %v474_v25 = vld [vmem:[#allocation5 + $0x7d8] sm:$0xff] }
 0x2a5   :  { %v1697_v2 = vadd.f32 %v1696_v9, %v1632_v11  ;;  %v3842_v11 = vld [vmem:[#allocation2 + $0x288] sm:$0xff]  ;;  %2060 = vmatpush.msrb.mxu0 %v481_v6  ;;  %2501 = vmatpush.msra.mxu3 %v474_v25 }
 0x2a6   :  { %v1764_v48 = vpop.f32.mrf.mxu3 }
 0x2a7   :  { %v4445_v33 = vadd.f32 %v1761_v55, %v1697_v2  ;;  %v549_v2 = vld [vmem:[#allocation5 + $0xa30] sm:$0xff]  ;;  %v3845_v55 = vld [vmem:[#allocation2 + $0x2c0] sm:$0xff] }
 0x2a8   :  { %v1569_v10 = vpop.f32.mrf.mxu0  ;;  %2124 = vmatpush.msrb.mxu1 %v549_v2 }
 0x2a9   :  { %v1570_v16 = vadd.f32 %v1569_v10, %v4400_v27  ;;  %v1699_v40 = vpop.f32.mrf.mxu2  ;;  %v1637_v45 = vpop.f32.mrf.mxu1  ;;  %1896 = vmatmul.f32.gmra.mxu1 %v3842_v11  ;;  %v3852_v11 = vld [vmem:[#allocation2 + $0x318] sm:$0xff] }
 0x2aa   :  { %1961 = vmatmul.f32.gmra.mxu2 %v3843_v24  ;;  %v414_v24 = vld [vmem:[#allocation5 + $0x5f8] sm:$0xff] }
 0x2ab   :  { %v1635_v19 = vadd.f32 %v1634_v41, %v1570_v16  ;;  %1828 = vmatmul.f32.gmra.mxu0 %v3837_v22  ;;  %2026 = vmatmul.f32.gmra.mxu3 %v3844_v60  ;;  %v3847_v22 = vld [vmem:[#allocation2 + $0x2d0] sm:$0xff]  ;;  %v286_v60 = vld [vmem:[#allocation5 + $0x1f8] sm:$0xff] }
 0x2ac   :  { %2435 = vmatpush.msra.mxu2 %v414_v24  ;;  %2305 = vmatpush.msra.mxu0 %v286_v60  ;;  %v470_v24 = vld [vmem:[#allocation5 + $0x7b8] sm:$0xff] }
 0x2ad   :  { %v1700_v27 = vadd.f32 %v1699_v40, %v1635_v19  ;;  %v3846_v19 = vld [vmem:[#allocation2 + $0x2c8] sm:$0xff]  ;;  %2502 = vmatpush.msra.mxu3 %v470_v24  ;;  %v462_v24 = vld [vmem:[#allocation5 + $0x778] sm:$0xff] }
 0x2ae   :  { %v1767_v41 = vpop.f32.mrf.mxu3 }
 0x2af   :  { %v4448_v57 = vadd.f32 %v1764_v48, %v1700_v27  ;;  %v545_v27 = vld [vmem:[#allocation5 + $0xa10] sm:$0xff]  ;;  %v3849_v48 = vld [vmem:[#allocation2 + $0x300] sm:$0xff] }
 0x2b0   :  { %v1572_v50 = vpop.f32.mrf.mxu0  ;;  %2125 = vmatpush.msrb.mxu1 %v545_v27 }
 0x2b1   :  { %v1573_v59 = vadd.f32 %v1572_v50, %v4403_v54  ;;  %v1702_v3 = vpop.f32.mrf.mxu2  ;;  %v1640_v9 = vpop.f32.mrf.mxu1  ;;  %1899 = vmatmul.f32.gmra.mxu1 %v3846_v19  ;;  %v410_v19 = vld [vmem:[#allocation5 + $0x5d8] sm:$0xff] }
 0x2b2   :  { %1964 = vmatmul.f32.gmra.mxu2 %v3847_v22  ;;  %v3856_v22 = vld [vmem:[#allocation2 + $0x358] sm:$0xff] }
 0x2b3   :  { %v1638_v49 = vadd.f32 %v1637_v45, %v1573_v59  ;;  %1831 = vmatmul.f32.gmra.mxu0 %v3841_v53  ;;  %2029 = vmatmul.f32.gmra.mxu3 %v3848_v23  ;;  %v3851_v53 = vld [vmem:[#allocation2 + $0x310] sm:$0xff]  ;;  %v282_v23 = vld [vmem:[#allocation5 + $0x1d8] sm:$0xff] }
 0x2b4   :  { %2436 = vmatpush.msra.mxu2 %v410_v19  ;;  %2306 = vmatpush.msra.mxu0 %v282_v23  ;;  %v3865_v19 = vld [vmem:[#allocation7] sm:$0xf]  ;;  %v274_v23 = vld [vmem:[#allocation5 + $0x198] sm:$0xff] }
 0x2b5   :  { %v1703_v54 = vadd.f32 %v1702_v3, %v1638_v49  ;;  %v3850_v49 = vld [vmem:[#allocation2 + $0x308] sm:$0xff] }
 0x2b6   :  { %v1770_v45 = vpop.f32.mrf.mxu3 }
 0x2b7   :  { %v4451_v18 = vadd.f32 %v1767_v41, %v1703_v54  ;;  %v350_v54 = vld [vmem:[#allocation5 + $0x3f8] sm:$0xff]  ;;  %v3853_v41 = vld [vmem:[#allocation2 + $0x340] sm:$0xff] }
 0x2b8   :  { %v1575_v4 = vpop.f32.mrf.mxu0  ;;  %2370 = vmatpush.msra.mxu1 %v350_v54 }
 0x2b9   :  { %v1576_v10 = vadd.f32 %v1575_v4, %v4406_v34  ;;  %v1705_v58 = vpop.f32.mrf.mxu2  ;;  %v1643_v40 = vpop.f32.mrf.mxu1  ;;  %1902 = vmatmul.f32.gmra.mxu1 %v3850_v49  ;;  %v406_v49 = vld [vmem:[#allocation5 + $0x5b8] sm:$0xff] }
 0x2ba   :  { %1967 = vmatmul.f32.gmra.mxu2 %v3851_v53  ;;  %v3860_v53 = vld [vmem:[#allocation2 + $0x398] sm:$0xff] }
 0x2bb   :  { %v1641_v16 = vadd.f32 %v1640_v9, %v1576_v10  ;;  %1834 = vmatmul.f32.gmra.mxu0 %v3845_v55  ;;  %2032 = vmatmul.f32.gmra.mxu3 %v3852_v11  ;;  %v3855_v55 = vld [vmem:[#allocation2 + $0x350] sm:$0xff]  ;;  %v278_v11 = vld [vmem:[#allocation5 + $0x1b8] sm:$0xff] }
 0x2bc   :  { %2437 = vmatpush.msra.mxu2 %v406_v49  ;;  %2307 = vmatpush.msra.mxu0 %v278_v11  ;;  %v398_v49 = vld [vmem:[#allocation5 + $0x578] sm:$0xff] }
 0x2bd   :  { %v1706_v34 = vadd.f32 %v1705_v58, %v1641_v16  ;;  %v3854_v16 = vld [vmem:[#allocation2 + $0x348] sm:$0xff]  ;;  %v270_v11 = vld [vmem:[#allocation5 + $0x178] sm:$0xff] }
 0x2be   :  { %v1773_v9 = vpop.f32.mrf.mxu3  ;;  %2308 = vmatpush.msra.mxu0 %v274_v23  ;;  %v266_v23 = vld [vmem:[#allocation5 + $0x158] sm:$0xff] }
 0x2bf   :  { %v4454_v43 = vadd.f32 %v1770_v45, %v1706_v34  ;;  %v346_v34 = vld [vmem:[#allocation5 + $0x3d8] sm:$0xff]  ;;  %v3857_v45 = vld [vmem:[#allocation2 + $0x380] sm:$0xff] }
 0x2c0   :  { %v1578_v35 = vpop.f32.mrf.mxu0  ;;  %2371 = vmatpush.msra.mxu1 %v346_v34  ;;  %2309 = vmatpush.msra.mxu0 %v270_v11  ;;  %v3877_v11 = vld [vmem:[#allocation2 + $0xb8] sm:$0xff] }
 0x2c1   :  { %v1579_v50 = vadd.f32 %v1578_v35, %v4409_v46  ;;  %5095 = vst [vmem:[#allocation21_spill] sm:$0xff] %v4454_v43  ;;  %v1708_v63 = vpop.f32.mrf.mxu2  ;;  %v1646_v3 = vpop.f32.mrf.mxu1  ;;  %1905 = vmatmul.f32.gmra.mxu1 %v3854_v16  ;;  %v402_v16 = vld [vmem:[#allocation5 + $0x598] sm:$0xff] }
 0x2c2   :  { %1970 = vmatmul.f32.gmra.mxu2 %v3855_v55  ;;  %v3864_v55 = vld [vmem:[#allocation2 + $0x3d8] sm:$0xff]  ;;  %2310 = vmatpush.msra.mxu0 %v266_v23 }
 0x2c3   :  { %v1644_v59 = vadd.f32 %v1643_v40, %v1579_v50  ;;  %1837 = vmatmul.f32.gmra.mxu0 %v3849_v48  ;;  %2035 = vmatmul.f32.gmra.mxu3 %v3856_v22  ;;  %v3859_v48 = vld [vmem:[#allocation2 + $0x390] sm:$0xff]  ;;  %v4465_v22 = vperm.slane %v3865_v19, 2  ;;  %v3873_v19 = vld [vmem:[#allocation2 + $0x78] sm:$0xff] }
 0x2c4   :  { %2438 = vmatpush.msra.mxu2 %v402_v16  ;;  %v3872_v16 = vld [vmem:[#allocation2 + $0x70] sm:$0xff]  ;;  %v386_v23 = vld [vmem:[#allocation5 + $0x518] sm:$0xff] }
 0x2c5   :  { %v1709_v46 = vadd.f32 %v1708_v63, %v1644_v59  ;;  %v3858_v59 = vld [vmem:[#allocation2 + $0x388] sm:$0xff] }
 0x2c6   :  { %v1776_v40 = vpop.f32.mrf.mxu3  ;;  %2439 = vmatpush.msra.mxu2 %v398_v49  ;;  %v3876_v49 = vld [vmem:[#allocation2 + $0xb0] sm:$0xff] }
 0x2c7   :  { %v4457_v2 = vadd.f32 %v1773_v9, %v1709_v46  ;;  %v342_v46 = vld [vmem:[#allocation5 + $0x3b8] sm:$0xff]  ;;  %v3861_v9 = vld [vmem:[#allocation2 + $0x3c0] sm:$0xff] }
 0x2c8   :  { %v1581_v15 = vpop.f32.mrf.mxu0  ;;  %2372 = vmatpush.msra.mxu1 %v342_v46  ;;  %v334_v46 = vld [vmem:[#allocation5 + $0x378] sm:$0xff] }
 0x2c9   :  { %v1582_v4 = vadd.f32 %v1581_v15, %v4412_v13  ;;  %5096 = vst [vmem:[#allocation22_spill] sm:$0xff] %v4457_v2  ;;  %v1711_v13 = vpop.f32.mrf.mxu2  ;;  %v1649_v58 = vpop.f32.mrf.mxu1  ;;  %1908 = vmatmul.f32.gmra.mxu1 %v3858_v59 }
 0x2ca   :  { %1973 = vmatmul.f32.gmra.mxu2 %v3859_v48  ;;  %v3868_v48 = vld [vmem:[#allocation2 + $0x30] sm:$0xff] }
 0x2cb   :  { %v1647_v10 = vadd.f32 %v1646_v3, %v1582_v4  ;;  %1840 = vmatmul.f32.gmra.mxu0 %v3853_v41  ;;  %2038 = vmatmul.f32.gmra.mxu3 %v3860_v53  ;;  %v3863_v41 = vld [vmem:[#allocation2 + $0x3d0] sm:$0xff]  ;;  %v3869_v53 = vld [vmem:[#allocation2 + $0x38] sm:$0xff] }
 0x2cd   :  { %v1712_v6 = vadd.f32 %v1711_v13, %v1647_v10  ;;  %v3862_v10 = vld [vmem:[#allocation2 + $0x3c8] sm:$0xff] }
 0x2ce   :  { %v1779_v3 = vpop.f32.mrf.mxu3 }
 0x2cf   :  { %v4460_v27 = vadd.f32 %v1776_v40, %v1712_v6 }
 0x2d0   :  { %v1584_v47 = vpop.f32.mrf.mxu0 }
 0x2d1   :  { %v1585_v35 = vadd.f32 %v1584_v47, %v4415_v44  ;;  %5097 = vst [vmem:[#allocation23_spill] sm:$0xff] %v4460_v27  ;;  %v1714_v44 = vpop.f32.mrf.mxu2  ;;  %v1652_v63 = vpop.f32.mrf.mxu1  ;;  %1911 = vmatmul.f32.gmra.mxu1 %v3862_v10  ;;  %v3871_v10 = vld [vmem:[#allocation2 + $0x68] sm:$0xff] }
 0x2d2   :  { %1976 = vmatmul.f32.gmra.mxu2 %v3863_v41 }
 0x2d3   :  { %v1650_v50 = vadd.f32 %v1649_v58, %v1585_v35  ;;  %1843 = vmatmul.f32.gmra.mxu0 %v3857_v45  ;;  %2041 = vmatmul.f32.gmra.mxu3 %v3864_v55  ;;  %v338_v58 = vld [vmem:[#allocation5 + $0x398] sm:$0xff]  ;;  %v3867_v45 = vld [vmem:[#allocation2 + $0x28] sm:$0xff] }
 0x2d4   :  { %2373 = vmatpush.msra.mxu1 %v338_v58  ;;  %v394_v55 = vld [vmem:[#allocation5 + $0x558] sm:$0xff] }
 0x2d5   :  { %v1715_v60 = vadd.f32 %v1714_v44, %v1650_v50  ;;  %v3866_v50 = vld [vmem:[#allocation2 + $0x20] sm:$0xff]  ;;  %2440 = vmatpush.msra.mxu2 %v394_v55  ;;  %v330_v58 = vld [vmem:[#allocation5 + $0x358] sm:$0xff] }
 0x2d6   :  { %v1782_v34 = vpop.f32.mrf.mxu3  ;;  %2374 = vmatpush.msra.mxu1 %v334_v46 }
 0x2d7   :  { %v4463_v54 = vadd.f32 %v1779_v3, %v1715_v60 }
 0x2d8   :  { %v1587_v62 = vpop.f32.mrf.mxu0  ;;  %2375 = vmatpush.msra.mxu1 %v330_v58 }
 0x2d9   :  { %v1588_v15 = vadd.f32 %v1587_v62, %v4418_v20  ;;  %5098 = vst [vmem:[#allocation24_spill] sm:$0xff] %v4463_v54  ;;  %v466_v20 = vld [vmem:[#allocation5 + $0x798] sm:$0xff]  ;;  %v1717_v25 = vpop.f32.mrf.mxu2  ;;  %v1867_v47 = vpop.f32.mrf.mxu1  ;;  %2126 = vmatmul.f32.vlgmr.msrb.gmra.mxu1 %v3867_v45  ;;  %v3874_v45 = vld [vmem:[#allocation2 + $0xa0] sm:$0xff] }
 0x2da   :  { %2503 = vmatpush.msra.mxu3 %v466_v20  ;;  %2191 = vmatmul.f32.vlgmr.msrb.gmra.mxu2 %v3868_v48  ;;  %v458_v20 = vld [vmem:[#allocation5 + $0x758] sm:$0xff] }
 0x2db   :  { %v1653_v4 = vadd.f32 %v1652_v63, %v1588_v15  ;;  %1846 = vmatmul.f32.gmra.mxu0 %v3861_v9  ;;  %2256 = vmatmul.f32.vlgmr.msrb.gmra.mxu3 %v3869_v53  ;;  %v3870_v9 = vld [vmem:[#allocation2 + $0x60] sm:$0xff]  ;;  %v390_v53 = vld [vmem:[#allocation5 + $0x538] sm:$0xff] }
 0x2dc   :  { %2504 = vmatpush.msra.mxu3 %v462_v24  ;;  %2441 = vmatpush.msra.mxu2 %v390_v53  ;;  %v262_v24 = vld [vmem:[#allocation5 + $0x138] sm:$0xff]  ;;  %v3883_v53 = vld [vmem:[#allocation2 + $0x128] sm:$0xff] }
 0x2dd   :  { %v1718_v13 = vadd.f32 %v1717_v25, %v1653_v4  ;;  %2311 = vmatpush.msra.mxu0 %v262_v24  ;;  %v3884_v24 = vld [vmem:[#allocation2 + $0x130] sm:$0xff] }
 0x2de   :  { %v1997_v3 = vpop.f32.mrf.mxu3  ;;  %2505 = vmatpush.msra.mxu3 %v458_v20  ;;  %v3881_v20 = vld [vmem:[#allocation2 + $0xf8] sm:$0xff]  ;;  %2442 = vmatpush.msra.mxu2 %v386_v23  ;;  %v3886_v23 = vld [vmem:[#allocation2 + $0x160] sm:$0xff] }
 0x2df   :  { %v4468_v40 = vadd.f32 %v1782_v34, %v1718_v13 }
 0x2e0   :  { %v1802_v6 = vpop.f32.mrf.mxu0 }
 0x2e1   :  { %v1803_v35 = vadd.f32 %v1802_v6, %v4465_v22  ;;  %5099 = vst [vmem:[#allocation25_spill] sm:$0xff] %v4468_v40  ;;  %v1932_v44 = vpop.f32.mrf.mxu2  ;;  %v1870_v63 = vpop.f32.mrf.mxu1  ;;  %2129 = vmatmul.f32.gmra.mxu1 %v3871_v10 }
 0x2e2   :  { %2194 = vmatmul.f32.gmra.mxu2 %v3872_v16  ;;  %v3879_v16 = vld [vmem:[#allocation2 + $0xe8] sm:$0xff] }
 0x2e3   :  { %2061 = vmatmul.f32.vlgmr.msrb.gmra.mxu0 %v3866_v50  ;;  %v1868_v59 = vadd.f32 %v1867_v47, %v1803_v35  ;;  %2259 = vmatmul.f32.gmra.mxu3 %v3873_v19  ;;  %v3880_v19 = vld [vmem:[#allocation2 + $0xf0] sm:$0xff] }
 0x2e5   :  { %v1933_v60 = vadd.f32 %v1932_v44, %v1868_v59  ;;  %v3875_v59 = vld [vmem:[#allocation2 + $0xa8] sm:$0xff]  ;;  %v454_v44 = vld [vmem:[#allocation5 + $0x738] sm:$0xff] }
 0x2e6   :  { %v2000_v35 = vpop.f32.mrf.mxu3  ;;  %2506 = vmatpush.msra.mxu3 %v454_v44  ;;  %v382_v44 = vld [vmem:[#allocation5 + $0x4f8] sm:$0xff] }
 0x2e7   :  { %v4471_v4 = vadd.f32 %v1997_v3, %v1933_v60  ;;  %2443 = vmatpush.msra.mxu2 %v382_v44 }
 0x2e8   :  { %v1805_v62 = vpop.f32.mrf.mxu0 }
 0x2e9   :  { %v1806_v15 = vadd.f32 %v1805_v62, %v4465_v22  ;;  %v1935_v25 = vpop.f32.mrf.mxu2  ;;  %v1873_v47 = vpop.f32.mrf.mxu1  ;;  %2132 = vmatmul.f32.gmra.mxu1 %v3875_v59 }
 0x2ea   :  { %2197 = vmatmul.f32.gmra.mxu2 %v3876_v49  ;;  %v3882_v49 = vld [vmem:[#allocation2 + $0x120] sm:$0xff] }
 0x2eb   :  { %2064 = vmatmul.f32.gmra.mxu0 %v3870_v9  ;;  %v1871_v41 = vadd.f32 %v1870_v63, %v1806_v15  ;;  %2262 = vmatmul.f32.gmra.mxu3 %v3877_v11  ;;  %v326_v15 = vld [vmem:[#allocation5 + $0x338] sm:$0xff] }
 0x2ec   :  { %2376 = vmatpush.msra.mxu1 %v326_v15 }
 0x2ed   :  { %v1936_v13 = vadd.f32 %v1935_v25, %v1871_v41  ;;  %v3878_v41 = vld [vmem:[#allocation2 + $0xe0] sm:$0xff]  ;;  %v258_v25 = vld [vmem:[#allocation5 + $0x118] sm:$0xff] }
 0x2ee   :  { %v2003_v9 = vpop.f32.mrf.mxu3  ;;  %2312 = vmatpush.msra.mxu0 %v258_v25 }
 0x2ef   :  { %v4474_v50 = vadd.f32 %v2000_v35, %v1936_v13  ;;  %v450_v13 = vld [vmem:[#allocation5 + $0x718] sm:$0xff] }
 0x2f0   :  { %v1808_v6 = vpop.f32.mrf.mxu0  ;;  %2507 = vmatpush.msra.mxu3 %v450_v13  ;;  %v322_v35 = vld [vmem:[#allocation5 + $0x318] sm:$0xff]  ;;  %v3888_v13 = vld [vmem:[#allocation2 + $0x170] sm:$0xff] }
 0x2f1   :  { %v1809_v34 = vadd.f32 %v1808_v6, %v4465_v22  ;;  %v1938_v60 = vpop.f32.mrf.mxu2  ;;  %v1876_v46 = vpop.f32.mrf.mxu1  ;;  %2135 = vmatmul.f32.gmra.mxu1 %v3879_v16 }
 0x2f2   :  { %2200 = vmatmul.f32.gmra.mxu2 %v3880_v19  ;;  %2377 = vmatpush.msra.mxu1 %v322_v35 }
 0x2f3   :  { %2067 = vmatmul.f32.gmra.mxu0 %v3874_v45  ;;  %v1874_v48 = vadd.f32 %v1873_v47, %v1809_v34  ;;  %2265 = vmatmul.f32.gmra.mxu3 %v3881_v20  ;;  %v3887_v20 = vld [vmem:[#allocation2 + $0x168] sm:$0xff] }
 0x2f5   :  { %v1939_v62 = vadd.f32 %v1938_v60, %v1874_v48  ;;  %v3885_v60 = vld [vmem:[#allocation2 + $0x138] sm:$0xff] }
 0x2f6   :  { %v2006_v59 = vpop.f32.mrf.mxu3 }
 0x2f7   :  { %v4477_v10 = vadd.f32 %v2003_v9, %v1939_v62  ;;  %v254_v62 = vld [vmem:[#allocation5 + $0xf8] sm:$0xff] }
 0x2f8   :  { %v1811_v63 = vpop.f32.mrf.mxu0  ;;  %2313 = vmatpush.msra.mxu0 %v254_v62  ;;  %v3891_v62 = vld [vmem:[#allocation2 + $0x1a8] sm:$0xff] }
 0x2f9   :  { %v1812_v3 = vadd.f32 %v1811_v63, %v4465_v22  ;;  %v1941_v6 = vpop.f32.mrf.mxu2  ;;  %v1879_v34 = vpop.f32.mrf.mxu1  ;;  %2138 = vmatmul.f32.gmra.mxu1 %v3883_v53  ;;  %v446_v63 = vld [vmem:[#allocation5 + $0x6f8] sm:$0xff] }
 0x2fa   :  { %2203 = vmatmul.f32.gmra.mxu2 %v3884_v24  ;;  %2508 = vmatpush.msra.mxu3 %v446_v63  ;;  %v314_v53 = vld [vmem:[#allocation5 + $0x2d8] sm:$0xff] }
 0x2fb   :  { %2070 = vmatmul.f32.gmra.mxu0 %v3878_v41  ;;  %v1877_v55 = vadd.f32 %v1876_v46, %v1812_v3  ;;  %2268 = vmatmul.f32.gmra.mxu3 %v3885_v60  ;;  %v318_v41 = vld [vmem:[#allocation5 + $0x2f8] sm:$0xff]  ;;  %v3890_v60 = vld [vmem:[#allocation2 + $0x1a0] sm:$0xff] }
 0x2fc   :  { %2378 = vmatpush.msra.mxu1 %v318_v41  ;;  %v438_v41 = vld [vmem:[#allocation5 + $0x6b8] sm:$0xff] }
 0x2fd   :  { %v1942_v47 = vadd.f32 %v1941_v6, %v1877_v55  ;;  %v378_v6 = vld [vmem:[#allocation5 + $0x4d8] sm:$0xff] }
 0x2fe   :  { %v2009_v55 = vpop.f32.mrf.mxu3  ;;  %2444 = vmatpush.msra.mxu2 %v378_v6  ;;  %2379 = vmatpush.msra.mxu1 %v314_v53  ;;  %v242_v53 = vld [vmem:[#allocation5 + $0x98] sm:$0xff] }
 0x2ff   :  { %v4480_v48 = vadd.f32 %v2006_v59, %v1942_v47  ;;  %v3889_v47 = vld [vmem:[#allocation2 + $0x178] sm:$0xff] }
 0x300   :  { %v1814_v58 = vpop.f32.mrf.mxu0 }
 0x301   :  { %v1815_v45 = vadd.f32 %v1814_v58, %v4465_v22  ;;  %v1944_v46 = vpop.f32.mrf.mxu2  ;;  %v1882_v9 = vpop.f32.mrf.mxu1  ;;  %2141 = vmatmul.f32.gmra.mxu1 %v3887_v20  ;;  %v250_v58 = vld [vmem:[#allocation5 + $0xd8] sm:$0xff] }
 0x302   :  { %2206 = vmatmul.f32.gmra.mxu2 %v3888_v13  ;;  %2314 = vmatpush.msra.mxu0 %v250_v58  ;;  %v3894_v58 = vld [vmem:[#allocation2 + $0x1e0] sm:$0xff] }
 0x303   :  { %2073 = vmatmul.f32.gmra.mxu0 %v3882_v49  ;;  %v1880_v11 = vadd.f32 %v1879_v34, %v1815_v45  ;;  %2271 = vmatmul.f32.gmra.mxu3 %v3889_v47  ;;  %v442_v34 = vld [vmem:[#allocation5 + $0x6d8] sm:$0xff] }
 0x304   :  { %2509 = vmatpush.msra.mxu3 %v442_v34  ;;  %v3895_v34 = vld [vmem:[#allocation2 + $0x1e8] sm:$0xff] }
 0x305   :  { %v1945_v15 = vadd.f32 %v1944_v46, %v1880_v11  ;;  %v3892_v46 = vld [vmem:[#allocation2 + $0x1b0] sm:$0xff] }
 0x306   :  { %v2012_v24 = vpop.f32.mrf.mxu3  ;;  %2510 = vmatpush.msra.mxu3 %v438_v41  ;;  %v3898_v41 = vld [vmem:[#allocation2 + $0x220] sm:$0xff] }
 0x307   :  { %v4483_v19 = vadd.f32 %v2009_v55, %v1945_v15  ;;  %v374_v15 = vld [vmem:[#allocation5 + $0x4b8] sm:$0xff] }
 0x308   :  { %v1817_v3 = vpop.f32.mrf.mxu0  ;;  %2445 = vmatpush.msra.mxu2 %v374_v15 }
 0x309   :  { %v1818_v16 = vadd.f32 %v1817_v3, %v4465_v22  ;;  %v1947_v35 = vpop.f32.mrf.mxu2  ;;  %v1885_v49 = vpop.f32.mrf.mxu1  ;;  %2144 = vmatmul.f32.gmra.mxu1 %v3891_v62  ;;  %v3893_v3 = vld [vmem:[#allocation2 + $0x1b8] sm:$0xff] }
 0x30a   :  { %2209 = vmatmul.f32.gmra.mxu2 %v3892_v46  ;;  %v306_v46 = vld [vmem:[#allocation5 + $0x298] sm:$0xff] }
 0x30b   :  { %2076 = vmatmul.f32.gmra.mxu0 %v3886_v23  ;;  %v1883_v25 = vadd.f32 %v1882_v9, %v1818_v16  ;;  %2274 = vmatmul.f32.gmra.mxu3 %v3893_v3  ;;  %v246_v9 = vld [vmem:[#allocation5 + $0xb8] sm:$0xff] }
 0x30c   :  { %2315 = vmatpush.msra.mxu0 %v246_v9 }
 0x30d   :  { %v1948_v45 = vadd.f32 %v1947_v35, %v1883_v25  ;;  %v310_v25 = vld [vmem:[#allocation5 + $0x2b8] sm:$0xff] }
 0x30e   :  { %v2015_v6 = vpop.f32.mrf.mxu3  ;;  %2380 = vmatpush.msra.mxu1 %v310_v25  ;;  %2316 = vmatpush.msra.mxu0 %v242_v53  ;;  %v3901_v25 = vld [vmem:[#allocation2 + $0x238] sm:$0xff] }
 0x30f   :  { %v4486_v44 = vadd.f32 %v2012_v24, %v1948_v45  ;;  %v3896_v45 = vld [vmem:[#allocation2 + $0x1f0] sm:$0xff] }
 0x310   :  { %v1820_v59 = vpop.f32.mrf.mxu0  ;;  %2381 = vmatpush.msra.mxu1 %v306_v46  ;;  %v362_v46 = vld [vmem:[#allocation5 + $0x458] sm:$0xff] }
 0x311   :  { %v1821_v11 = vadd.f32 %v1820_v59, %v4465_v22  ;;  %v1950_v16 = vpop.f32.mrf.mxu2  ;;  %v1888_v20 = vpop.f32.mrf.mxu1  ;;  %2147 = vmatmul.f32.gmra.mxu1 %v3895_v34  ;;  %v370_v59 = vld [vmem:[#allocation5 + $0x498] sm:$0xff] }
 0x312   :  { %2212 = vmatmul.f32.gmra.mxu2 %v3896_v45 }
 0x313   :  { %2079 = vmatmul.f32.gmra.mxu0 %v3890_v60  ;;  %v1886_v63 = vadd.f32 %v1885_v49, %v1821_v11  ;;  %v3897_v49 = vld [vmem:[#allocation2 + $0x1f8] sm:$0xff]  ;;  %2446 = vmatpush.msra.mxu2 %v370_v59 }
 0x314   :  { %2277 = vmatmul.f32.gmra.mxu3 %v3897_v49  ;;  %v434_v11 = vld [vmem:[#allocation5 + $0x698] sm:$0xff] }
 0x315   :  { %v1951_v55 = vadd.f32 %v1950_v16, %v1886_v63  ;;  %2511 = vmatpush.msra.mxu3 %v434_v11  ;;  %v3899_v16 = vld [vmem:[#allocation2 + $0x228] sm:$0xff]  ;;  %v302_v59 = vld [vmem:[#allocation5 + $0x278] sm:$0xff] }
 0x316   :  { %v2018_v3 = vpop.f32.mrf.mxu3  ;;  %2382 = vmatpush.msra.mxu1 %v302_v59  ;;  %v3908_v59 = vld [vmem:[#allocation2 + $0x2b0] sm:$0xff] }
 0x317   :  { %v4489_v47 = vadd.f32 %v2015_v6, %v1951_v55  ;;  %v430_v6 = vld [vmem:[#allocation5 + $0x678] sm:$0xff] }
 0x318   :  { %v1823_v23 = vpop.f32.mrf.mxu0  ;;  %2512 = vmatpush.msra.mxu3 %v430_v6 }
 0x319   :  { %v1824_v13 = vadd.f32 %v1823_v23, %v4465_v22  ;;  %v1953_v24 = vpop.f32.mrf.mxu2  ;;  %v1891_v63 = vpop.f32.mrf.mxu1  ;;  %2150 = vmatmul.f32.gmra.mxu1 %v3899_v16  ;;  %v3900_v23 = vld [vmem:[#allocation2 + $0x230] sm:$0xff] }
 0x31a   :  { %2215 = vmatmul.f32.gmra.mxu2 %v3900_v23 }
 0x31b   :  { %2082 = vmatmul.f32.gmra.mxu0 %v3894_v58  ;;  %v1889_v35 = vadd.f32 %v1888_v20, %v1824_v13  ;;  %v366_v20 = vld [vmem:[#allocation5 + $0x478] sm:$0xff] }
 0x31c   :  { %2280 = vmatmul.f32.gmra.mxu3 %v3901_v25  ;;  %2447 = vmatpush.msra.mxu2 %v366_v20  ;;  %v238_v13 = vld [vmem:[#allocation5 + $0x78] sm:$0xff] }
 0x31d   :  { %v1954_v60 = vadd.f32 %v1953_v24, %v1889_v35  ;;  %2317 = vmatpush.msra.mxu0 %v238_v13  ;;  %v3902_v24 = vld [vmem:[#allocation2 + $0x260] sm:$0xff]  ;;  %v298_v25 = vld [vmem:[#allocation5 + $0x258] sm:$0xff] }
 0x31e   :  { %v2021_v53 = vpop.f32.mrf.mxu3  ;;  %2448 = vmatpush.msra.mxu2 %v362_v46  ;;  %2383 = vmatpush.msra.mxu1 %v298_v25 }
 0x31f   :  { %v4492_v9 = vadd.f32 %v2018_v3, %v1954_v60  ;;  %v3903_v60 = vld [vmem:[#allocation2 + $0x268] sm:$0xff]  ;;  %v234_v3 = vld [vmem:[#allocation5 + $0x58] sm:$0xff] }
 0x320   :  { %v1826_v62 = vpop.f32.mrf.mxu0  ;;  %2318 = vmatpush.msra.mxu0 %v234_v3  ;;  %v294_v3 = vld [vmem:[#allocation5 + $0x238] sm:$0xff] }
 0x321   :  { %v1827_v15 = vadd.f32 %v1826_v62, %v4465_v22  ;;  %v1956_v58 = vpop.f32.mrf.mxu2  ;;  %v1894_v45 = vpop.f32.mrf.mxu1  ;;  %2153 = vmatmul.f32.gmra.mxu1 %v3903_v60  ;;  %v422_v60 = vld [vmem:[#allocation5 + $0x638] sm:$0xff] }
 0x322   :  { %2384 = vmatpush.msra.mxu1 %v294_v3  ;;  %v3915_v3 = vld [vmem:[#allocation2 + $0x328] sm:$0xff] }
 0x323   :  { %2085 = vmatmul.f32.gmra.mxu0 %v3898_v41  ;;  %v1892_v55 = vadd.f32 %v1891_v63, %v1827_v15  ;;  %v3904_v63 = vld [vmem:[#allocation2 + $0x270] sm:$0xff]  ;;  %v3905_v15 = vld [vmem:[#allocation2 + $0x278] sm:$0xff] }
 0x324   :  { %2218 = vmatmul.f32.gmra.mxu2 %v3904_v63  ;;  %2283 = vmatmul.f32.gmra.mxu3 %v3905_v15  ;;  %v426_v41 = vld [vmem:[#allocation5 + $0x658] sm:$0xff] }
 0x325   :  { %v1957_v34 = vadd.f32 %v1956_v58, %v1892_v55  ;;  %2513 = vmatpush.msra.mxu3 %v426_v41 }
 0x326   :  { %v2024_v6 = vpop.f32.mrf.mxu3 }
 0x327   :  { %v4495_v11 = vadd.f32 %v2021_v53, %v1957_v34  ;;  %v3906_v34 = vld [vmem:[#allocation2 + $0x2a0] sm:$0xff]  ;;  %v3909_v53 = vld [vmem:[#allocation2 + $0x2b8] sm:$0xff]  ;;  %2514 = vmatpush.msra.mxu3 %v422_v60 }
 0x328   :  { %v1829_v35 = vpop.f32.mrf.mxu0  ;;  %v290_v60 = vld [vmem:[#allocation5 + $0x218] sm:$0xff] }
 0x329   :  { %v1830_v49 = vadd.f32 %v1829_v35, %v4465_v22  ;;  %v1959_v16 = vpop.f32.mrf.mxu2  ;;  %v1897_v20 = vpop.f32.mrf.mxu1  ;;  %v3907_v35 = vld [vmem:[#allocation2 + $0x2a8] sm:$0xff]  ;;  %2385 = vmatpush.msra.mxu1 %v290_v60  ;;  %v3918_v60 = vld [vmem:[#allocation2 + $0x360] sm:$0xff] }
 0x32a   :  { %2156 = vmatmul.f32.gmra.mxu1 %v3907_v35  ;;  %v226_v35 = vld [vmem:[#allocation5 + $0x18] sm:$0xff] }
 0x32b   :  { %2088 = vmatmul.f32.gmra.mxu0 %v3902_v24  ;;  %v1895_v62 = vadd.f32 %v1894_v45, %v1830_v49  ;;  %v358_v49 = vld [vmem:[#allocation5 + $0x438] sm:$0xff] }
 0x32c   :  { %2221 = vmatmul.f32.gmra.mxu2 %v3908_v59  ;;  %2286 = vmatmul.f32.gmra.mxu3 %v3909_v53  ;;  %v230_v24 = vld [vmem:[#allocation5 + $0x38] sm:$0xff] }
 0x32d   :  { %v1960_v55 = vadd.f32 %v1959_v16, %v1895_v62  ;;  %2449 = vmatpush.msra.mxu2 %v358_v49  ;;  %2319 = vmatpush.msra.mxu0 %v230_v24 }
 0x32e   :  { %v2027_v16 = vpop.f32.mrf.mxu3 }
 0x32f   :  { %v4498_v58 = vadd.f32 %v2024_v6, %v1960_v55  ;;  %v354_v6 = vld [vmem:[#allocation5 + $0x418] sm:$0xff]  ;;  %2320 = vmatpush.msra.mxu0 %v226_v35 }
 0x330   :  { %v1832_v23 = vpop.f32.mrf.mxu0  ;;  %2450 = vmatpush.msra.mxu2 %v354_v6 }
 0x331   :  { %v1833_v13 = vadd.f32 %v1832_v23, %v4465_v22  ;;  %v1962_v62 = vpop.f32.mrf.mxu2  ;;  %v1900_v15 = vpop.f32.mrf.mxu1  ;;  %v3910_v23 = vld [vmem:[#allocation2 + $0x2e0] sm:$0xff] }
 0x333   :  { %2091 = vmatmul.f32.gmra.mxu0 %v3906_v34  ;;  %v1898_v45 = vadd.f32 %v1897_v20, %v1833_v13  ;;  %v3911_v20 = vld [vmem:[#allocation2 + $0x2e8] sm:$0xff]  ;;  %v3912_v13 = vld [vmem:[#allocation2 + $0x2f0] sm:$0xff]  ;;  %v3913_v34 = vld [vmem:[#allocation2 + $0x2f8] sm:$0xff] }
 0x334   :  { %2159 = vmatmul.f32.gmra.mxu1 %v3911_v20  ;;  %2224 = vmatmul.f32.gmra.mxu2 %v3912_v13  ;;  %v3917_v20 = vld [vmem:[#allocation2 + $0x338] sm:$0xff] }
 0x335   :  { %v1963_v63 = vadd.f32 %v1962_v62, %v1898_v45  ;;  %2289 = vmatmul.f32.gmra.mxu3 %v3913_v34  ;;  %v418_v45 = vld [vmem:[#allocation5 + $0x618] sm:$0xff] }
 0x336   :  { %2515 = vmatpush.msra.mxu3 %v418_v45  ;;  %v734_v13 = vld [vmem:[#allocation5 + $0xff8] sm:$0xff] }
 0x337   :  { %v4501_v55 = vadd.f32 %v2027_v16, %v1963_v63  ;;  %v2030_v63 = vpop.f32.mrf.mxu3  ;;  %v3916_v16 = vld [vmem:[#allocation2 + $0x330] sm:$0xff] }
 0x338   :  { %v1835_v46 = vpop.f32.mrf.mxu0  ;;  %2760 = vmatpush.msrb.mxu3 %v734_v13 }
 0x339   :  { %v1836_v41 = vadd.f32 %v1835_v46, %v4465_v22  ;;  %v1965_v59 = vpop.f32.mrf.mxu2  ;;  %v1903_v24 = vpop.f32.mrf.mxu1 }
 0x33b   :  { %2094 = vmatmul.f32.gmra.mxu0 %v3910_v23  ;;  %v1901_v25 = vadd.f32 %v1900_v15, %v1836_v41  ;;  %v3914_v15 = vld [vmem:[#allocation2 + $0x320] sm:$0xff]  ;;  %v670_v23 = vld [vmem:[#allocation5 + $0xdf8] sm:$0xff] }
 0x33c   :  { %2162 = vmatmul.f32.gmra.mxu1 %v3915_v3  ;;  %2227 = vmatmul.f32.gmra.mxu2 %v3916_v16  ;;  %v3921_v3 = vld [vmem:[#allocation2 + $0x378] sm:$0xff] }
 0x33d   :  { %v1966_v49 = vadd.f32 %v1965_v59, %v1901_v25  ;;  %2292 = vmatmul.f32.gmra.mxu3 %v3917_v20  ;;  %2695 = vmatpush.msrb.mxu2 %v670_v23  ;;  %v542_v25 = vld [vmem:[#allocation5 + $0x9f8] sm:$0xff] }
 0x33e   :  { %2565 = vmatpush.msrb.mxu0 %v542_v25  ;;  %v606_v59 = vld [vmem:[#allocation5 + $0xbf8] sm:$0xff] }
 0x33f   :  { %v4504_v46 = vadd.f32 %v2030_v63, %v1966_v49  ;;  %2630 = vmatpush.msrb.mxu1 %v606_v59  ;;  %v666_v16 = vld [vmem:[#allocation5 + $0xdd8] sm:$0xff] }
 0x340   :  { %v1838_v53 = vpop.f32.mrf.mxu0  ;;  %v730_v23 = vld [vmem:[#allocation5 + $0xfd8] sm:$0xff]  ;;  %2696 = vmatpush.msrb.mxu2 %v666_v16 }
 0x341   :  { %v1839_v62 = vadd.f32 %v1838_v53, %v4465_v22  ;;  %v1968_v6 = vpop.f32.mrf.mxu2  ;;  %v1906_v45 = vpop.f32.mrf.mxu1  ;;  %2761 = vmatpush.msrb.mxu3 %v730_v23  ;;  %v726_v16 = vld [vmem:[#allocation5 + $0xfb8] sm:$0xff] }
 0x342   :  { %v2033_v53 = vpop.f32.mrf.mxu3 }
 0x343   :  { %2097 = vmatmul.f32.gmra.mxu0 %v3914_v15  ;;  %v1904_v41 = vadd.f32 %v1903_v24, %v1839_v62  ;;  %v3919_v62 = vld [vmem:[#allocation2 + $0x368] sm:$0xff]  ;;  %v3920_v15 = vld [vmem:[#allocation2 + $0x370] sm:$0xff]  ;;  %2762 = vmatpush.msrb.mxu3 %v726_v16 }
 0x344   :  { %2165 = vmatmul.f32.gmra.mxu1 %v3919_v62  ;;  %2230 = vmatmul.f32.gmra.mxu2 %v3920_v15  ;;  %v3924_v62 = vld [vmem:[#allocation2 + $0x3b0] sm:$0xff]  ;;  %v3925_v15 = vld [vmem:[#allocation2 + $0x3b8] sm:$0xff] }
 0x345   :  { %v1969_v34 = vadd.f32 %v1968_v6, %v1904_v41  ;;  %2295 = vmatmul.f32.gmra.mxu3 %v3921_v3  ;;  %v538_v41 = vld [vmem:[#allocation5 + $0x9d8] sm:$0xff] }
 0x346   :  { %2566 = vmatpush.msrb.mxu0 %v538_v41  ;;  %v534_v3 = vld [vmem:[#allocation5 + $0x9b8] sm:$0xff] }
 0x347   :  { %v4507_v24 = vadd.f32 %v2033_v53, %v1969_v34  ;;  %v602_v34 = vld [vmem:[#allocation5 + $0xbd8] sm:$0xff]  ;;  %v3923_v53 = vld [vmem:[#allocation2 + $0x3a8] sm:$0xff] }
 0x348   :  { %v1841_v35 = vpop.f32.mrf.mxu0  ;;  %2631 = vmatpush.msrb.mxu1 %v602_v34  ;;  %2567 = vmatpush.msrb.mxu0 %v534_v3  ;;  %v722_v3 = vld [vmem:[#allocation5 + $0xf98] sm:$0xff] }
 0x349   :  { %v1842_v49 = vadd.f32 %v1841_v35, %v4465_v22  ;;  %v1971_v20 = vpop.f32.mrf.mxu2  ;;  %v1909_v6 = vpop.f32.mrf.mxu1  ;;  %2763 = vmatpush.msrb.mxu3 %v722_v3 }
 0x34a   :  { %v2036_v59 = vpop.f32.mrf.mxu3 }
 0x34b   :  { %2100 = vmatmul.f32.gmra.mxu0 %v3918_v60  ;;  %v1907_v63 = vadd.f32 %v1906_v45, %v1842_v49  ;;  %v3922_v49 = vld [vmem:[#allocation2 + $0x3a0] sm:$0xff] }
 0x34c   :  { %2168 = vmatmul.f32.gmra.mxu1 %v3923_v53  ;;  %2233 = vmatmul.f32.gmra.mxu2 %v3924_v62  ;;  %v3928_v62 = vld [vmem:[#allocation2 + $0x3f0] sm:$0xff] }
 0x34d   :  { %v1972_v25 = vadd.f32 %v1971_v20, %v1907_v63  ;;  %2298 = vmatmul.f32.gmra.mxu3 %v3925_v15  ;;  %v662_v63 = vld [vmem:[#allocation5 + $0xdb8] sm:$0xff] }
 0x34e   :  { %2697 = vmatpush.msrb.mxu2 %v662_v63  ;;  %v3929_v15 = vld [vmem:[#allocation2 + $0x3f8] sm:$0xff] }
 0x34f   :  { %v4510_v45 = vadd.f32 %v2036_v59, %v1972_v25  ;;  %v598_v25 = vld [vmem:[#allocation5 + $0xbb8] sm:$0xff] }
 0x350   :  { %v1844_v13 = vpop.f32.mrf.mxu0  ;;  %2632 = vmatpush.msrb.mxu1 %v598_v25  ;;  %v530_v63 = vld [vmem:[#allocation5 + $0x998] sm:$0xff] }
 0x351   :  { %v1845_v35 = vadd.f32 %v1844_v13, %v4465_v22  ;;  %v1974_v41 = vpop.f32.mrf.mxu2  ;;  %v1912_v13 = vpop.f32.mrf.mxu1  ;;  %2568 = vmatpush.msrb.mxu0 %v530_v63  ;;  %v718_v63 = vld [vmem:[#allocation5 + $0xf78] sm:$0xff] }
 0x352   :  { %v2039_v59 = vpop.f32.mrf.mxu3  ;;  %2764 = vmatpush.msrb.mxu3 %v718_v63 }
 0x353   :  { %2103 = vmatmul.f32.gmra.mxu0 %v3922_v49  ;;  %v1910_v60 = vadd.f32 %v1909_v6, %v1845_v35  ;;  %v3926_v35 = vld [vmem:[#allocation2 + $0x3e0] sm:$0xff]  ;;  %v3927_v49 = vld [vmem:[#allocation2 + $0x3e8] sm:$0xff] }
 0x354   :  { %2171 = vmatmul.f32.gmra.mxu1 %v3927_v49  ;;  %2236 = vmatmul.f32.gmra.mxu2 %v3928_v62  ;;  %v3931_v49 = vld [vmem:[#allocation2 + $0x8] sm:$0xff]  ;;  %v3932_v62 = vld [vmem:[#allocation2 + $0x10] sm:$0xff] }
 0x355   :  { %v1975_v23 = vadd.f32 %v1974_v41, %v1910_v60  ;;  %2301 = vmatmul.f32.gmra.mxu3 %v3929_v15  ;;  %v658_v60 = vld [vmem:[#allocation5 + $0xd98] sm:$0xff] }
 0x356   :  { %2698 = vmatpush.msrb.mxu2 %v658_v60  ;;  %v3933_v15 = vld [vmem:[#allocation2 + $0x18] sm:$0xff] }
 0x357   :  { %v4513_v6 = vadd.f32 %v2039_v59, %v1975_v23  ;;  %v594_v23 = vld [vmem:[#allocation5 + $0xb98] sm:$0xff] }
 0x358   :  { %v1847_v20 = vpop.f32.mrf.mxu0  ;;  %2633 = vmatpush.msrb.mxu1 %v594_v23  ;;  %v526_v60 = vld [vmem:[#allocation5 + $0x978] sm:$0xff] }
 0x359   :  { %v1848_v34 = vadd.f32 %v1847_v20, %v4465_v22  ;;  %v1977_v16 = vpop.f32.mrf.mxu2  ;;  %v2127_v20 = vpop.f32.mrf.mxu1  ;;  %2569 = vmatpush.msrb.mxu0 %v526_v60  ;;  %v714_v60 = vld [vmem:[#allocation5 + $0xf58] sm:$0xff] }
 0x35a   :  { %v2042_v25 = vpop.f32.mrf.mxu3  ;;  %2765 = vmatpush.msrb.mxu3 %v714_v60 }
 0x35b   :  { %2106 = vmatmul.f32.gmra.mxu0 %v3926_v35  ;;  %v1913_v53 = vadd.f32 %v1912_v13, %v1848_v34  ;;  %v3930_v35 = vld [vmem:[#allocation2] sm:$0xff] }
 0x35c   :  { %2386 = vmatmul.f32.vlgmr.msra.gmra.mxu1 %v3931_v49  ;;  %2451 = vmatmul.f32.vlgmr.msra.gmra.mxu2 %v3932_v62  ;;  %v3935_v49 = vld [vmem:[#allocation2 + $0x48] sm:$0xff]  ;;  %v3936_v62 = vld [vmem:[#allocation2 + $0x50] sm:$0xff] }
 0x35d   :  { %v1978_v22 = vadd.f32 %v1977_v16, %v1913_v53  ;;  %2516 = vmatmul.f32.vlgmr.msra.gmra.mxu3 %v3933_v15  ;;  %v654_v53 = vld [vmem:[#allocation5 + $0xd78] sm:$0xff] }
 0x35e   :  { %2699 = vmatpush.msrb.mxu2 %v654_v53  ;;  %v3937_v15 = vld [vmem:[#allocation2 + $0x58] sm:$0xff] }
 0x35f   :  { %v4516_v13 = vadd.f32 %v2042_v25, %v1978_v22  ;;  %v590_v22 = vld [vmem:[#allocation5 + $0xb78] sm:$0xff] }
 0x360   :  { %v2062_v41 = vpop.f32.mrf.mxu0  ;;  %2634 = vmatpush.msrb.mxu1 %v590_v22  ;;  %v522_v53 = vld [vmem:[#allocation5 + $0x958] sm:$0xff] }
 0x361   :  { %v2063_v59 = vadd.f32 %v2062_v41, %v4471_v4  ;;  %v2192_v3 = vpop.f32.mrf.mxu2  ;;  %v2130_v41 = vpop.f32.mrf.mxu1  ;;  %2570 = vmatpush.msrb.mxu0 %v522_v53  ;;  %v710_v53 = vld [vmem:[#allocation5 + $0xf38] sm:$0xff] }
 0x362   :  { %v2257_v23 = vpop.f32.mrf.mxu3  ;;  %2766 = vmatpush.msrb.mxu3 %v710_v53 }
 0x363   :  { %v2128_v34 = vadd.f32 %v2127_v20, %v2063_v59  ;;  %2321 = vmatmul.f32.vlgmr.msra.gmra.mxu0 %v3930_v35  ;;  %v3934_v35 = vld [vmem:[#allocation2 + $0x40] sm:$0xff] }
 0x364   :  { %2389 = vmatmul.f32.gmra.mxu1 %v3935_v49  ;;  %2454 = vmatmul.f32.gmra.mxu2 %v3936_v62  ;;  %v3939_v49 = vld [vmem:[#allocation2 + $0x88] sm:$0xff]  ;;  %v3940_v62 = vld [vmem:[#allocation2 + $0x90] sm:$0xff] }
 0x365   :  { %v2193_v16 = vadd.f32 %v2192_v3, %v2128_v34  ;;  %2519 = vmatmul.f32.gmra.mxu3 %v3937_v15  ;;  %v650_v34 = vld [vmem:[#allocation5 + $0xd58] sm:$0xff] }
 0x366   :  { %2700 = vmatpush.msrb.mxu2 %v650_v34  ;;  %v3941_v15 = vld [vmem:[#allocation2 + $0x98] sm:$0xff] }
 0x367   :  { %v4519_v25 = vadd.f32 %v2257_v23, %v2193_v16  ;;  %v586_v16 = vld [vmem:[#allocation5 + $0xb58] sm:$0xff] }
 0x368   :  { %v2065_v4 = vpop.f32.mrf.mxu0  ;;  %2635 = vmatpush.msrb.mxu1 %v586_v16  ;;  %v518_v34 = vld [vmem:[#allocation5 + $0x938] sm:$0xff] }
 0x369   :  { %v2066_v20 = vadd.f32 %v2065_v4, %v4474_v50  ;;  %v2195_v63 = vpop.f32.mrf.mxu2  ;;  %v2133_v4 = vpop.f32.mrf.mxu1  ;;  %2571 = vmatpush.msrb.mxu0 %v518_v34  ;;  %v706_v34 = vld [vmem:[#allocation5 + $0xf18] sm:$0xff] }
 0x36a   :  { %v2260_v22 = vpop.f32.mrf.mxu3  ;;  %2767 = vmatpush.msrb.mxu3 %v706_v34 }
 0x36b   :  { %v2131_v59 = vadd.f32 %v2130_v41, %v2066_v20  ;;  %2324 = vmatmul.f32.gmra.mxu0 %v3934_v35  ;;  %v3938_v35 = vld [vmem:[#allocation2 + $0x80] sm:$0xff] }
 0x36c   :  { %2392 = vmatmul.f32.gmra.mxu1 %v3939_v49  ;;  %2457 = vmatmul.f32.gmra.mxu2 %v3940_v62  ;;  %v3943_v49 = vld [vmem:[#allocation2 + $0xc8] sm:$0xff]  ;;  %v3944_v62 = vld [vmem:[#allocation2 + $0xd0] sm:$0xff] }
 0x36d   :  { %v2196_v50 = vadd.f32 %v2195_v63, %v2131_v59  ;;  %2522 = vmatmul.f32.gmra.mxu3 %v3941_v15  ;;  %v646_v59 = vld [vmem:[#allocation5 + $0xd38] sm:$0xff] }
 0x36e   :  { %2701 = vmatpush.msrb.mxu2 %v646_v59  ;;  %v3945_v15 = vld [vmem:[#allocation2 + $0xd8] sm:$0xff] }
 0x36f   :  { %v4522_v20 = vadd.f32 %v2260_v22, %v2196_v50  ;;  %v582_v50 = vld [vmem:[#allocation5 + $0xb38] sm:$0xff] }
 0x370   :  { %v2068_v3 = vpop.f32.mrf.mxu0  ;;  %2636 = vmatpush.msrb.mxu1 %v582_v50  ;;  %v514_v59 = vld [vmem:[#allocation5 + $0x918] sm:$0xff] }
 0x371   :  { %v2069_v41 = vadd.f32 %v2068_v3, %v4477_v10  ;;  %v2198_v60 = vpop.f32.mrf.mxu2  ;;  %v2136_v3 = vpop.f32.mrf.mxu1  ;;  %2572 = vmatpush.msrb.mxu0 %v514_v59  ;;  %v702_v59 = vld [vmem:[#allocation5 + $0xef8] sm:$0xff] }
 0x372   :  { %v2263_v16 = vpop.f32.mrf.mxu3  ;;  %2768 = vmatpush.msrb.mxu3 %v702_v59 }
 0x373   :  { %v2134_v23 = vadd.f32 %v2133_v4, %v2069_v41  ;;  %2327 = vmatmul.f32.gmra.mxu0 %v3938_v35  ;;  %v3942_v35 = vld [vmem:[#allocation2 + $0xc0] sm:$0xff] }
 0x374   :  { %2395 = vmatmul.f32.gmra.mxu1 %v3943_v49  ;;  %2460 = vmatmul.f32.gmra.mxu2 %v3944_v62  ;;  %v3947_v49 = vld [vmem:[#allocation2 + $0x108] sm:$0xff]  ;;  %v3948_v62 = vld [vmem:[#allocation2 + $0x110] sm:$0xff] }
 0x375   :  { %v2199_v10 = vadd.f32 %v2198_v60, %v2134_v23  ;;  %2525 = vmatmul.f32.gmra.mxu3 %v3945_v15  ;;  %v642_v23 = vld [vmem:[#allocation5 + $0xd18] sm:$0xff] }
 0x376   :  { %2702 = vmatpush.msrb.mxu2 %v642_v23  ;;  %v3949_v15 = vld [vmem:[#allocation2 + $0x118] sm:$0xff] }
 0x377   :  { %v4525_v41 = vadd.f32 %v2263_v16, %v2199_v10  ;;  %v578_v10 = vld [vmem:[#allocation5 + $0xb18] sm:$0xff] }
 0x378   :  { %v2071_v63 = vpop.f32.mrf.mxu0  ;;  %2637 = vmatpush.msrb.mxu1 %v578_v10  ;;  %v510_v23 = vld [vmem:[#allocation5 + $0x8f8] sm:$0xff] }
 0x379   :  { %v2072_v4 = vadd.f32 %v2071_v63, %v4480_v48  ;;  %v2201_v53 = vpop.f32.mrf.mxu2  ;;  %v2139_v63 = vpop.f32.mrf.mxu1  ;;  %2573 = vmatpush.msrb.mxu0 %v510_v23  ;;  %v698_v23 = vld [vmem:[#allocation5 + $0xed8] sm:$0xff] }
 0x37a   :  { %v2266_v50 = vpop.f32.mrf.mxu3  ;;  %2769 = vmatpush.msrb.mxu3 %v698_v23 }
 0x37b   :  { %v2137_v22 = vadd.f32 %v2136_v3, %v2072_v4  ;;  %2330 = vmatmul.f32.gmra.mxu0 %v3942_v35  ;;  %v3946_v35 = vld [vmem:[#allocation2 + $0x100] sm:$0xff] }
 0x37c   :  { %2398 = vmatmul.f32.gmra.mxu1 %v3947_v49  ;;  %2463 = vmatmul.f32.gmra.mxu2 %v3948_v62  ;;  %v3951_v49 = vld [vmem:[#allocation2 + $0x148] sm:$0xff]  ;;  %v3952_v62 = vld [vmem:[#allocation2 + $0x150] sm:$0xff] }
 0x37d   :  { %v2202_v48 = vadd.f32 %v2201_v53, %v2137_v22  ;;  %2528 = vmatmul.f32.gmra.mxu3 %v3949_v15  ;;  %v638_v22 = vld [vmem:[#allocation5 + $0xcf8] sm:$0xff] }
 0x37e   :  { %2703 = vmatpush.msrb.mxu2 %v638_v22  ;;  %v3953_v15 = vld [vmem:[#allocation2 + $0x158] sm:$0xff] }
 0x37f   :  { %v4528_v4 = vadd.f32 %v2266_v50, %v2202_v48  ;;  %v574_v48 = vld [vmem:[#allocation5 + $0xaf8] sm:$0xff] }
 0x380   :  { %v2074_v60 = vpop.f32.mrf.mxu0  ;;  %2638 = vmatpush.msrb.mxu1 %v574_v48  ;;  %v506_v22 = vld [vmem:[#allocation5 + $0x8d8] sm:$0xff] }
 0x381   :  { %v2075_v3 = vadd.f32 %v2074_v60, %v4483_v19  ;;  %v2204_v34 = vpop.f32.mrf.mxu2  ;;  %v2142_v60 = vpop.f32.mrf.mxu1  ;;  %2574 = vmatpush.msrb.mxu0 %v506_v22  ;;  %v694_v22 = vld [vmem:[#allocation5 + $0xeb8] sm:$0xff] }
 0x382   :  { %v2269_v10 = vpop.f32.mrf.mxu3  ;;  %2770 = vmatpush.msrb.mxu3 %v694_v22 }
 0x383   :  { %v2140_v16 = vadd.f32 %v2139_v63, %v2075_v3  ;;  %2333 = vmatmul.f32.gmra.mxu0 %v3946_v35  ;;  %v3950_v35 = vld [vmem:[#allocation2 + $0x140] sm:$0xff] }
 0x384   :  { %2401 = vmatmul.f32.gmra.mxu1 %v3951_v49  ;;  %2466 = vmatmul.f32.gmra.mxu2 %v3952_v62  ;;  %v3955_v49 = vld [vmem:[#allocation2 + $0x188] sm:$0xff]  ;;  %v3956_v62 = vld [vmem:[#allocation2 + $0x190] sm:$0xff] }
 0x385   :  { %v2205_v19 = vadd.f32 %v2204_v34, %v2140_v16  ;;  %2531 = vmatmul.f32.gmra.mxu3 %v3953_v15  ;;  %v634_v16 = vld [vmem:[#allocation5 + $0xcd8] sm:$0xff] }
 0x386   :  { %2704 = vmatpush.msrb.mxu2 %v634_v16  ;;  %v3957_v15 = vld [vmem:[#allocation2 + $0x198] sm:$0xff] }
 0x387   :  { %v4531_v3 = vadd.f32 %v2269_v10, %v2205_v19  ;;  %v570_v19 = vld [vmem:[#allocation5 + $0xad8] sm:$0xff] }
 0x388   :  { %v2077_v53 = vpop.f32.mrf.mxu0  ;;  %2639 = vmatpush.msrb.mxu1 %v570_v19  ;;  %v502_v16 = vld [vmem:[#allocation5 + $0x8b8] sm:$0xff] }
 0x389   :  { %v2078_v63 = vadd.f32 %v2077_v53, %v4486_v44  ;;  %v2207_v59 = vpop.f32.mrf.mxu2  ;;  %v2145_v53 = vpop.f32.mrf.mxu1  ;;  %2575 = vmatpush.msrb.mxu0 %v502_v16  ;;  %v690_v16 = vld [vmem:[#allocation5 + $0xe98] sm:$0xff] }
 0x38a   :  { %v2272_v48 = vpop.f32.mrf.mxu3  ;;  %2771 = vmatpush.msrb.mxu3 %v690_v16 }
 0x38b   :  { %v2143_v50 = vadd.f32 %v2142_v60, %v2078_v63  ;;  %2336 = vmatmul.f32.gmra.mxu0 %v3950_v35  ;;  %v3954_v35 = vld [vmem:[#allocation2 + $0x180] sm:$0xff] }
 0x38c   :  { %2404 = vmatmul.f32.gmra.mxu1 %v3955_v49  ;;  %2469 = vmatmul.f32.gmra.mxu2 %v3956_v62  ;;  %v3959_v49 = vld [vmem:[#allocation2 + $0x1c8] sm:$0xff]  ;;  %v3960_v62 = vld [vmem:[#allocation2 + $0x1d0] sm:$0xff] }
 0x38d   :  { %v2208_v44 = vadd.f32 %v2207_v59, %v2143_v50  ;;  %2534 = vmatmul.f32.gmra.mxu3 %v3957_v15  ;;  %v630_v50 = vld [vmem:[#allocation5 + $0xcb8] sm:$0xff] }
 0x38e   :  { %2705 = vmatpush.msrb.mxu2 %v630_v50  ;;  %v3961_v15 = vld [vmem:[#allocation2 + $0x1d8] sm:$0xff] }
 0x38f   :  { %v4534_v63 = vadd.f32 %v2272_v48, %v2208_v44  ;;  %v566_v44 = vld [vmem:[#allocation5 + $0xab8] sm:$0xff] }
 0x390   :  { %v2080_v34 = vpop.f32.mrf.mxu0  ;;  %2640 = vmatpush.msrb.mxu1 %v566_v44  ;;  %v498_v50 = vld [vmem:[#allocation5 + $0x898] sm:$0xff] }
 0x391   :  { %v2081_v60 = vadd.f32 %v2080_v34, %v4489_v47  ;;  %v2210_v23 = vpop.f32.mrf.mxu2  ;;  %v2148_v34 = vpop.f32.mrf.mxu1  ;;  %2576 = vmatpush.msrb.mxu0 %v498_v50  ;;  %v686_v50 = vld [vmem:[#allocation5 + $0xe78] sm:$0xff] }
 0x392   :  { %v2275_v19 = vpop.f32.mrf.mxu3  ;;  %2772 = vmatpush.msrb.mxu3 %v686_v50 }
 0x393   :  { %v2146_v10 = vadd.f32 %v2145_v53, %v2081_v60  ;;  %2339 = vmatmul.f32.gmra.mxu0 %v3954_v35  ;;  %v3958_v35 = vld [vmem:[#allocation2 + $0x1c0] sm:$0xff] }
 0x394   :  { %2407 = vmatmul.f32.gmra.mxu1 %v3959_v49  ;;  %2472 = vmatmul.f32.gmra.mxu2 %v3960_v62  ;;  %v3963_v49 = vld [vmem:[#allocation2 + $0x208] sm:$0xff]  ;;  %v3964_v62 = vld [vmem:[#allocation2 + $0x210] sm:$0xff] }
 0x395   :  { %v2211_v47 = vadd.f32 %v2210_v23, %v2146_v10  ;;  %2537 = vmatmul.f32.gmra.mxu3 %v3961_v15  ;;  %v626_v10 = vld [vmem:[#allocation5 + $0xc98] sm:$0xff] }
 0x396   :  { %2706 = vmatpush.msrb.mxu2 %v626_v10  ;;  %v3965_v15 = vld [vmem:[#allocation2 + $0x218] sm:$0xff] }
 0x397   :  { %v4537_v60 = vadd.f32 %v2275_v19, %v2211_v47  ;;  %v562_v47 = vld [vmem:[#allocation5 + $0xa98] sm:$0xff] }
 0x398   :  { %v2083_v59 = vpop.f32.mrf.mxu0  ;;  %2641 = vmatpush.msrb.mxu1 %v562_v47  ;;  %v494_v10 = vld [vmem:[#allocation5 + $0x878] sm:$0xff] }
 0x399   :  { %v2084_v53 = vadd.f32 %v2083_v59, %v4492_v9  ;;  %v2213_v22 = vpop.f32.mrf.mxu2  ;;  %v2151_v59 = vpop.f32.mrf.mxu1  ;;  %2577 = vmatpush.msrb.mxu0 %v494_v10  ;;  %v682_v10 = vld [vmem:[#allocation5 + $0xe58] sm:$0xff] }
 0x39a   :  { %v2278_v44 = vpop.f32.mrf.mxu3  ;;  %2773 = vmatpush.msrb.mxu3 %v682_v10 }
 0x39b   :  { %v2149_v48 = vadd.f32 %v2148_v34, %v2084_v53  ;;  %2342 = vmatmul.f32.gmra.mxu0 %v3958_v35  ;;  %v3962_v35 = vld [vmem:[#allocation2 + $0x200] sm:$0xff] }
 0x39c   :  { %2410 = vmatmul.f32.gmra.mxu1 %v3963_v49  ;;  %2475 = vmatmul.f32.gmra.mxu2 %v3964_v62  ;;  %v3967_v49 = vld [vmem:[#allocation2 + $0x248] sm:$0xff]  ;;  %v3968_v62 = vld [vmem:[#allocation2 + $0x250] sm:$0xff] }
 0x39d   :  { %v2214_v9 = vadd.f32 %v2213_v22, %v2149_v48  ;;  %2540 = vmatmul.f32.gmra.mxu3 %v3965_v15  ;;  %v622_v48 = vld [vmem:[#allocation5 + $0xc78] sm:$0xff] }
 0x39e   :  { %2707 = vmatpush.msrb.mxu2 %v622_v48  ;;  %v3969_v15 = vld [vmem:[#allocation2 + $0x258] sm:$0xff] }
 0x39f   :  { %v4540_v53 = vadd.f32 %v2278_v44, %v2214_v9  ;;  %v558_v9 = vld [vmem:[#allocation5 + $0xa78] sm:$0xff] }
 0x3a0   :  { %v2086_v23 = vpop.f32.mrf.mxu0  ;;  %2642 = vmatpush.msrb.mxu1 %v558_v9  ;;  %v490_v48 = vld [vmem:[#allocation5 + $0x858] sm:$0xff] }
 0x3a1   :  { %v2087_v34 = vadd.f32 %v2086_v23, %v4495_v11  ;;  %v2216_v16 = vpop.f32.mrf.mxu2  ;;  %v2154_v23 = vpop.f32.mrf.mxu1  ;;  %2578 = vmatpush.msrb.mxu0 %v490_v48  ;;  %v678_v48 = vld [vmem:[#allocation5 + $0xe38] sm:$0xff] }
 0x3a2   :  { %v2281_v47 = vpop.f32.mrf.mxu3  ;;  %2774 = vmatpush.msrb.mxu3 %v678_v48 }
 0x3a3   :  { %v2152_v19 = vadd.f32 %v2151_v59, %v2087_v34  ;;  %2345 = vmatmul.f32.gmra.mxu0 %v3962_v35  ;;  %v3966_v35 = vld [vmem:[#allocation2 + $0x240] sm:$0xff] }
 0x3a4   :  { %2413 = vmatmul.f32.gmra.mxu1 %v3967_v49  ;;  %2478 = vmatmul.f32.gmra.mxu2 %v3968_v62  ;;  %v3971_v49 = vld [vmem:[#allocation2 + $0x288] sm:$0xff]  ;;  %v3972_v62 = vld [vmem:[#allocation2 + $0x290] sm:$0xff] }
 0x3a5   :  { %v2217_v11 = vadd.f32 %v2216_v16, %v2152_v19  ;;  %2543 = vmatmul.f32.gmra.mxu3 %v3969_v15  ;;  %v618_v19 = vld [vmem:[#allocation5 + $0xc58] sm:$0xff] }
 0x3a6   :  { %2708 = vmatpush.msrb.mxu2 %v618_v19  ;;  %v3973_v15 = vld [vmem:[#allocation2 + $0x298] sm:$0xff] }
 0x3a7   :  { %v4543_v34 = vadd.f32 %v2281_v47, %v2217_v11  ;;  %v554_v11 = vld [vmem:[#allocation5 + $0xa58] sm:$0xff] }
 0x3a8   :  { %v2089_v22 = vpop.f32.mrf.mxu0  ;;  %2643 = vmatpush.msrb.mxu1 %v554_v11  ;;  %v486_v19 = vld [vmem:[#allocation5 + $0x838] sm:$0xff] }
 0x3a9   :  { %v2090_v59 = vadd.f32 %v2089_v22, %v4498_v58  ;;  %v2219_v50 = vpop.f32.mrf.mxu2  ;;  %v2157_v22 = vpop.f32.mrf.mxu1  ;;  %2579 = vmatpush.msrb.mxu0 %v486_v19  ;;  %v674_v19 = vld [vmem:[#allocation5 + $0xe18] sm:$0xff] }
 0x3aa   :  { %v2284_v9 = vpop.f32.mrf.mxu3  ;;  %2775 = vmatpush.msrb.mxu3 %v674_v19 }
 0x3ab   :  { %v2155_v44 = vadd.f32 %v2154_v23, %v2090_v59  ;;  %2348 = vmatmul.f32.gmra.mxu0 %v3966_v35  ;;  %v3970_v35 = vld [vmem:[#allocation2 + $0x280] sm:$0xff] }
 0x3ac   :  { %2416 = vmatmul.f32.gmra.mxu1 %v3971_v49  ;;  %2481 = vmatmul.f32.gmra.mxu2 %v3972_v62  ;;  %v3975_v49 = vld [vmem:[#allocation2 + $0x2c8] sm:$0xff]  ;;  %v3976_v62 = vld [vmem:[#allocation2 + $0x2d0] sm:$0xff] }
 0x3ad   :  { %v2220_v58 = vadd.f32 %v2219_v50, %v2155_v44  ;;  %2546 = vmatmul.f32.gmra.mxu3 %v3973_v15  ;;  %v614_v44 = vld [vmem:[#allocation5 + $0xc38] sm:$0xff] }
 0x3ae   :  { %2709 = vmatpush.msrb.mxu2 %v614_v44  ;;  %v3977_v15 = vld [vmem:[#allocation2 + $0x2d8] sm:$0xff] }
 0x3af   :  { %v4546_v59 = vadd.f32 %v2284_v9, %v2220_v58  ;;  %v550_v58 = vld [vmem:[#allocation5 + $0xa38] sm:$0xff] }
 0x3b0   :  { %v2092_v16 = vpop.f32.mrf.mxu0  ;;  %2644 = vmatpush.msrb.mxu1 %v550_v58  ;;  %v482_v44 = vld [vmem:[#allocation5 + $0x818] sm:$0xff] }
 0x3b1   :  { %v2093_v23 = vadd.f32 %v2092_v16, %v4501_v55  ;;  %v2222_v10 = vpop.f32.mrf.mxu2  ;;  %v2160_v16 = vpop.f32.mrf.mxu1  ;;  %2580 = vmatpush.msrb.mxu0 %v482_v44 }
 0x3b2   :  { %v2287_v11 = vpop.f32.mrf.mxu3 }
 0x3b3   :  { %v2158_v47 = vadd.f32 %v2157_v22, %v2093_v23  ;;  %2351 = vmatmul.f32.gmra.mxu0 %v3970_v35  ;;  %v3974_v35 = vld [vmem:[#allocation2 + $0x2c0] sm:$0xff] }
 0x3b4   :  { %2419 = vmatmul.f32.gmra.mxu1 %v3975_v49  ;;  %2484 = vmatmul.f32.gmra.mxu2 %v3976_v62  ;;  %v3979_v49 = vld [vmem:[#allocation2 + $0x308] sm:$0xff]  ;;  %v3980_v62 = vld [vmem:[#allocation2 + $0x310] sm:$0xff] }
 0x3b5   :  { %v2223_v55 = vadd.f32 %v2222_v10, %v2158_v47  ;;  %2549 = vmatmul.f32.gmra.mxu3 %v3977_v15  ;;  %v610_v47 = vld [vmem:[#allocation5 + $0xc18] sm:$0xff] }
 0x3b6   :  { %2710 = vmatpush.msrb.mxu2 %v610_v47  ;;  %v3981_v15 = vld [vmem:[#allocation2 + $0x318] sm:$0xff] }
 0x3b7   :  { %v4549_v23 = vadd.f32 %v2287_v11, %v2223_v55  ;;  %v546_v55 = vld [vmem:[#allocation5 + $0xa18] sm:$0xff] }
 0x3b8   :  { %v2095_v50 = vpop.f32.mrf.mxu0  ;;  %2645 = vmatpush.msrb.mxu1 %v546_v55  ;;  %v3982_v55 = vld [vmem:[#allocation2 + $0x340] sm:$0xff] }
 0x3b9   :  { %v2096_v22 = vadd.f32 %v2095_v50, %v4504_v46  ;;  %v2225_v48 = vpop.f32.mrf.mxu2  ;;  %v2163_v50 = vpop.f32.mrf.mxu1 }
 0x3ba   :  { %v2290_v58 = vpop.f32.mrf.mxu3 }
 0x3bb   :  { %v2161_v9 = vadd.f32 %v2160_v16, %v2096_v22  ;;  %2354 = vmatmul.f32.gmra.mxu0 %v3974_v35  ;;  %v3978_v35 = vld [vmem:[#allocation2 + $0x300] sm:$0xff] }
 0x3bc   :  { %2422 = vmatmul.f32.gmra.mxu1 %v3979_v49  ;;  %2487 = vmatmul.f32.gmra.mxu2 %v3980_v62 }
 0x3bd   :  { %v2226_v46 = vadd.f32 %v2225_v48, %v2161_v9  ;;  %2552 = vmatmul.f32.gmra.mxu3 %v3981_v15 }
 0x3bf   :  { %v4552_v22 = vadd.f32 %v2290_v58, %v2226_v46  ;;  %v3985_v58 = vld [vmem:[#allocation2 + $0x358] sm:$0xff] }
 0x3c0   :  { %v2098_v10 = vpop.f32.mrf.mxu0 }
 0x3c1   :  { %v2099_v16 = vadd.f32 %v2098_v10, %v4507_v24  ;;  %5100 = vst [vmem:[#allocation26_spill] sm:$0xff] %v4552_v22  ;;  %v2228_v9 = vpop.f32.mrf.mxu2  ;;  %v2166_v19 = vpop.f32.mrf.mxu1 }
 0x3c2   :  { %v2293_v24 = vpop.f32.mrf.mxu3 }
 0x3c3   :  { %v2164_v11 = vadd.f32 %v2163_v50, %v2099_v16  ;;  %2357 = vmatmul.f32.gmra.mxu0 %v3978_v35  ;;  %v3983_v50 = vld [vmem:[#allocation2 + $0x348] sm:$0xff]  ;;  %v3984_v16 = vld [vmem:[#allocation2 + $0x350] sm:$0xff] }
 0x3c4   :  { %2425 = vmatmul.f32.gmra.mxu1 %v3983_v50  ;;  %2490 = vmatmul.f32.gmra.mxu2 %v3984_v16  ;;  %v3047_v35 = vld [vmem:[#allocation8 + $0x2f0] sm:$0xff] }
 0x3c5   :  { %v2229_v47 = vadd.f32 %v2228_v9, %v2164_v11  ;;  %2555 = vmatmul.f32.gmra.mxu3 %v3985_v58  ;;  %3217 = vmatpush.msra.mxu2 %v3047_v35  ;;  %v2983_v9 = vld [vmem:[#allocation8 + $0xf0] sm:$0xff]  ;;  %v3045_v58 = vld [vmem:[#allocation8 + $0x2e0] sm:$0xff] }
 0x3c6   :  { %3087 = vmatpush.msra.mxu0 %v2983_v9  ;;  %v3015_v50 = vld [vmem:[#allocation8 + $0x1f0] sm:$0xff]  ;;  %v2981_v9 = vld [vmem:[#allocation8 + $0xe0] sm:$0xff] }
 0x3c7   :  { %v4555_v10 = vadd.f32 %v2293_v24, %v2229_v47  ;;  %v3986_v24 = vld [vmem:[#allocation2 + $0x380] sm:$0xff]  ;;  %v3988_v16 = vld [vmem:[#allocation2 + $0x390] sm:$0xff]  ;;  %3152 = vmatpush.msra.mxu1 %v3015_v50  ;;  %3218 = vmatpush.msra.mxu2 %v3045_v58 }
 0x3c8   :  { %v2101_v44 = vpop.f32.mrf.mxu0  ;;  %3088 = vmatpush.msra.mxu0 %v2981_v9  ;;  %v3013_v50 = vld [vmem:[#allocation8 + $0x1e0] sm:$0xff] }
 0x3c9   :  { %v2102_v48 = vadd.f32 %v2101_v44, %v4510_v45  ;;  %5101 = vst [vmem:[#allocation27_spill] sm:$0xff] %v4555_v10  ;;  %v2231_v49 = vpop.f32.mrf.mxu2  ;;  %v2169_v15 = vpop.f32.mrf.mxu1  ;;  %v3079_v45 = vld [vmem:[#allocation8 + $0x3f0] sm:$0xff]  ;;  %3153 = vmatpush.msra.mxu1 %v3013_v50  ;;  %v3996_v50 = vld [vmem:[#allocation2 + $0x28] sm:$0xff] }
 0x3ca   :  { %v2296_v44 = vpop.f32.mrf.mxu3  ;;  %3282 = vmatpush.msra.mxu3 %v3079_v45 }
 0x3cb   :  { %v2167_v46 = vadd.f32 %v2166_v19, %v2102_v48  ;;  %2360 = vmatmul.f32.gmra.mxu0 %v3982_v55  ;;  %v3987_v55 = vld [vmem:[#allocation2 + $0x388] sm:$0xff] }
 0x3cc   :  { %2428 = vmatmul.f32.gmra.mxu1 %v3987_v55  ;;  %2493 = vmatmul.f32.gmra.mxu2 %v3988_v16  ;;  %v3991_v55 = vld [vmem:[#allocation2 + $0x3c8] sm:$0xff]  ;;  %v3992_v16 = vld [vmem:[#allocation2 + $0x3d0] sm:$0xff] }
 0x3cd   :  { %v2232_v11 = vadd.f32 %v2231_v49, %v2167_v46  ;;  %v3989_v46 = vld [vmem:[#allocation2 + $0x398] sm:$0xff] }
 0x3ce   :  { %2558 = vmatmul.f32.gmra.mxu3 %v3989_v46  ;;  %v3994_v46 = vld [vmem:[#allocation7] sm:$0xf] }
 0x3cf   :  { %v4558_v19 = vadd.f32 %v2296_v44, %v2232_v11  ;;  %v3077_v11 = vld [vmem:[#allocation8 + $0x3e0] sm:$0xff]  ;;  %v4563_v58 = vperm.slane %v3994_v46, 3  ;;  %v3997_v46 = vld [vmem:[#allocation2 + $0x30] sm:$0xff] }
 0x3d0   :  { %v2104_v62 = vpop.f32.mrf.mxu0  ;;  %3283 = vmatpush.msra.mxu3 %v3077_v11  ;;  %v3075_v11 = vld [vmem:[#allocation8 + $0x3d0] sm:$0xff] }
 0x3d1   :  { %v2105_v47 = vadd.f32 %v2104_v62, %v4513_v6  ;;  %5102 = vst [vmem:[#allocation28_spill] sm:$0xff] %v4558_v19  ;;  %v2234_v35 = vpop.f32.mrf.mxu2  ;;  %v2172_v62 = vpop.f32.mrf.mxu1 }
 0x3d2   :  { %v2299_v45 = vpop.f32.mrf.mxu3  ;;  %3284 = vmatpush.msra.mxu3 %v3075_v11  ;;  %v2977_v11 = vld [vmem:[#allocation8 + $0xc0] sm:$0xff] }
 0x3d3   :  { %v2170_v48 = vadd.f32 %v2169_v15, %v2105_v47  ;;  %2363 = vmatmul.f32.gmra.mxu0 %v3986_v24  ;;  %v3990_v24 = vld [vmem:[#allocation2 + $0x3c0] sm:$0xff] }
 0x3d4   :  { %2431 = vmatmul.f32.gmra.mxu1 %v3991_v55  ;;  %2496 = vmatmul.f32.gmra.mxu2 %v3992_v16  ;;  %v3995_v55 = vld [vmem:[#allocation2 + $0x20] sm:$0xff]  ;;  %v3011_v16 = vld [vmem:[#allocation8 + $0x1d0] sm:$0xff] }
 0x3d5   :  { %v2235_v6 = vadd.f32 %v2234_v35, %v2170_v48  ;;  %v3993_v48 = vld [vmem:[#allocation2 + $0x3d8] sm:$0xff]  ;;  %3154 = vmatpush.msra.mxu1 %v3011_v16  ;;  %v3009_v16 = vld [vmem:[#allocation8 + $0x1c0] sm:$0xff] }
 0x3d6   :  { %2561 = vmatmul.f32.gmra.mxu3 %v3993_v48 }
 0x3d7   :  { %v4561_v47 = vadd.f32 %v2299_v45, %v2235_v6  ;;  %3155 = vmatpush.msra.mxu1 %v3009_v16  ;;  %v3007_v16 = vld [vmem:[#allocation8 + $0x1b0] sm:$0xff] }
 0x3d8   :  { %v2107_v49 = vpop.f32.mrf.mxu0 }
 0x3d9   :  { %v2108_v15 = vadd.f32 %v2107_v49, %v4516_v13  ;;  %5103 = vst [vmem:[#allocation29_spill] sm:$0xff] %v4561_v47  ;;  %v3043_v13 = vld [vmem:[#allocation8 + $0x2d0] sm:$0xff]  ;;  %v2237_v35 = vpop.f32.mrf.mxu2  ;;  %v2387_v9 = vpop.f32.mrf.mxu1  ;;  %3156 = vmatpush.msra.mxu1 %v3007_v16  ;;  %v3005_v16 = vld [vmem:[#allocation8 + $0x1a0] sm:$0xff] }
 0x3da   :  { %3219 = vmatpush.msra.mxu2 %v3043_v13  ;;  %v3041_v13 = vld [vmem:[#allocation8 + $0x2c0] sm:$0xff] }
 0x3db   :  { %v2173_v44 = vadd.f32 %v2172_v62, %v2108_v15  ;;  %2366 = vmatmul.f32.gmra.mxu0 %v3990_v24  ;;  %v2979_v62 = vld [vmem:[#allocation8 + $0xd0] sm:$0xff]  ;;  %v2302_v15 = vpop.f32.mrf.mxu3  ;;  %3157 = vmatpush.msra.mxu1 %v3005_v16 }
 0x3dc   :  { %3089 = vmatpush.msra.mxu0 %v2979_v62  ;;  %2646 = vmatmul.f32.vlgmr.msrb.gmra.mxu1 %v3996_v50  ;;  %v3003_v16 = vld [vmem:[#allocation8 + $0x190] sm:$0xff] }
 0x3dd   :  { %v2238_v49 = vadd.f32 %v2237_v35, %v2173_v44  ;;  %2711 = vmatmul.f32.vlgmr.msrb.gmra.mxu2 %v3997_v46  ;;  %v3998_v44 = vld [vmem:[#allocation2 + $0x38] sm:$0xff]  ;;  %3158 = vmatpush.msra.mxu1 %v3003_v16  ;;  %v3001_v16 = vld [vmem:[#allocation8 + $0x180] sm:$0xff] }
 0x3de   :  { %2776 = vmatmul.f32.vlgmr.msrb.gmra.mxu3 %v3998_v44  ;;  %3220 = vmatpush.msra.mxu2 %v3041_v13  ;;  %v4001_v44 = vld [vmem:[#allocation2 + $0x70] sm:$0xff] }
 0x3df   :  { %v4566_v24 = vadd.f32 %v2302_v15, %v2238_v49  ;;  %v3073_v49 = vld [vmem:[#allocation8 + $0x3c0] sm:$0xff]  ;;  %3090 = vmatpush.msra.mxu0 %v2977_v11  ;;  %v3039_v13 = vld [vmem:[#allocation8 + $0x2b0] sm:$0xff]  ;;  %3159 = vmatpush.msra.mxu1 %v3001_v16 }
 0x3e0   :  { %v2322_v6 = vpop.f32.mrf.mxu0  ;;  %3285 = vmatpush.msra.mxu3 %v3073_v49  ;;  %3221 = vmatpush.msra.mxu2 %v3039_v13  ;;  %v2975_v49 = vld [vmem:[#allocation8 + $0xb0] sm:$0xff]  ;;  %v3037_v13 = vld [vmem:[#allocation8 + $0x2a0] sm:$0xff] }
 0x3e1   :  { %v2323_v45 = vadd.f32 %v2322_v6, %v4563_v58  ;;  %5104 = vst [vmem:[#allocation30_spill] sm:$0xff] %v4566_v24  ;;  %v2452_v35 = vpop.f32.mrf.mxu2  ;;  %v2390_v62 = vpop.f32.mrf.mxu1  ;;  %3091 = vmatpush.msra.mxu0 %v2975_v49  ;;  %v2999_v16 = vld [vmem:[#allocation8 + $0x170] sm:$0xff] }
 0x3e2   :  { %3222 = vmatpush.msra.mxu2 %v3037_v13  ;;  %v3035_v13 = vld [vmem:[#allocation8 + $0x290] sm:$0xff]  ;;  %3160 = vmatpush.msra.mxu1 %v2999_v16  ;;  %v2997_v16 = vld [vmem:[#allocation8 + $0x160] sm:$0xff] }
 0x3e3   :  { %2581 = vmatmul.f32.vlgmr.msrb.gmra.mxu0 %v3995_v55  ;;  %v2388_v48 = vadd.f32 %v2387_v9, %v2323_v45  ;;  %v2517_v55 = vpop.f32.mrf.mxu3  ;;  %v3999_v9 = vld [vmem:[#allocation2 + $0x60] sm:$0xff]  ;;  %v4000_v45 = vld [vmem:[#allocation2 + $0x68] sm:$0xff] }
 0x3e4   :  { %2649 = vmatmul.f32.gmra.mxu1 %v4000_v45  ;;  %3223 = vmatpush.msra.mxu2 %v3035_v13  ;;  %v3033_v13 = vld [vmem:[#allocation8 + $0x280] sm:$0xff] }
 0x3e5   :  { %v2453_v40 = vadd.f32 %v2452_v35, %v2388_v48  ;;  %2714 = vmatmul.f32.gmra.mxu2 %v4001_v44  ;;  %v4002_v48 = vld [vmem:[#allocation2 + $0x78] sm:$0xff]  ;;  %3161 = vmatpush.msra.mxu1 %v2997_v16 }
 0x3e6   :  { %2779 = vmatmul.f32.gmra.mxu3 %v4002_v48  ;;  %v4005_v48 = vld [vmem:[#allocation2 + $0xb0] sm:$0xff]  ;;  %3224 = vmatpush.msra.mxu2 %v3033_v13 }
 0x3e7   :  { %v4569_v50 = vadd.f32 %v2517_v55, %v2453_v40  ;;  %v3071_v40 = vld [vmem:[#allocation8 + $0x3b0] sm:$0xff] }
 0x3e8   :  { %v2325_v6 = vpop.f32.mrf.mxu0  ;;  %3286 = vmatpush.msra.mxu3 %v3071_v40  ;;  %v2973_v40 = vld [vmem:[#allocation8 + $0xa0] sm:$0xff]  ;;  %v3031_v13 = vld [vmem:[#allocation8 + $0x270] sm:$0xff] }
 0x3e9   :  { %v2326_v15 = vadd.f32 %v2325_v6, %v4563_v58  ;;  %v2455_v35 = vpop.f32.mrf.mxu2  ;;  %v2393_v11 = vpop.f32.mrf.mxu1  ;;  %3092 = vmatpush.msra.mxu0 %v2973_v40  ;;  %3225 = vmatpush.msra.mxu2 %v3031_v13  ;;  %v3029_v13 = vld [vmem:[#allocation8 + $0x260] sm:$0xff]  ;;  %v2995_v16 = vld [vmem:[#allocation8 + $0x150] sm:$0xff] }
 0x3ea   :  { %3162 = vmatpush.msra.mxu1 %v2995_v16 }
 0x3eb   :  { %2584 = vmatmul.f32.gmra.mxu0 %v3999_v9  ;;  %v2391_v46 = vadd.f32 %v2390_v62, %v2326_v15  ;;  %v2520_v9 = vpop.f32.mrf.mxu3  ;;  %v4003_v62 = vld [vmem:[#allocation2 + $0xa0] sm:$0xff]  ;;  %v4004_v15 = vld [vmem:[#allocation2 + $0xa8] sm:$0xff]  ;;  %3226 = vmatpush.msra.mxu2 %v3029_v13  ;;  %v3027_v13 = vld [vmem:[#allocation8 + $0x250] sm:$0xff] }
 0x3ec   :  { %2652 = vmatmul.f32.gmra.mxu1 %v4004_v15 }
 0x3ed   :  { %v2456_v6 = vadd.f32 %v2455_v35, %v2391_v46  ;;  %2717 = vmatmul.f32.gmra.mxu2 %v4005_v48  ;;  %v4006_v46 = vld [vmem:[#allocation2 + $0xb8] sm:$0xff] }
 0x3ee   :  { %2782 = vmatmul.f32.gmra.mxu3 %v4006_v46  ;;  %v4009_v46 = vld [vmem:[#allocation2 + $0xf0] sm:$0xff]  ;;  %3227 = vmatpush.msra.mxu2 %v3027_v13  ;;  %v3025_v13 = vld [vmem:[#allocation8 + $0x240] sm:$0xff] }
 0x3ef   :  { %v4572_v45 = vadd.f32 %v2520_v9, %v2456_v6  ;;  %v3069_v6 = vld [vmem:[#allocation8 + $0x3a0] sm:$0xff] }
 0x3f0   :  { %v2328_v24 = vpop.f32.mrf.mxu0  ;;  %3287 = vmatpush.msra.mxu3 %v3069_v6  ;;  %v2971_v6 = vld [vmem:[#allocation8 + $0x90] sm:$0xff]  ;;  %3228 = vmatpush.msra.mxu2 %v3025_v13 }
 0x3f1   :  { %v2329_v55 = vadd.f32 %v2328_v24, %v4563_v58  ;;  %v2458_v35 = vpop.f32.mrf.mxu2  ;;  %v2396_v49 = vpop.f32.mrf.mxu1  ;;  %3093 = vmatpush.msra.mxu0 %v2971_v6 }
 0x3f3   :  { %2587 = vmatmul.f32.gmra.mxu0 %v4003_v62  ;;  %v2394_v44 = vadd.f32 %v2393_v11, %v2329_v55  ;;  %v2523_v62 = vpop.f32.mrf.mxu3  ;;  %v4007_v11 = vld [vmem:[#allocation2 + $0xe0] sm:$0xff]  ;;  %v4008_v55 = vld [vmem:[#allocation2 + $0xe8] sm:$0xff] }
 0x3f4   :  { %2655 = vmatmul.f32.gmra.mxu1 %v4008_v55 }
 0x3f5   :  { %v2459_v24 = vadd.f32 %v2458_v35, %v2394_v44  ;;  %2720 = vmatmul.f32.gmra.mxu2 %v4009_v46  ;;  %v4010_v44 = vld [vmem:[#allocation2 + $0xf8] sm:$0xff] }
 0x3f6   :  { %2785 = vmatmul.f32.gmra.mxu3 %v4010_v44  ;;  %v4013_v44 = vld [vmem:[#allocation2 + $0x130] sm:$0xff] }
 0x3f7   :  { %v4575_v15 = vadd.f32 %v2523_v62, %v2459_v24  ;;  %v3067_v24 = vld [vmem:[#allocation8 + $0x390] sm:$0xff] }
 0x3f8   :  { %v2331_v1 = vpop.f32.mrf.mxu0  ;;  %3288 = vmatpush.msra.mxu3 %v3067_v24  ;;  %v2969_v24 = vld [vmem:[#allocation8 + $0x80] sm:$0xff] }
 0x3f9   :  { %v2332_v9 = vadd.f32 %v2331_v1, %v4563_v58  ;;  %v2461_v35 = vpop.f32.mrf.mxu2  ;;  %v2399_v40 = vpop.f32.mrf.mxu1  ;;  %3094 = vmatpush.msra.mxu0 %v2969_v24 }
 0x3fb   :  { %2590 = vmatmul.f32.gmra.mxu0 %v4007_v11  ;;  %v2397_v48 = vadd.f32 %v2396_v49, %v2332_v9  ;;  %v2526_v11 = vpop.f32.mrf.mxu3  ;;  %v4011_v49 = vld [vmem:[#allocation2 + $0x120] sm:$0xff]  ;;  %v4012_v9 = vld [vmem:[#allocation2 + $0x128] sm:$0xff] }
 0x3fc   :  { %2658 = vmatmul.f32.gmra.mxu1 %v4012_v9 }
 0x3fd   :  { %v2462_v1 = vadd.f32 %v2461_v35, %v2397_v48  ;;  %2723 = vmatmul.f32.gmra.mxu2 %v4013_v44  ;;  %v4014_v48 = vld [vmem:[#allocation2 + $0x138] sm:$0xff] }
 0x3fe   :  { %2788 = vmatmul.f32.gmra.mxu3 %v4014_v48  ;;  %v4017_v48 = vld [vmem:[#allocation2 + $0x170] sm:$0xff] }
 0x3ff   :  { %v4578_v55 = vadd.f32 %v2526_v11, %v2462_v1  ;;  %v3065_v1 = vld [vmem:[#allocation8 + $0x380] sm:$0xff] }
 0x400   :  { %v2334_v47 = vpop.f32.mrf.mxu0  ;;  %3289 = vmatpush.msra.mxu3 %v3065_v1  ;;  %v2967_v1 = vld [vmem:[#allocation8 + $0x70] sm:$0xff] }
 0x401   :  { %v2335_v62 = vadd.f32 %v2334_v47, %v4563_v58  ;;  %v2464_v35 = vpop.f32.mrf.mxu2  ;;  %v2402_v6 = vpop.f32.mrf.mxu1  ;;  %3095 = vmatpush.msra.mxu0 %v2967_v1 }
 0x403   :  { %2593 = vmatmul.f32.gmra.mxu0 %v4011_v49  ;;  %v2400_v46 = vadd.f32 %v2399_v40, %v2335_v62  ;;  %v2529_v49 = vpop.f32.mrf.mxu3  ;;  %v4015_v40 = vld [vmem:[#allocation2 + $0x160] sm:$0xff]  ;;  %v4016_v62 = vld [vmem:[#allocation2 + $0x168] sm:$0xff] }
 0x404   :  { %2661 = vmatmul.f32.gmra.mxu1 %v4016_v62 }
 0x405   :  { %v2465_v47 = vadd.f32 %v2464_v35, %v2400_v46  ;;  %2726 = vmatmul.f32.gmra.mxu2 %v4017_v48  ;;  %v4018_v46 = vld [vmem:[#allocation2 + $0x178] sm:$0xff] }
 0x406   :  { %2791 = vmatmul.f32.gmra.mxu3 %v4018_v46  ;;  %v4021_v46 = vld [vmem:[#allocation2 + $0x1b0] sm:$0xff] }
 0x407   :  { %v4581_v9 = vadd.f32 %v2529_v49, %v2465_v47  ;;  %v3063_v47 = vld [vmem:[#allocation8 + $0x370] sm:$0xff] }
 0x408   :  { %v2337_v54 = vpop.f32.mrf.mxu0  ;;  %3290 = vmatpush.msra.mxu3 %v3063_v47  ;;  %v2965_v47 = vld [vmem:[#allocation8 + $0x60] sm:$0xff] }
 0x409   :  { %v2338_v11 = vadd.f32 %v2337_v54, %v4563_v58  ;;  %v2467_v35 = vpop.f32.mrf.mxu2  ;;  %v2405_v24 = vpop.f32.mrf.mxu1  ;;  %3096 = vmatpush.msra.mxu0 %v2965_v47 }
 0x40b   :  { %2596 = vmatmul.f32.gmra.mxu0 %v4015_v40  ;;  %v2403_v44 = vadd.f32 %v2402_v6, %v2338_v11  ;;  %v2532_v40 = vpop.f32.mrf.mxu3  ;;  %v4019_v6 = vld [vmem:[#allocation2 + $0x1a0] sm:$0xff]  ;;  %v4020_v11 = vld [vmem:[#allocation2 + $0x1a8] sm:$0xff] }
 0x40c   :  { %2664 = vmatmul.f32.gmra.mxu1 %v4020_v11 }
 0x40d   :  { %v2468_v54 = vadd.f32 %v2467_v35, %v2403_v44  ;;  %2729 = vmatmul.f32.gmra.mxu2 %v4021_v46  ;;  %v4022_v44 = vld [vmem:[#allocation2 + $0x1b8] sm:$0xff] }
 0x40e   :  { %2794 = vmatmul.f32.gmra.mxu3 %v4022_v44  ;;  %v4025_v44 = vld [vmem:[#allocation2 + $0x1f0] sm:$0xff] }
 0x40f   :  { %v4584_v62 = vadd.f32 %v2532_v40, %v2468_v54  ;;  %v3061_v54 = vld [vmem:[#allocation8 + $0x360] sm:$0xff] }
 0x410   :  { %v2340_v28 = vpop.f32.mrf.mxu0  ;;  %3291 = vmatpush.msra.mxu3 %v3061_v54  ;;  %v2963_v54 = vld [vmem:[#allocation8 + $0x50] sm:$0xff] }
 0x411   :  { %v2341_v49 = vadd.f32 %v2340_v28, %v4563_v58  ;;  %v2470_v35 = vpop.f32.mrf.mxu2  ;;  %v2408_v1 = vpop.f32.mrf.mxu1  ;;  %3097 = vmatpush.msra.mxu0 %v2963_v54 }
 0x413   :  { %2599 = vmatmul.f32.gmra.mxu0 %v4019_v6  ;;  %v2406_v48 = vadd.f32 %v2405_v24, %v2341_v49  ;;  %v2535_v6 = vpop.f32.mrf.mxu3  ;;  %v4023_v24 = vld [vmem:[#allocation2 + $0x1e0] sm:$0xff]  ;;  %v4024_v49 = vld [vmem:[#allocation2 + $0x1e8] sm:$0xff] }
 0x414   :  { %2667 = vmatmul.f32.gmra.mxu1 %v4024_v49 }
 0x415   :  { %v2471_v28 = vadd.f32 %v2470_v35, %v2406_v48  ;;  %2732 = vmatmul.f32.gmra.mxu2 %v4025_v44  ;;  %v4026_v48 = vld [vmem:[#allocation2 + $0x1f8] sm:$0xff] }
 0x416   :  { %2797 = vmatmul.f32.gmra.mxu3 %v4026_v48  ;;  %v4029_v48 = vld [vmem:[#allocation2 + $0x230] sm:$0xff] }
 0x417   :  { %v4587_v11 = vadd.f32 %v2535_v6, %v2471_v28  ;;  %v3059_v28 = vld [vmem:[#allocation8 + $0x350] sm:$0xff] }
 0x418   :  { %v2343_v19 = vpop.f32.mrf.mxu0  ;;  %3292 = vmatpush.msra.mxu3 %v3059_v28 }
 0x419   :  { %v2344_v40 = vadd.f32 %v2343_v19, %v4563_v58  ;;  %v2473_v35 = vpop.f32.mrf.mxu2  ;;  %v2411_v47 = vpop.f32.mrf.mxu1 }
 0x41b   :  { %2602 = vmatmul.f32.gmra.mxu0 %v4023_v24  ;;  %v2409_v46 = vadd.f32 %v2408_v1, %v2344_v40  ;;  %v2538_v24 = vpop.f32.mrf.mxu3  ;;  %v4027_v1 = vld [vmem:[#allocation2 + $0x220] sm:$0xff]  ;;  %v4028_v40 = vld [vmem:[#allocation2 + $0x228] sm:$0xff] }
 0x41c   :  { %2670 = vmatmul.f32.gmra.mxu1 %v4028_v40  ;;  %v2993_v40 = vld [vmem:[#allocation8 + $0x140] sm:$0xff] }
 0x41d   :  { %v2474_v19 = vadd.f32 %v2473_v35, %v2409_v46  ;;  %2735 = vmatmul.f32.gmra.mxu2 %v4029_v48  ;;  %v4030_v46 = vld [vmem:[#allocation2 + $0x238] sm:$0xff]  ;;  %v4033_v48 = vld [vmem:[#allocation2 + $0x270] sm:$0xff]  ;;  %3163 = vmatpush.msra.mxu1 %v2993_v40 }
 0x41e   :  { %2800 = vmatmul.f32.gmra.mxu3 %v4030_v46  ;;  %v3023_v46 = vld [vmem:[#allocation8 + $0x230] sm:$0xff] }
 0x41f   :  { %v4590_v49 = vadd.f32 %v2538_v24, %v2474_v19  ;;  %v2961_v19 = vld [vmem:[#allocation8 + $0x40] sm:$0xff]  ;;  %3229 = vmatpush.msra.mxu2 %v3023_v46 }
 0x420   :  { %v2346_v27 = vpop.f32.mrf.mxu0  ;;  %v3057_v24 = vld [vmem:[#allocation8 + $0x340] sm:$0xff]  ;;  %3098 = vmatpush.msra.mxu0 %v2961_v19  ;;  %v2959_v19 = vld [vmem:[#allocation8 + $0x30] sm:$0xff] }
 0x421   :  { %v2347_v6 = vadd.f32 %v2346_v27, %v4563_v58  ;;  %v2476_v35 = vpop.f32.mrf.mxu2  ;;  %v2414_v28 = vpop.f32.mrf.mxu1  ;;  %3293 = vmatpush.msra.mxu3 %v3057_v24  ;;  %v3055_v24 = vld [vmem:[#allocation8 + $0x330] sm:$0xff] }
 0x422   :  { %3099 = vmatpush.msra.mxu0 %v2959_v19  ;;  %v2957_v19 = vld [vmem:[#allocation8 + $0x20] sm:$0xff] }
 0x423   :  { %2605 = vmatmul.f32.gmra.mxu0 %v4027_v1  ;;  %v2412_v44 = vadd.f32 %v2411_v47, %v2347_v6  ;;  %v4595_v8 = vpop.f32.mrf.mxu3  ;;  %v4031_v47 = vld [vmem:[#allocation2 + $0x260] sm:$0xff]  ;;  %v4032_v6 = vld [vmem:[#allocation2 + $0x268] sm:$0xff]  ;;  %3294 = vmatpush.msra.mxu3 %v3055_v24 }
 0x424   :  { %2673 = vmatmul.f32.gmra.mxu1 %v4032_v6  ;;  %v2991_v6 = vld [vmem:[#allocation8 + $0x130] sm:$0xff]  ;;  %v3053_v24 = vld [vmem:[#allocation8 + $0x320] sm:$0xff]  ;;  %3100 = vmatpush.msra.mxu0 %v2957_v19 }
 0x425   :  { %v4592_v27 = vadd.f32 %v2476_v35, %v2412_v44  ;;  %2738 = vmatmul.f32.gmra.mxu2 %v4033_v48  ;;  %v4034_v44 = vld [vmem:[#allocation2 + $0x278] sm:$0xff]  ;;  %v4037_v48 = vld [vmem:[#allocation2 + $0x2b0] sm:$0xff]  ;;  %3164 = vmatpush.msra.mxu1 %v2991_v6 }
 0x426   :  { %2803 = vmatmul.f32.gmra.mxu3 %v4034_v44  ;;  %v3021_v44 = vld [vmem:[#allocation8 + $0x220] sm:$0xff]  ;;  %v2955_v19 = vld [vmem:[#allocation8 + $0x10] sm:$0xff] }
 0x427   :  { %3230 = vmatpush.msra.mxu2 %v3021_v44  ;;  %3295 = vmatpush.msra.mxu3 %v3053_v24  ;;  %v3051_v24 = vld [vmem:[#allocation8 + $0x310] sm:$0xff] }
 0x428   :  { %v2349_v54 = vpop.f32.mrf.mxu0  ;;  %3101 = vmatpush.msra.mxu0 %v2955_v19 }
 0x429   :  { %v2350_v1 = vadd.f32 %v2349_v54, %v4563_v58  ;;  %v2479_v13 = vpop.f32.mrf.mxu2  ;;  %v2417_v10 = vpop.f32.mrf.mxu1  ;;  %3296 = vmatpush.msra.mxu3 %v3051_v24  ;;  %v3049_v24 = vld [vmem:[#allocation8 + $0x300] sm:$0xff] }
 0x42b   :  { %2608 = vmatmul.f32.gmra.mxu0 %v4031_v47  ;;  %v2415_v16 = vadd.f32 %v2414_v28, %v2350_v1  ;;  %v4600_v2 = vpop.f32.mrf.mxu3  ;;  %v4035_v28 = vld [vmem:[#allocation2 + $0x2a0] sm:$0xff]  ;;  %v4036_v1 = vld [vmem:[#allocation2 + $0x2a8] sm:$0xff]  ;;  %3297 = vmatpush.msra.mxu3 %v3049_v24 }
 0x42c   :  { %2676 = vmatmul.f32.gmra.mxu1 %v4036_v1  ;;  %v2989_v1 = vld [vmem:[#allocation8 + $0x120] sm:$0xff] }
 0x42d   :  { %v4597_v35 = vadd.f32 %v2479_v13, %v2415_v16  ;;  %2741 = vmatmul.f32.gmra.mxu2 %v4037_v48  ;;  %v4038_v16 = vld [vmem:[#allocation2 + $0x2b8] sm:$0xff]  ;;  %v4041_v48 = vld [vmem:[#allocation2 + $0x2f0] sm:$0xff]  ;;  %3165 = vmatpush.msra.mxu1 %v2989_v1  ;;  %v4043_v1 = vld [vmem:[#allocation2 + $0x320] sm:$0xff] }
 0x42e   :  { %2806 = vmatmul.f32.gmra.mxu3 %v4038_v16  ;;  %v3019_v16 = vld [vmem:[#allocation8 + $0x210] sm:$0xff] }
 0x42f   :  { %3231 = vmatpush.msra.mxu2 %v3019_v16  ;;  %3166 = vmatpush.msra.mxu1 %v2987_v32  ;;  %v4045_v16 = vld [vmem:[#allocation2 + $0x330] sm:$0xff] }
 0x430   :  { %v2352_v54 = vpop.f32.mrf.mxu0 }
 0x431   :  { %v2353_v47 = vadd.f32 %v2352_v54, %v4563_v58  ;;  %v2482_v46 = vpop.f32.mrf.mxu2  ;;  %v2420_v52 = vpop.f32.mrf.mxu1 }
 0x433   :  { %2611 = vmatmul.f32.gmra.mxu0 %v4035_v28  ;;  %v2418_v40 = vadd.f32 %v2417_v10, %v2353_v47  ;;  %v4605_v22 = vpop.f32.mrf.mxu3  ;;  %v4039_v10 = vld [vmem:[#allocation2 + $0x2e0] sm:$0xff]  ;;  %v4040_v47 = vld [vmem:[#allocation2 + $0x2e8] sm:$0xff] }
 0x434   :  { %2679 = vmatmul.f32.gmra.mxu1 %v4040_v47 }
 0x435   :  { %v4602_v13 = vadd.f32 %v2482_v46, %v2418_v40  ;;  %2744 = vmatmul.f32.gmra.mxu2 %v4041_v48  ;;  %v4042_v40 = vld [vmem:[#allocation2 + $0x2f8] sm:$0xff]  ;;  %v4044_v48 = vld [vmem:[#allocation2 + $0x328] sm:$0xff] }
 0x436   :  { %2809 = vmatmul.f32.gmra.mxu3 %v4042_v40 }
 0x438   :  { %v2355_v54 = vpop.f32.mrf.mxu0 }
 0x439   :  { %v2356_v28 = vadd.f32 %v2355_v54, %v4563_v58  ;;  %v2485_v44 = vpop.f32.mrf.mxu2  ;;  %v2423_v43 = vpop.f32.mrf.mxu1 }
 0x43b   :  { %2614 = vmatmul.f32.gmra.mxu0 %v4039_v10  ;;  %v2421_v6 = vadd.f32 %v2420_v52, %v2356_v28  ;;  %v4610_v47 = vpop.f32.mrf.mxu3  ;;  %v2953_v52 = vld [vmem:[#allocation8] sm:$0xff] }
 0x43c   :  { %5106 = vst [vmem:[#allocation32_spill] sm:$0xff] %v4610_v47  ;;  %v2985_v28 = vld [vmem:[#allocation8 + $0x100] sm:$0xff]  ;;  %2682 = vmatmul.f32.gmra.mxu1 %v4044_v48  ;;  %3102 = vmatpush.msra.mxu0 %v2953_v52  ;;  %v4049_v52 = vld [vmem:[#allocation2 + $0x370] sm:$0xff] }
 0x43d   :  { %v4607_v46 = vadd.f32 %v2485_v44, %v2421_v6  ;;  %v3017_v6 = vld [vmem:[#allocation8 + $0x200] sm:$0xff]  ;;  %2747 = vmatmul.f32.gmra.mxu2 %v4045_v16  ;;  %v4046_v44 = vld [vmem:[#allocation2 + $0x338] sm:$0xff]  ;;  %3167 = vmatpush.msra.mxu1 %v2985_v28 }
 0x43e   :  { %2812 = vmatmul.f32.gmra.mxu3 %v4046_v44  ;;  %3232 = vmatpush.msra.mxu2 %v3017_v6  ;;  %v4047_v48 = vld [vmem:[#allocation2 + $0x360] sm:$0xff]  ;;  %v4050_v28 = vld [vmem:[#allocation2 + $0x378] sm:$0xff] }
 0x43f   :  { %5105 = vst [vmem:[#allocation31_spill] sm:$0xff] %v4607_v46  ;;  %v3048_v6 = vld [vmem:[#allocation8 + $0x2f8] sm:$0xff] }
 0x440   :  { %v2358_v54 = vpop.f32.mrf.mxu0  ;;  %3477 = vmatpush.msrb.mxu2 %v3048_v6 }
 0x441   :  { %v2359_v10 = vadd.f32 %v2358_v54, %v4563_v58  ;;  %v2488_v54 = vpop.f32.mrf.mxu2  ;;  %v2426_v32 = vpop.f32.mrf.mxu1 }
 0x443   :  { %2617 = vmatmul.f32.gmra.mxu0 %v4043_v1  ;;  %v2424_v40 = vadd.f32 %v2423_v43, %v2359_v10  ;;  %v4615_v1 = vpop.f32.mrf.mxu3  ;;  %v4048_v43 = vld [vmem:[#allocation2 + $0x368] sm:$0xff] }
 0x444   :  { %5108 = vst [vmem:[#allocation34_spill] sm:$0xff] %v4615_v1  ;;  %2685 = vmatmul.f32.gmra.mxu1 %v4048_v43  ;;  %v4053_v43 = vld [vmem:[#allocation2 + $0x3b0] sm:$0xff] }
 0x445   :  { %v4612_v47 = vadd.f32 %v2488_v54, %v2424_v40  ;;  %2750 = vmatmul.f32.gmra.mxu2 %v4049_v52  ;;  %v4054_v52 = vld [vmem:[#allocation2 + $0x3b8] sm:$0xff] }
 0x446   :  { %2815 = vmatmul.f32.gmra.mxu3 %v4050_v28  ;;  %v3046_v28 = vld [vmem:[#allocation8 + $0x2e8] sm:$0xff] }
 0x447   :  { %5107 = vst [vmem:[#allocation33_spill] sm:$0xff] %v4612_v47  ;;  %v3080_v47 = vld [vmem:[#allocation8 + $0x3f8] sm:$0xff]  ;;  %3478 = vmatpush.msrb.mxu2 %v3046_v28  ;;  %v2827_v28 = vmul.f32 0.01, %v4519_v25 }
 0x448   :  { %v2361_v19 = vpop.f32.mrf.mxu0  ;;  %3542 = vmatpush.msrb.mxu3 %v3080_v47  ;;  %v3078_v47 = vld [vmem:[#allocation8 + $0x3e8] sm:$0xff] }
 0x449   :  { %v2362_v46 = vadd.f32 %v2361_v19, %v4563_v58  ;;  %v2491_v40 = vpop.f32.mrf.mxu2  ;;  %v2429_v54 = vpop.f32.mrf.mxu1  ;;  %v2984_v19 = vld [vmem:[#allocation8 + $0xf8] sm:$0xff] }
 0x44a   :  { %3347 = vmatpush.msrb.mxu0 %v2984_v19  ;;  %v2982_v19 = vld [vmem:[#allocation8 + $0xe8] sm:$0xff]  ;;  %3543 = vmatpush.msrb.mxu3 %v3078_v47 }
 0x44b   :  { %2620 = vmatmul.f32.gmra.mxu0 %v4047_v48  ;;  %v2427_v10 = vadd.f32 %v2426_v32, %v2362_v46  ;;  %v4620_v1 = vpop.f32.mrf.mxu3  ;;  %v4051_v46 = vld [vmem:[#allocation2 + $0x3a0] sm:$0xff]  ;;  %v4052_v32 = vld [vmem:[#allocation2 + $0x3a8] sm:$0xff] }
 0x44c   :  { %5110 = vst [vmem:[#allocation36_spill] sm:$0xff] %v4620_v1  ;;  %2688 = vmatmul.f32.gmra.mxu1 %v4052_v32  ;;  %3348 = vmatpush.msrb.mxu0 %v2982_v19 }
 0x44d   :  { %v4617_v16 = vadd.f32 %v2491_v40, %v2427_v10  ;;  %2753 = vmatmul.f32.gmra.mxu2 %v4053_v43  ;;  %v3016_v10 = vld [vmem:[#allocation8 + $0x1f8] sm:$0xff]  ;;  %v4057_v43 = vld [vmem:[#allocation2 + $0x3f0] sm:$0xff] }
 0x44e   :  { %2818 = vmatmul.f32.gmra.mxu3 %v4054_v52  ;;  %3412 = vmatpush.msrb.mxu1 %v3016_v10  ;;  %v2826_v52 = vmul.f32 0.01, %v4421_v37  ;;  %v4058_v10 = vld [vmem:[#allocation2 + $0x3f8] sm:$0xff] }
 0x44f   :  { %5109 = vst [vmem:[#allocation35_spill] sm:$0xff] %v4617_v16 }
 0x450   :  { %v2364_v44 = vpop.f32.mrf.mxu0 }
 0x451   :  { %v2365_v24 = vadd.f32 %v2364_v44, %v4563_v58  ;;  %v2494_v6 = vpop.f32.mrf.mxu2  ;;  %v2432_v1 = vpop.f32.mrf.mxu1 }
 0x453   :  { %2623 = vmatmul.f32.gmra.mxu0 %v4051_v46  ;;  %v2430_v48 = vadd.f32 %v2429_v54, %v2365_v24  ;;  %v4625_v16 = vpop.f32.mrf.mxu3  ;;  %v4055_v54 = vld [vmem:[#allocation2 + $0x3e0] sm:$0xff]  ;;  %v4056_v24 = vld [vmem:[#allocation2 + $0x3e8] sm:$0xff] }
 0x454   :  { %5111 = vst [vmem:[#allocation37_spill] sm:$0xff] %v4625_v16  ;;  %2691 = vmatmul.f32.gmra.mxu1 %v4056_v24  ;;  %v4641_v16 = vmax.f32 %v4519_v25, %v2827_v28 }
 0x455   :  { %v4622_v40 = vadd.f32 %v2494_v6, %v2430_v48  ;;  %2756 = vmatmul.f32.gmra.mxu2 %v4057_v43  ;;  %v2825_v48 = vmul.f32 0.01, %v4323_v5  ;;  %v3044_v6 = vld [vmem:[#allocation8 + $0x2d8] sm:$0xff]  ;;  %v4636_v43 = vmax.f32 %v4421_v37, %v2826_v52  ;;  %v2830_v37 = vmul.f32 0.01, %v4424_v39 }
 0x456   :  { %2821 = vmatmul.f32.gmra.mxu3 %v4058_v10  ;;  %3479 = vmatpush.msrb.mxu2 %v3044_v6  ;;  %5113 = vst [vmem:[#allocation39_spill] sm:$0xff] %v4641_v16  ;;  %v3042_v6 = vld [vmem:[#allocation8 + $0x2c8] sm:$0xff] }
 0x457   :  { %v4633_v24 = vmax.f32 %v4323_v5, %v2825_v48  ;;  %5112 = vst [vmem:[#allocation38_spill] sm:$0xff] %v4636_v43  ;;  %v2829_v5 = vmul.f32 0.01, %v4326_v26  ;;  %v2831_v48 = vmul.f32 0.01, %v4522_v20 }
 0x458   :  { %v2367_v44 = vpop.f32.mrf.mxu0  ;;  %3480 = vmatpush.msrb.mxu2 %v3042_v6 }
 0x459   :  { %v2368_v46 = vadd.f32 %v2367_v44, %v4563_v58  ;;  %v3014_v58 = vld [vmem:[#allocation8 + $0x1e8] sm:$0xff]  ;;  %v2497_v44 = vpop.f32.mrf.mxu2 }
 0x45a   :  { %3413 = vmatpush.msrb.mxu1 %v3014_v58  ;;  %v3012_v58 = vld [vmem:[#allocation8 + $0x1d8] sm:$0xff] }
 0x45b   :  { %2626 = vmatmul.f32.gmra.mxu0 %v4055_v54  ;;  %v2433_v32 = vadd.f32 %v2432_v1, %v2368_v46  ;;  %v2647_v54 = vpop.f32.mrf.mxu1  ;;  %v2980_v1 = vld [vmem:[#allocation8 + $0xd8] sm:$0xff]  ;;  %v4638_v10 = vpop.f32.mrf.mxu3 }
 0x45c   :  { %v3076_v46 = vld [vmem:[#allocation8 + $0x3d8] sm:$0xff]  ;;  %3349 = vmatpush.msrb.mxu0 %v2980_v1  ;;  %3168 = vmatmul.f32.vlgmr.msra.gmra.mxu1 %v4636_v43  ;;  %v3074_v1 = vld [vmem:[#allocation8 + $0x3c8] sm:$0xff] }
 0x45d   :  { %v4630_v19 = vadd.f32 %v2497_v44, %v2433_v32  ;;  %3544 = vmatpush.msrb.mxu3 %v3076_v46  ;;  %3233 = vmatmul.f32.vlgmr.msra.gmra.mxu2 %v4641_v16  ;;  %v4651_v46 = vmax.f32 %v4326_v26, %v2829_v5  ;;  %v4654_v16 = vmax.f32 %v4424_v39, %v2830_v37  ;;  %v2833_v26 = vmul.f32 0.01, %v4329_v14 }
 0x45e   :  { %3414 = vmatpush.msrb.mxu1 %v3012_v58  ;;  %v2834_v39 = vmul.f32 0.01, %v4427_v31  ;;  %v2835_v5 = vmul.f32 0.01, %v4525_v41 }
 0x45f   :  { %3545 = vmatpush.msrb.mxu3 %v3074_v1  ;;  %v4670_v1 = vmax.f32 %v4329_v14, %v2833_v26  ;;  %v2837_v14 = vmul.f32 0.01, %v4332_v0  ;;  %v2839_v26 = vmul.f32 0.01, %v4528_v4 }
 0x460   :  { %v2582_v47 = vpop.f32.mrf.mxu0 }
 0x461   :  { %v2583_v32 = vadd.f32 %v2582_v47, %v4569_v50  ;;  %v2712_v44 = vpop.f32.mrf.mxu2  ;;  %v2978_v47 = vld [vmem:[#allocation8 + $0xc8] sm:$0xff] }
 0x462   :  { %3350 = vmatpush.msrb.mxu0 %v2978_v47  ;;  %v3072_v47 = vld [vmem:[#allocation8 + $0x3b8] sm:$0xff] }
 0x463   :  { %3103 = vmatmul.f32.vlgmr.msra.gmra.mxu0 %v4633_v24  ;;  %v2648_v52 = vadd.f32 %v2647_v54, %v2583_v32  ;;  %v2650_v28 = vpop.f32.mrf.mxu1  ;;  %v2777_v43 = vpop.f32.mrf.mxu3  ;;  %v4657_v54 = vmax.f32 %v4522_v20, %v2831_v48  ;;  %v3010_v20 = vld [vmem:[#allocation8 + $0x1c8] sm:$0xff]  ;;  %v3040_v48 = vld [vmem:[#allocation8 + $0x2b8] sm:$0xff]  ;;  %3546 = vmatpush.msrb.mxu3 %v3072_v47  ;;  %v4689_v47 = vmax.f32 %v4332_v0, %v2837_v14  ;;  %v2841_v0 = vmul.f32 0.01, %v4335_v21 }
 0x464   :  { %3171 = vmatmul.f32.gmra.mxu1 %v4654_v16  ;;  %3481 = vmatpush.msrb.mxu2 %v3040_v48  ;;  %v2843_v14 = vmul.f32 0.01, %v4531_v3 }
 0x465   :  { %v2713_v25 = vadd.f32 %v2712_v44, %v2648_v52  ;;  %5114 = vst [vmem:[#allocation40_spill] sm:$0xff] %v4657_v54  ;;  %3236 = vmatmul.f32.gmra.mxu2 %v4657_v54  ;;  %3415 = vmatpush.msrb.mxu1 %v3010_v20  ;;  %v4673_v54 = vmax.f32 %v4427_v31, %v2834_v39  ;;  %v2838_v31 = vmul.f32 0.01, %v4430_v7 }
 0x467   :  { %v2778_v58 = vadd.f32 %v2777_v43, %v2713_v25 }
 0x468   :  { %v2585_v50 = vpop.f32.mrf.mxu0 }
 0x469   :  { %v2586_v32 = vadd.f32 %v2585_v50, %v4572_v45  ;;  %v2828_v52 = vmul.f32 0.01, %v2778_v58  ;;  %v2715_v45 = vpop.f32.mrf.mxu2  ;;  %v2976_v50 = vld [vmem:[#allocation8 + $0xb8] sm:$0xff] }
 0x46a   :  { %3351 = vmatpush.msrb.mxu0 %v2976_v50  ;;  %v3070_v50 = vld [vmem:[#allocation8 + $0x3a8] sm:$0xff] }
 0x46b   :  { %3106 = vmatmul.f32.gmra.mxu0 %v4651_v46  ;;  %v2651_v37 = vadd.f32 %v2650_v28, %v2586_v32  ;;  %v4666_v6 = vmax.f32 %v2778_v58, %v2828_v52  ;;  %v2653_v25 = vpop.f32.mrf.mxu1  ;;  %v2780_v28 = vpop.f32.mrf.mxu3  ;;  %v4676_v32 = vmax.f32 %v4525_v41, %v2835_v5  ;;  %v3008_v41 = vld [vmem:[#allocation8 + $0x1b8] sm:$0xff]  ;;  %v3038_v5 = vld [vmem:[#allocation8 + $0x2a8] sm:$0xff]  ;;  %3547 = vmatpush.msrb.mxu3 %v3070_v50 }
 0x46c   :  { %3174 = vmatmul.f32.gmra.mxu1 %v4673_v54  ;;  %3482 = vmatpush.msrb.mxu2 %v3038_v5  ;;  %v4708_v50 = vmax.f32 %v4335_v21, %v2841_v0  ;;  %v2845_v21 = vmul.f32 0.01, %v4338_v42  ;;  %v2847_v0 = vmul.f32 0.01, %v4534_v63 }
 0x46d   :  { %v2716_v43 = vadd.f32 %v2715_v45, %v2651_v37  ;;  %3298 = vmatmul.f32.vlgmr.msra.gmra.mxu3 %v4666_v6  ;;  %3239 = vmatmul.f32.gmra.mxu2 %v4676_v32 }
 0x46e   :  { %3416 = vmatpush.msrb.mxu1 %v3008_v41 }
 0x46f   :  { %v2781_v52 = vadd.f32 %v2780_v28, %v2716_v43  ;;  %v4692_v28 = vmax.f32 %v4430_v7, %v2838_v31  ;;  %v2842_v7 = vmul.f32 0.01, %v4433_v38 }
 0x470   :  { %v2588_v44 = vpop.f32.mrf.mxu0 }
 0x471   :  { %v2589_v58 = vadd.f32 %v2588_v44, %v4575_v15  ;;  %v2832_v37 = vmul.f32 0.01, %v2781_v52  ;;  %v2718_v15 = vpop.f32.mrf.mxu2  ;;  %v2974_v44 = vld [vmem:[#allocation8 + $0xa8] sm:$0xff] }
 0x472   :  { %3352 = vmatpush.msrb.mxu0 %v2974_v44  ;;  %v3068_v44 = vld [vmem:[#allocation8 + $0x398] sm:$0xff] }
 0x473   :  { %3109 = vmatmul.f32.gmra.mxu0 %v4670_v1  ;;  %v2654_v39 = vadd.f32 %v2653_v25, %v2589_v58  ;;  %v4685_v20 = vmax.f32 %v2781_v52, %v2832_v37  ;;  %v2656_v43 = vpop.f32.mrf.mxu1  ;;  %v2783_v25 = vpop.f32.mrf.mxu3  ;;  %v4695_v58 = vmax.f32 %v4528_v4, %v2839_v26  ;;  %v3006_v4 = vld [vmem:[#allocation8 + $0x1a8] sm:$0xff]  ;;  %v3036_v26 = vld [vmem:[#allocation8 + $0x298] sm:$0xff]  ;;  %3548 = vmatpush.msrb.mxu3 %v3068_v44 }
 0x474   :  { %3177 = vmatmul.f32.gmra.mxu1 %v4692_v28  ;;  %3483 = vmatpush.msrb.mxu2 %v3036_v26  ;;  %v4727_v44 = vmax.f32 %v4338_v42, %v2845_v21  ;;  %v2849_v42 = vmul.f32 0.01, %v4341_v61  ;;  %v2851_v21 = vmul.f32 0.01, %v4537_v60 }
 0x475   :  { %v2719_v48 = vadd.f32 %v2718_v15, %v2654_v39  ;;  %3301 = vmatmul.f32.gmra.mxu3 %v4685_v20  ;;  %3242 = vmatmul.f32.gmra.mxu2 %v4695_v58 }
 0x476   :  { %3417 = vmatpush.msrb.mxu1 %v3006_v4 }
 0x477   :  { %v2784_v37 = vadd.f32 %v2783_v25, %v2719_v48  ;;  %v4711_v25 = vmax.f32 %v4433_v38, %v2842_v7  ;;  %v2846_v38 = vmul.f32 0.01, %v4436_v30 }
 0x478   :  { %v2591_v45 = vpop.f32.mrf.mxu0 }
 0x479   :  { %v2592_v52 = vadd.f32 %v2591_v45, %v4578_v55  ;;  %v2836_v39 = vmul.f32 0.01, %v2784_v37  ;;  %v2721_v55 = vpop.f32.mrf.mxu2  ;;  %v2972_v45 = vld [vmem:[#allocation8 + $0x98] sm:$0xff] }
 0x47a   :  { %3353 = vmatpush.msrb.mxu0 %v2972_v45  ;;  %v3066_v45 = vld [vmem:[#allocation8 + $0x388] sm:$0xff] }
 0x47b   :  { %3112 = vmatmul.f32.gmra.mxu0 %v4689_v47  ;;  %v2657_v31 = vadd.f32 %v2656_v43, %v2592_v52  ;;  %v4704_v41 = vmax.f32 %v2784_v37, %v2836_v39  ;;  %v2659_v48 = vpop.f32.mrf.mxu1  ;;  %v2786_v43 = vpop.f32.mrf.mxu3  ;;  %v4714_v52 = vmax.f32 %v4531_v3, %v2843_v14  ;;  %v3004_v3 = vld [vmem:[#allocation8 + $0x198] sm:$0xff]  ;;  %v3034_v14 = vld [vmem:[#allocation8 + $0x288] sm:$0xff]  ;;  %3549 = vmatpush.msrb.mxu3 %v3066_v45 }
 0x47c   :  { %3180 = vmatmul.f32.gmra.mxu1 %v4711_v25  ;;  %3484 = vmatpush.msrb.mxu2 %v3034_v14  ;;  %v4746_v45 = vmax.f32 %v4341_v61, %v2849_v42  ;;  %v2853_v61 = vmul.f32 0.01, %v4344_v17  ;;  %v2855_v42 = vmul.f32 0.01, %v4540_v53 }
 0x47d   :  { %v2722_v5 = vadd.f32 %v2721_v55, %v2657_v31  ;;  %3304 = vmatmul.f32.gmra.mxu3 %v4704_v41  ;;  %3245 = vmatmul.f32.gmra.mxu2 %v4714_v52 }
 0x47e   :  { %3418 = vmatpush.msrb.mxu1 %v3004_v3 }
 0x47f   :  { %v2787_v39 = vadd.f32 %v2786_v43, %v2722_v5  ;;  %v4730_v43 = vmax.f32 %v4436_v30, %v2846_v38  ;;  %v2850_v30 = vmul.f32 0.01, %v4439_v51 }
 0x480   :  { %v2594_v15 = vpop.f32.mrf.mxu0 }
 0x481   :  { %v2595_v37 = vadd.f32 %v2594_v15, %v4581_v9  ;;  %v2840_v31 = vmul.f32 0.01, %v2787_v39  ;;  %v2724_v9 = vpop.f32.mrf.mxu2  ;;  %v2970_v15 = vld [vmem:[#allocation8 + $0x88] sm:$0xff] }
 0x482   :  { %3354 = vmatpush.msrb.mxu0 %v2970_v15  ;;  %v3064_v15 = vld [vmem:[#allocation8 + $0x378] sm:$0xff] }
 0x483   :  { %3115 = vmatmul.f32.gmra.mxu0 %v4708_v50  ;;  %v2660_v7 = vadd.f32 %v2659_v48, %v2595_v37  ;;  %v4723_v4 = vmax.f32 %v2787_v39, %v2840_v31  ;;  %v2662_v5 = vpop.f32.mrf.mxu1  ;;  %v2789_v48 = vpop.f32.mrf.mxu3  ;;  %v4733_v37 = vmax.f32 %v4534_v63, %v2847_v0  ;;  %v3002_v63 = vld [vmem:[#allocation8 + $0x188] sm:$0xff]  ;;  %v3032_v0 = vld [vmem:[#allocation8 + $0x278] sm:$0xff]  ;;  %3550 = vmatpush.msrb.mxu3 %v3064_v15 }
 0x484   :  { %3183 = vmatmul.f32.gmra.mxu1 %v4730_v43  ;;  %3485 = vmatpush.msrb.mxu2 %v3032_v0  ;;  %v4765_v15 = vmax.f32 %v4344_v17, %v2853_v61  ;;  %v2857_v17 = vmul.f32 0.01, %v4347_v36  ;;  %v2859_v61 = vmul.f32 0.01, %v4543_v34 }
 0x485   :  { %v2725_v26 = vadd.f32 %v2724_v9, %v2660_v7  ;;  %3307 = vmatmul.f32.gmra.mxu3 %v4723_v4  ;;  %3248 = vmatmul.f32.gmra.mxu2 %v4733_v37 }
 0x486   :  { %3419 = vmatpush.msrb.mxu1 %v3002_v63 }
 0x487   :  { %v2790_v31 = vadd.f32 %v2789_v48, %v2725_v26  ;;  %v4749_v48 = vmax.f32 %v4439_v51, %v2850_v30  ;;  %v2854_v51 = vmul.f32 0.01, %v4442_v29 }
 0x488   :  { %v2597_v55 = vpop.f32.mrf.mxu0 }
 0x489   :  { %v2598_v39 = vadd.f32 %v2597_v55, %v4584_v62  ;;  %v2844_v7 = vmul.f32 0.01, %v2790_v31  ;;  %v2727_v62 = vpop.f32.mrf.mxu2  ;;  %v2968_v55 = vld [vmem:[#allocation8 + $0x78] sm:$0xff] }
 0x48a   :  { %3355 = vmatpush.msrb.mxu0 %v2968_v55  ;;  %v3062_v55 = vld [vmem:[#allocation8 + $0x368] sm:$0xff] }
 0x48b   :  { %3118 = vmatmul.f32.gmra.mxu0 %v4727_v44  ;;  %v2663_v38 = vadd.f32 %v2662_v5, %v2598_v39  ;;  %v4742_v3 = vmax.f32 %v2790_v31, %v2844_v7  ;;  %v2665_v26 = vpop.f32.mrf.mxu1  ;;  %v2792_v5 = vpop.f32.mrf.mxu3  ;;  %v4752_v39 = vmax.f32 %v4537_v60, %v2851_v21  ;;  %v3000_v60 = vld [vmem:[#allocation8 + $0x178] sm:$0xff]  ;;  %v3030_v21 = vld [vmem:[#allocation8 + $0x268] sm:$0xff]  ;;  %3551 = vmatpush.msrb.mxu3 %v3062_v55 }
 0x48c   :  { %3186 = vmatmul.f32.gmra.mxu1 %v4749_v48  ;;  %3486 = vmatpush.msrb.mxu2 %v3030_v21  ;;  %v2542_v21 = vadd.f32 %v4595_v8, %v4592_v27  ;;  %v3060_v55 = vld [vmem:[#allocation8 + $0x358] sm:$0xff] }
 0x48d   :  { %v2728_v14 = vadd.f32 %v2727_v62, %v2663_v38  ;;  %3310 = vmatmul.f32.gmra.mxu3 %v4742_v3  ;;  %3251 = vmatmul.f32.gmra.mxu2 %v4752_v39 }
 0x48e   :  { %3420 = vmatpush.msrb.mxu1 %v3000_v60  ;;  %3552 = vmatpush.msrb.mxu3 %v3060_v55 }
 0x48f   :  { %v2793_v7 = vadd.f32 %v2792_v5, %v2728_v14  ;;  %v4768_v5 = vmax.f32 %v4442_v29, %v2854_v51  ;;  %v2858_v29 = vmul.f32 0.01, %v4445_v33 }
 0x490   :  { %v2600_v9 = vpop.f32.mrf.mxu0 }
 0x491   :  { %v2601_v31 = vadd.f32 %v2600_v9, %v4587_v11  ;;  %v2848_v38 = vmul.f32 0.01, %v2793_v7  ;;  %v2730_v11 = vpop.f32.mrf.mxu2  ;;  %v2966_v9 = vld [vmem:[#allocation8 + $0x68] sm:$0xff] }
 0x492   :  { %3356 = vmatpush.msrb.mxu0 %v2966_v9  ;;  %v2964_v9 = vld [vmem:[#allocation8 + $0x58] sm:$0xff] }
 0x493   :  { %3121 = vmatmul.f32.gmra.mxu0 %v4746_v45  ;;  %v2666_v30 = vadd.f32 %v2665_v26, %v2601_v31  ;;  %v4761_v63 = vmax.f32 %v2793_v7, %v2848_v38  ;;  %v2668_v14 = vpop.f32.mrf.mxu1  ;;  %v2795_v26 = vpop.f32.mrf.mxu3  ;;  %v4771_v31 = vmax.f32 %v4540_v53, %v2855_v42  ;;  %v2998_v53 = vld [vmem:[#allocation8 + $0x168] sm:$0xff]  ;;  %v3028_v42 = vld [vmem:[#allocation8 + $0x258] sm:$0xff] }
 0x494   :  { %3189 = vmatmul.f32.gmra.mxu1 %v4768_v5  ;;  %3487 = vmatpush.msrb.mxu2 %v3028_v42  ;;  %v2545_v42 = vadd.f32 %v4600_v2, %v4597_v35 }
 0x495   :  { %v2731_v0 = vadd.f32 %v2730_v11, %v2666_v30  ;;  %3313 = vmatmul.f32.gmra.mxu3 %v4761_v63  ;;  %3254 = vmatmul.f32.gmra.mxu2 %v4771_v31 }
 0x496   :  { %3421 = vmatpush.msrb.mxu1 %v2998_v53  ;;  %3357 = vmatpush.msrb.mxu0 %v2964_v9  ;;  %v3058_v9 = vld [vmem:[#allocation8 + $0x348] sm:$0xff] }
 0x497   :  { %v2796_v38 = vadd.f32 %v2795_v26, %v2731_v0  ;;  %v4786_v26 = vmax.f32 %v4347_v36, %v2857_v17  ;;  %v2861_v36 = vmul.f32 0.01, %v4350_v56  ;;  %v2863_v17 = vmul.f32 0.01, %v4546_v59  ;;  %3553 = vmatpush.msrb.mxu3 %v3058_v9 }
 0x498   :  { %v2603_v62 = vpop.f32.mrf.mxu0 }
 0x499   :  { %v2604_v7 = vadd.f32 %v2603_v62, %v4590_v49  ;;  %v2852_v30 = vmul.f32 0.01, %v2796_v38  ;;  %v2733_v49 = vpop.f32.mrf.mxu2  ;;  %v4806_v55 = vmax.f32 %v4350_v56, %v2861_v36  ;;  %v2865_v56 = vmul.f32 0.01, %v4353_v12 }
 0x49b   :  { %3124 = vmatmul.f32.gmra.mxu0 %v4765_v15  ;;  %v2669_v51 = vadd.f32 %v2668_v14, %v2604_v7  ;;  %v4780_v60 = vmax.f32 %v2796_v38, %v2852_v30  ;;  %v2671_v62 = vpop.f32.mrf.mxu1  ;;  %v4789_v14 = vmax.f32 %v4445_v33, %v2858_v29  ;;  %v2798_v7 = vpop.f32.mrf.mxu3  ;;  %v4792_v38 = vmax.f32 %v4543_v34, %v2859_v61  ;;  %v2996_v34 = vld [vmem:[#allocation8 + $0x158] sm:$0xff]  ;;  %v3026_v61 = vld [vmem:[#allocation8 + $0x248] sm:$0xff] }
 0x49c   :  { %v2862_v33 = vmul.f32 0.01, %v4448_v57  ;;  %3422 = vmatpush.msrb.mxu1 %v2996_v34  ;;  %3488 = vmatpush.msrb.mxu2 %v3026_v61  ;;  %v2548_v34 = vadd.f32 %v4605_v22, %v4602_v13 }
 0x49d   :  { %v2734_v11 = vadd.f32 %v2733_v49, %v2669_v51  ;;  %3316 = vmatmul.f32.gmra.mxu3 %v4780_v60  ;;  %3192 = vmatmul.f32.gmra.mxu1 %v4789_v14 }
 0x49e   :  { %3257 = vmatmul.f32.gmra.mxu2 %v4792_v38 }
 0x49f   :  { %v2799_v27 = vadd.f32 %v2798_v7, %v2734_v11 }
 0x4a0   :  { %v2606_v0 = vpop.f32.mrf.mxu0 }
 0x4a1   :  { %v2607_v8 = vadd.f32 %v2606_v0, %v2542_v21  ;;  %v2856_v30 = vmul.f32 0.01, %v2799_v27  ;;  %v2736_v53 = vpop.f32.mrf.mxu2  ;;  %v2962_v0 = vld [vmem:[#allocation8 + $0x48] sm:$0xff] }
 0x4a2   :  { %3358 = vmatpush.msrb.mxu0 %v2962_v0  ;;  %v4826_v0 = vmax.f32 %v4353_v12, %v2865_v56  ;;  %v5117_v12 = vld [vmem:[#allocation16_spill] sm:$0xff]  ;;  %v5119_v56 = vld [vmem:[#allocation26_spill] sm:$0xff] }
 0x4a3   :  { %3127 = vmatmul.f32.gmra.mxu0 %v4786_v26  ;;  %v2672_v29 = vadd.f32 %v2671_v62, %v2607_v8  ;;  %v4800_v51 = vmax.f32 %v2799_v27, %v2856_v30  ;;  %v2674_v11 = vpop.f32.mrf.mxu1  ;;  %v4809_v62 = vmax.f32 %v4448_v57, %v2862_v33  ;;  %v2801_v7 = vpop.f32.mrf.mxu3  ;;  %v4812_v8 = vmax.f32 %v4546_v59, %v2863_v17  ;;  %v2994_v59 = vld [vmem:[#allocation8 + $0x148] sm:$0xff]  ;;  %v3024_v17 = vld [vmem:[#allocation8 + $0x238] sm:$0xff] }
 0x4a4   :  { %v2866_v57 = vmul.f32 0.01, %v4451_v18  ;;  %v2867_v30 = vmul.f32 0.01, %v4549_v23  ;;  %3423 = vmatpush.msrb.mxu1 %v2994_v59  ;;  %3489 = vmatpush.msrb.mxu2 %v3024_v17 }
 0x4a5   :  { %v2737_v49 = vadd.f32 %v2736_v53, %v2672_v29  ;;  %3319 = vmatmul.f32.gmra.mxu3 %v4800_v51  ;;  %3195 = vmatmul.f32.gmra.mxu1 %v4809_v62 }
 0x4a6   :  { %3260 = vmatmul.f32.gmra.mxu2 %v4812_v8 }
 0x4a7   :  { %v2802_v35 = vadd.f32 %v2801_v7, %v2737_v49  ;;  %v2960_v49 = vld [vmem:[#allocation8 + $0x38] sm:$0xff]  ;;  %v4832_v7 = vmax.f32 %v4549_v23, %v2867_v30  ;;  %v3022_v30 = vld [vmem:[#allocation8 + $0x228] sm:$0xff] }
 0x4a8   :  { %v2609_v21 = vpop.f32.mrf.mxu0  ;;  %3359 = vmatpush.msrb.mxu0 %v2960_v49  ;;  %v2992_v23 = vld [vmem:[#allocation8 + $0x138] sm:$0xff]  ;;  %3490 = vmatpush.msrb.mxu2 %v3022_v30 }
 0x4a9   :  { %v2610_v2 = vadd.f32 %v2609_v21, %v2545_v42  ;;  %v2860_v27 = vmul.f32 0.01, %v2802_v35  ;;  %v2739_v29 = vpop.f32.mrf.mxu2  ;;  %v3056_v21 = vld [vmem:[#allocation8 + $0x338] sm:$0xff]  ;;  %5116 = vst [vmem:[#allocation42_spill] sm:$0xff] %v4832_v7  ;;  %3424 = vmatpush.msrb.mxu1 %v2992_v23 }
 0x4aa   :  { %3554 = vmatpush.msrb.mxu3 %v3056_v21  ;;  %v5127_v30 = vld [vmem:[#allocation22_spill] sm:$0xff] }
 0x4ab   :  { %3130 = vmatmul.f32.gmra.mxu0 %v4806_v55  ;;  %v2675_v36 = vadd.f32 %v2674_v11, %v2610_v2  ;;  %v4820_v33 = vmax.f32 %v2802_v35, %v2860_v27  ;;  %v2677_v42 = vpop.f32.mrf.mxu1  ;;  %v4829_v11 = vmax.f32 %v4451_v18, %v2866_v57  ;;  %v2804_v9 = vpop.f32.mrf.mxu3  ;;  %v2869_v35 = vmul.f32 0.01, %v5117_v12  ;;  %v5118_v27 = vld [vmem:[#allocation21_spill] sm:$0xff] }
 0x4ac   :  { %v2870_v18 = vmul.f32 0.01, %v5118_v27  ;;  %v2871_v57 = vmul.f32 0.01, %v5119_v56 }
 0x4ad   :  { %v2740_v61 = vadd.f32 %v2739_v29, %v2675_v36  ;;  %3322 = vmatmul.f32.gmra.mxu3 %v4820_v33  ;;  %5115 = vst [vmem:[#allocation41_spill] sm:$0xff] %v4829_v11  ;;  %3198 = vmatmul.f32.gmra.mxu1 %v4829_v11  ;;  %v5121_v29 = vld [vmem:[#allocation31_spill] sm:$0xff]  ;;  %v4846_v11 = vmax.f32 %v5117_v12, %v2869_v35  ;;  %v5126_v12 = vld [vmem:[#allocation17_spill] sm:$0xff] }
 0x4ae   :  { %3263 = vmatmul.f32.gmra.mxu2 %v4832_v7  ;;  %v3054_v7 = vld [vmem:[#allocation8 + $0x328] sm:$0xff]  ;;  %v2873_v35 = vmul.f32 0.01, %v5126_v12 }
 0x4af   :  { %v2805_v13 = vadd.f32 %v2804_v9, %v2740_v61  ;;  %v2958_v9 = vld [vmem:[#allocation8 + $0x28] sm:$0xff]  ;;  %5123 = vst [vmem:[#allocation21_spill] sm:$0xff] %v4846_v11  ;;  %3555 = vmatpush.msrb.mxu3 %v3054_v7 }
 0x4b0   :  { %v2612_v53 = vpop.f32.mrf.mxu0  ;;  %3360 = vmatpush.msrb.mxu0 %v2958_v9 }
 0x4b1   :  { %v2613_v22 = vadd.f32 %v2612_v53, %v2548_v34  ;;  %v2864_v2 = vmul.f32 0.01, %v2805_v13  ;;  %v2742_v17 = vpop.f32.mrf.mxu2  ;;  %v5122_v34 = vld [vmem:[#allocation32_spill] sm:$0xff] }
 0x4b2   :  { %v2551_v61 = vadd.f32 %v5122_v34, %v5121_v29 }
 0x4b3   :  { %3133 = vmatmul.f32.gmra.mxu0 %v4826_v0  ;;  %v2678_v36 = vadd.f32 %v2677_v42, %v2613_v22  ;;  %v4840_v59 = vmax.f32 %v2805_v13, %v2864_v2  ;;  %v2680_v21 = vpop.f32.mrf.mxu1  ;;  %v4849_v42 = vmax.f32 %v5118_v27, %v2870_v18  ;;  %v2807_v22 = vpop.f32.mrf.mxu3  ;;  %v4852_v13 = vmax.f32 %v5119_v56, %v2871_v57  ;;  %v5128_v18 = vld [vmem:[#allocation27_spill] sm:$0xff]  ;;  %v2990_v56 = vld [vmem:[#allocation8 + $0x128] sm:$0xff] }
 0x4b4   :  { %v2874_v27 = vmul.f32 0.01, %v5127_v30  ;;  %v3020_v57 = vld [vmem:[#allocation8 + $0x218] sm:$0xff]  ;;  %3425 = vmatpush.msrb.mxu1 %v2990_v56 }
 0x4b5   :  { %5120 = vst [vmem:[#allocation16_spill] sm:$0xff] %v4840_v59  ;;  %v2743_v53 = vadd.f32 %v2742_v17, %v2678_v36  ;;  %3325 = vmatmul.f32.gmra.mxu3 %v4840_v59  ;;  %3201 = vmatmul.f32.gmra.mxu1 %v4849_v42  ;;  %v2875_v17 = vmul.f32 0.01, %v5128_v18  ;;  %v2988_v59 = vld [vmem:[#allocation8 + $0x118] sm:$0xff] }
 0x4b6   :  { %5124 = vst [vmem:[#allocation26_spill] sm:$0xff] %v4849_v42  ;;  %3266 = vmatmul.f32.gmra.mxu2 %v4852_v13  ;;  %v2956_v42 = vld [vmem:[#allocation8 + $0x18] sm:$0xff]  ;;  %3426 = vmatpush.msrb.mxu1 %v2988_v59 }
 0x4b7   :  { %5125 = vst [vmem:[#allocation31_spill] sm:$0xff] %v4852_v13  ;;  %v2808_v36 = vadd.f32 %v2807_v22, %v2743_v53  ;;  %3491 = vmatpush.msrb.mxu2 %v3020_v57  ;;  %v5130_v53 = vld [vmem:[#allocation34_spill] sm:$0xff]  ;;  %3361 = vmatpush.msrb.mxu0 %v2956_v42  ;;  %v2954_v57 = vld [vmem:[#allocation8 + $0x8] sm:$0xff] }
 0x4b8   :  { %v2615_v49 = vpop.f32.mrf.mxu0 }
 0x4b9   :  { %v2616_v2 = vadd.f32 %v2615_v49, %v2551_v61  ;;  %v2868_v23 = vmul.f32 0.01, %v2808_v36  ;;  %v2745_v34 = vpop.f32.mrf.mxu2  ;;  %v5129_v61 = vld [vmem:[#allocation33_spill] sm:$0xff]  ;;  %3362 = vmatpush.msrb.mxu0 %v2954_v57 }
 0x4ba   :  { %v2554_v49 = vadd.f32 %v5130_v53, %v5129_v61  ;;  %v3018_v61 = vld [vmem:[#allocation8 + $0x208] sm:$0xff] }
 0x4bb   :  { %3136 = vmatmul.f32.gmra.mxu0 %v4846_v11  ;;  %v2681_v29 = vadd.f32 %v2680_v21, %v2616_v2  ;;  %v4860_v7 = vmax.f32 %v2808_v36, %v2868_v23  ;;  %v2683_v13 = vpop.f32.mrf.mxu1  ;;  %v3052_v11 = vld [vmem:[#allocation8 + $0x318] sm:$0xff]  ;;  %v4866_v21 = vmax.f32 %v5126_v12, %v2873_v35  ;;  %v4869_v2 = vmax.f32 %v5127_v30, %v2874_v27  ;;  %v2810_v36 = vpop.f32.mrf.mxu3  ;;  %v5136_v27 = vld [vmem:[#allocation28_spill] sm:$0xff] }
 0x4bc   :  { %3556 = vmatpush.msrb.mxu3 %v3052_v11  ;;  %v4872_v23 = vmax.f32 %v5128_v18, %v2875_v17  ;;  %v5134_v35 = vld [vmem:[#allocation18_spill] sm:$0xff]  ;;  %v5135_v11 = vld [vmem:[#allocation23_spill] sm:$0xff]  ;;  %3492 = vmatpush.msrb.mxu2 %v3018_v61  ;;  %v2879_v18 = vmul.f32 0.01, %v5136_v27 }
 0x4bd   :  { %v2746_v9 = vadd.f32 %v2745_v34, %v2681_v29  ;;  %3328 = vmatmul.f32.gmra.mxu3 %v4860_v7  ;;  %5131 = vst [vmem:[#allocation32_spill] sm:$0xff] %v4866_v21  ;;  %v2986_v34 = vld [vmem:[#allocation8 + $0x108] sm:$0xff]  ;;  %3204 = vmatmul.f32.gmra.mxu1 %v4869_v2  ;;  %v2877_v42 = vmul.f32 0.01, %v5134_v35  ;;  %v2878_v30 = vmul.f32 0.01, %v5135_v11 }
 0x4be   :  { %5132 = vst [vmem:[#allocation17_spill] sm:$0xff] %v4869_v2  ;;  %3269 = vmatmul.f32.gmra.mxu2 %v4872_v23  ;;  %3427 = vmatpush.msrb.mxu1 %v2986_v34  ;;  %v3050_v2 = vld [vmem:[#allocation8 + $0x308] sm:$0xff] }
 0x4bf   :  { %5133 = vst [vmem:[#allocation22_spill] sm:$0xff] %v4872_v23  ;;  %v2811_v56 = vadd.f32 %v2810_v36, %v2746_v9  ;;  %v5138_v9 = vld [vmem:[#allocation36_spill] sm:$0xff]  ;;  %v4889_v34 = vmax.f32 %v5135_v11, %v2878_v30  ;;  %3557 = vmatpush.msrb.mxu3 %v3050_v2  ;;  %v5143_v11 = vld [vmem:[#allocation29_spill] sm:$0xff] }
 0x4c0   :  { %v2618_v22 = vpop.f32.mrf.mxu0  ;;  %v2883_v30 = vmul.f32 0.01, %v5143_v11 }
 0x4c1   :  { %v2619_v29 = vadd.f32 %v2618_v22, %v2554_v49  ;;  %v2872_v12 = vmul.f32 0.01, %v2811_v56  ;;  %v2748_v53 = vpop.f32.mrf.mxu2  ;;  %v5137_v49 = vld [vmem:[#allocation35_spill] sm:$0xff]  ;;  %5139 = vst [vmem:[#allocation27_spill] sm:$0xff] %v4889_v34 }
 0x4c2   :  { %v2557_v22 = vadd.f32 %v5138_v9, %v5137_v49 }
 0x4c3   :  { %3139 = vmatmul.f32.gmra.mxu0 %v4866_v21  ;;  %v2684_v59 = vadd.f32 %v2683_v13, %v2619_v29  ;;  %v4880_v17 = vmax.f32 %v2811_v56, %v2872_v12  ;;  %v2686_v57 = vpop.f32.mrf.mxu1  ;;  %v4886_v21 = vmax.f32 %v5134_v35, %v2877_v42  ;;  %v2813_v61 = vpop.f32.mrf.mxu3  ;;  %v4892_v13 = vmax.f32 %v5136_v27, %v2879_v18  ;;  %v5142_v42 = vld [vmem:[#allocation24_spill] sm:$0xff] }
 0x4c5   :  { %v2749_v36 = vadd.f32 %v2748_v53, %v2684_v59  ;;  %3331 = vmatmul.f32.gmra.mxu3 %v4880_v17  ;;  %5140 = vst [vmem:[#allocation33_spill] sm:$0xff] %v4892_v13  ;;  %3207 = vmatmul.f32.gmra.mxu1 %v4889_v34  ;;  %v5141_v59 = vld [vmem:[#allocation19_spill] sm:$0xff]  ;;  %v2882_v53 = vmul.f32 0.01, %v5142_v42 }
 0x4c6   :  { %3272 = vmatmul.f32.gmra.mxu2 %v4892_v13  ;;  %v2881_v35 = vmul.f32 0.01, %v5141_v59 }
 0x4c7   :  { %v2814_v56 = vadd.f32 %v2813_v61, %v2749_v36  ;;  %v4909_v13 = vmax.f32 %v5142_v42, %v2882_v53 }
 0x4c8   :  { %v2621_v23 = vpop.f32.mrf.mxu0  ;;  %v4906_v61 = vmax.f32 %v5141_v59, %v2881_v35  ;;  %v5148_v59 = vld [vmem:[#allocation25_spill] sm:$0xff] }
 0x4c9   :  { %v2622_v29 = vadd.f32 %v2621_v23, %v2557_v22  ;;  %v2876_v12 = vmul.f32 0.01, %v2814_v56  ;;  %v2751_v27 = vpop.f32.mrf.mxu2  ;;  %v5144_v23 = vld [vmem:[#allocation37_spill] sm:$0xff]  ;;  %5145 = vst [vmem:[#allocation34_spill] sm:$0xff] %v4909_v13  ;;  %v2886_v35 = vmul.f32 0.01, %v5148_v59 }
 0x4ca   :  { %v2560_v18 = vadd.f32 %v5144_v23, %v4622_v40 }
 0x4cb   :  { %3142 = vmatmul.f32.gmra.mxu0 %v4886_v21  ;;  %v2687_v49 = vadd.f32 %v2686_v57, %v2622_v29  ;;  %v4900_v2 = vmax.f32 %v2814_v56, %v2876_v12  ;;  %v2689_v36 = vpop.f32.mrf.mxu1  ;;  %v2816_v34 = vpop.f32.mrf.mxu3  ;;  %v4912_v57 = vmax.f32 %v5143_v11, %v2883_v30  ;;  %v5147_v12 = vld [vmem:[#allocation20_spill] sm:$0xff] }
 0x4cd   :  { %v2752_v9 = vadd.f32 %v2751_v27, %v2687_v49  ;;  %3334 = vmatmul.f32.gmra.mxu3 %v4900_v2  ;;  %5146 = vst [vmem:[#allocation18_spill] sm:$0xff] %v4912_v57  ;;  %3210 = vmatmul.f32.gmra.mxu1 %v4909_v13  ;;  %v2885_v49 = vmul.f32 0.01, %v5147_v12  ;;  %v5149_v27 = vld [vmem:[#allocation30_spill] sm:$0xff] }
 0x4ce   :  { %3275 = vmatmul.f32.gmra.mxu2 %v4912_v57  ;;  %v2887_v42 = vmul.f32 0.01, %v5149_v27  ;;  %v4929_v57 = vmax.f32 %v5148_v59, %v2886_v35 }
 0x4cf   :  { %v2817_v56 = vadd.f32 %v2816_v34, %v2752_v9  ;;  %v2563_v34 = vadd.f32 %v4638_v10, %v4630_v19 }
 0x4d0   :  { %v2624_v22 = vpop.f32.mrf.mxu0 }
 0x4d1   :  { %v2625_v29 = vadd.f32 %v2624_v22, %v2560_v18  ;;  %v2880_v40 = vmul.f32 0.01, %v2817_v56  ;;  %v2754_v11 = vpop.f32.mrf.mxu2  ;;  %v4926_v22 = vmax.f32 %v5147_v12, %v2885_v49 }
 0x4d3   :  { %3145 = vmatmul.f32.gmra.mxu0 %v4906_v61  ;;  %v2690_v53 = vadd.f32 %v2689_v36, %v2625_v29  ;;  %v4920_v23 = vmax.f32 %v2817_v56, %v2880_v40  ;;  %v2692_v9 = vpop.f32.mrf.mxu1  ;;  %v2819_v13 = vpop.f32.mrf.mxu3  ;;  %v4932_v36 = vmax.f32 %v5149_v27, %v2887_v42 }
 0x4d5   :  { %v2755_v30 = vadd.f32 %v2754_v11, %v2690_v53  ;;  %3337 = vmatmul.f32.gmra.mxu3 %v4920_v23  ;;  %3213 = vmatmul.f32.gmra.mxu1 %v4929_v57  ;;  %v5151_v11 = vld [vmem:[#allocation39_spill] sm:$0xff] }
 0x4d6   :  { %3278 = vmatmul.f32.gmra.mxu2 %v4932_v36 }
 0x4d7   :  { %v2820_v56 = vadd.f32 %v2819_v13, %v2755_v30  ;;  %v5150_v13 = vld [vmem:[#allocation38_spill] sm:$0xff] }
 0x4d8   :  { %v2627_v18 = vpop.f32.mrf.mxu0 }
 0x4d9   :  { %v2628_v29 = vadd.f32 %v2627_v18, %v2563_v34  ;;  %v2884_v19 = vmul.f32 0.01, %v2820_v56  ;;  %v2757_v12 = vpop.f32.mrf.mxu2  ;;  %v4943_v34 = vld [vmem:[#allocation10] sm:$0x3] }
 0x4db   :  { %3148 = vmatmul.f32.gmra.mxu0 %v4926_v22  ;;  %v2693_v10 = vadd.f32 %v2692_v9, %v2628_v29  ;;  %v4937_v40 = vmax.f32 %v2820_v56, %v2884_v19  ;;  %v3169_v35 = vpop.f32.mrf.mxu1  ;;  %v2822_v27 = vpop.f32.mrf.mxu3  ;;  %v4948_v9 = vperm.slane %v4943_v34, 0  ;;  %v5152_v19 = vld [vmem:[#allocation40_spill] sm:$0xff] }
 0x4dd   :  { %v2758_v49 = vadd.f32 %v2757_v12, %v2693_v10  ;;  %3340 = vmatmul.f32.gmra.mxu3 %v4937_v40  ;;  %3428 = vmatmul.f32.vlgmr.msrb.gmra.mxu1 %v5150_v13 }
 0x4de   :  { %3493 = vmatmul.f32.vlgmr.msrb.gmra.mxu2 %v5151_v11 }
 0x4df   :  { %v2823_v42 = vadd.f32 %v2822_v27, %v2758_v49 }
 0x4e0   :  { %v3104_v59 = vpop.f32.mrf.mxu0 }
 0x4e1   :  { %v2888_v53 = vmul.f32 0.01, %v2823_v42  ;;  %v3234_v18 = vpop.f32.mrf.mxu2 }
 0x4e3   :  { %3363 = vmatmul.f32.vlgmr.msrb.gmra.mxu0 %v4633_v24  ;;  %v4945_v30 = vmax.f32 %v2823_v42, %v2888_v53  ;;  %v3172_v56 = vpop.f32.mrf.mxu1  ;;  %v3105_v24 = vadd.f32 %v3104_v59, %v4948_v9 }
 0x4e5   :  { %3343 = vmatmul.f32.gmra.mxu3 %v4945_v30  ;;  %3431 = vmatmul.f32.gmra.mxu1 %v4654_v16  ;;  %v3170_v12 = vadd.f32 %v3169_v35, %v3105_v24 }
 0x4e6   :  { %3496 = vmatmul.f32.gmra.mxu2 %v5152_v19 }
 0x4e7   :  { %v3235_v42 = vadd.f32 %v3234_v18, %v3170_v12 }
 0x4e8   :  { %v3107_v29 = vpop.f32.mrf.mxu0 }
 0x4e9   :  { %v3237_v10 = vpop.f32.mrf.mxu2 }
 0x4eb   :  { %3366 = vmatmul.f32.gmra.mxu0 %v4651_v46  ;;  %v3175_v27 = vpop.f32.mrf.mxu1  ;;  %v3108_v46 = vadd.f32 %v3107_v29, %v4948_v9 }
 0x4ed   :  { %3558 = vmatmul.f32.vlgmr.msrb.gmra.mxu3 %v4666_v6  ;;  %3434 = vmatmul.f32.gmra.mxu1 %v4673_v54  ;;  %v3173_v59 = vadd.f32 %v3172_v56, %v3108_v46 }
 0x4ee   :  { %3499 = vmatmul.f32.gmra.mxu2 %v4676_v32 }
 0x4ef   :  { %v3238_v11 = vadd.f32 %v3237_v10, %v3173_v59 }
 0x4f0   :  { %v3110_v49 = vpop.f32.mrf.mxu0  ;;  %v3299_v13 = vpop.f32.mrf.mxu3 }
 0x4f1   :  { %v3300_v53 = vadd.f32 %v3299_v13, %v3235_v42  ;;  %v3240_v16 = vpop.f32.mrf.mxu2  ;;  %v3111_v54 = vadd.f32 %v3110_v49, %v4948_v9 }
 0x4f3   :  { %3369 = vmatmul.f32.gmra.mxu0 %v4670_v1  ;;  %3607 = vst [vmem:[#allocation11] sm:$0xff] %v3300_v53  ;;  %v3178_v6 = vpop.f32.mrf.mxu1  ;;  %v3176_v18 = vadd.f32 %v3175_v27, %v3111_v54 }
 0x4f5   :  { %3561 = vmatmul.f32.gmra.mxu3 %v4685_v20  ;;  %3437 = vmatmul.f32.gmra.mxu1 %v4692_v28  ;;  %v3241_v56 = vadd.f32 %v3240_v16, %v3176_v18 }
 0x4f6   :  { %3502 = vmatmul.f32.gmra.mxu2 %v4695_v58 }
 0x4f8   :  { %v3113_v35 = vpop.f32.mrf.mxu0  ;;  %v3302_v24 = vpop.f32.mrf.mxu3 }
 0x4f9   :  { %v3303_v1 = vadd.f32 %v3302_v24, %v3238_v11  ;;  %v3243_v32 = vpop.f32.mrf.mxu2 }
 0x4fb   :  { %3372 = vmatmul.f32.gmra.mxu0 %v4689_v47  ;;  %3609 = vst [vmem:[#allocation11 + $0x10] sm:$0xff] %v3303_v1  ;;  %v3181_v20 = vpop.f32.mrf.mxu1  ;;  %v3114_v47 = vadd.f32 %v3113_v35, %v4948_v9 }
 0x4fd   :  { %3564 = vmatmul.f32.gmra.mxu3 %v4704_v41  ;;  %3440 = vmatmul.f32.gmra.mxu1 %v4711_v25  ;;  %v3179_v10 = vadd.f32 %v3178_v6, %v3114_v47 }
 0x4fe   :  { %3505 = vmatmul.f32.gmra.mxu2 %v4714_v52 }
 0x4ff   :  { %v3244_v49 = vadd.f32 %v3243_v32, %v3179_v10  ;;  %v5154_v10 = vld [vmem:[#allocation42_spill] sm:$0xff] }
 0x500   :  { %v3116_v29 = vpop.f32.mrf.mxu0  ;;  %v3305_v19 = vpop.f32.mrf.mxu3 }
 0x501   :  { %v3306_v28 = vadd.f32 %v3305_v19, %v3241_v56  ;;  %v3246_v58 = vpop.f32.mrf.mxu2 }
 0x503   :  { %3375 = vmatmul.f32.gmra.mxu0 %v4708_v50  ;;  %3611 = vst [vmem:[#allocation11 + $0x20] sm:$0xff] %v3306_v28  ;;  %v3184_v41 = vpop.f32.mrf.mxu1  ;;  %v3117_v50 = vadd.f32 %v3116_v29, %v4948_v9 }
 0x505   :  { %3567 = vmatmul.f32.gmra.mxu3 %v4723_v4  ;;  %3443 = vmatmul.f32.gmra.mxu1 %v4730_v43  ;;  %v3182_v42 = vadd.f32 %v3181_v20, %v3117_v50 }
 0x506   :  { %3508 = vmatmul.f32.gmra.mxu2 %v4733_v37 }
 0x507   :  { %v3247_v46 = vadd.f32 %v3246_v58, %v3182_v42  ;;  %v5153_v58 = vld [vmem:[#allocation41_spill] sm:$0xff] }
 0x508   :  { %v3119_v12 = vpop.f32.mrf.mxu0  ;;  %v3308_v27 = vpop.f32.mrf.mxu3 }
 0x509   :  { %v3309_v25 = vadd.f32 %v3308_v27, %v3244_v49  ;;  %v3249_v52 = vpop.f32.mrf.mxu2 }
 0x50b   :  { %3378 = vmatmul.f32.gmra.mxu0 %v4727_v44  ;;  %3613 = vst [vmem:[#allocation11 + $0x30] sm:$0xff] %v3309_v25  ;;  %v3187_v4 = vpop.f32.mrf.mxu1  ;;  %v3120_v44 = vadd.f32 %v3119_v12, %v4948_v9  ;;  %v5156_v25 = vld [vmem:[#allocation21_spill] sm:$0xff] }
 0x50d   :  { %3570 = vmatmul.f32.gmra.mxu3 %v4742_v3  ;;  %3446 = vmatmul.f32.gmra.mxu1 %v4749_v48  ;;  %v3185_v16 = vadd.f32 %v3184_v41, %v3120_v44  ;;  %v5155_v41 = vld [vmem:[#allocation16_spill] sm:$0xff] }
 0x50e   :  { %3511 = vmatmul.f32.gmra.mxu2 %v4752_v39 }
 0x50f   :  { %v3250_v35 = vadd.f32 %v3249_v52, %v3185_v16  ;;  %v5157_v52 = vld [vmem:[#allocation26_spill] sm:$0xff]  ;;  %v5159_v16 = vld [vmem:[#allocation32_spill] sm:$0xff] }
 0x510   :  { %v3122_v13 = vpop.f32.mrf.mxu0  ;;  %v3311_v53 = vpop.f32.mrf.mxu3 }
 0x511   :  { %v3312_v43 = vadd.f32 %v3311_v53, %v3247_v46  ;;  %v3252_v37 = vpop.f32.mrf.mxu2 }
 0x513   :  { %3381 = vmatmul.f32.gmra.mxu0 %v4746_v45  ;;  %3615 = vst [vmem:[#allocation11 + $0x40] sm:$0xff] %v3312_v43  ;;  %v3190_v3 = vpop.f32.mrf.mxu1  ;;  %v3123_v45 = vadd.f32 %v3122_v13, %v4948_v9  ;;  %v5158_v13 = vld [vmem:[#allocation31_spill] sm:$0xff] }
 0x515   :  { %3573 = vmatmul.f32.gmra.mxu3 %v4761_v63  ;;  %3449 = vmatmul.f32.gmra.mxu1 %v4768_v5  ;;  %v3188_v11 = vadd.f32 %v3187_v4, %v3123_v45 }
 0x516   :  { %3514 = vmatmul.f32.gmra.mxu2 %v4771_v31 }
 0x517   :  { %v3253_v54 = vadd.f32 %v3252_v37, %v3188_v11 }
 0x518   :  { %v3125_v59 = vpop.f32.mrf.mxu0  ;;  %v3314_v6 = vpop.f32.mrf.mxu3 }
 0x519   :  { %v3315_v48 = vadd.f32 %v3314_v6, %v3250_v35  ;;  %v3255_v39 = vpop.f32.mrf.mxu2  ;;  %v5161_v6 = vld [vmem:[#allocation22_spill] sm:$0xff] }
 0x51b   :  { %3384 = vmatmul.f32.gmra.mxu0 %v4765_v15  ;;  %3617 = vst [vmem:[#allocation11 + $0x50] sm:$0xff] %v3315_v48  ;;  %v3193_v63 = vpop.f32.mrf.mxu1  ;;  %v3126_v15 = vadd.f32 %v3125_v59, %v4948_v9  ;;  %v5160_v59 = vld [vmem:[#allocation17_spill] sm:$0xff] }
 0x51d   :  { %3576 = vmatmul.f32.gmra.mxu3 %v4780_v60  ;;  %3452 = vmatmul.f32.gmra.mxu1 %v4789_v14  ;;  %v3191_v32 = vadd.f32 %v3190_v3, %v3126_v15  ;;  %v5163_v15 = vld [vmem:[#allocation33_spill] sm:$0xff] }
 0x51e   :  { %3517 = vmatmul.f32.gmra.mxu2 %v4792_v38 }
 0x51f   :  { %v3256_v29 = vadd.f32 %v3255_v39, %v3191_v32 }
 0x520   :  { %v3128_v24 = vpop.f32.mrf.mxu0  ;;  %v3317_v1 = vpop.f32.mrf.mxu3 }
 0x521   :  { %v3318_v5 = vadd.f32 %v3317_v1, %v3253_v54  ;;  %v3258_v31 = vpop.f32.mrf.mxu2 }
 0x523   :  { %3387 = vmatmul.f32.gmra.mxu0 %v4786_v26  ;;  %3619 = vst [vmem:[#allocation11 + $0x60] sm:$0xff] %v3318_v5  ;;  %v3196_v60 = vpop.f32.mrf.mxu1  ;;  %v3129_v26 = vadd.f32 %v3128_v24, %v4948_v9 }
 0x525   :  { %3579 = vmatmul.f32.gmra.mxu3 %v4800_v51  ;;  %3455 = vmatmul.f32.gmra.mxu1 %v4809_v62  ;;  %v3194_v56 = vadd.f32 %v3193_v63, %v3129_v26  ;;  %v5162_v63 = vld [vmem:[#allocation27_spill] sm:$0xff]  ;;  %v5165_v26 = vld [vmem:[#allocation18_spill] sm:$0xff] }
 0x526   :  { %3520 = vmatmul.f32.gmra.mxu2 %v4812_v8 }
 0x527   :  { %v3259_v47 = vadd.f32 %v3258_v31, %v3194_v56 }
 0x528   :  { %v3131_v18 = vpop.f32.mrf.mxu0  ;;  %v3320_v20 = vpop.f32.mrf.mxu3 }
 0x529   :  { %v3321_v14 = vadd.f32 %v3320_v20, %v3256_v29  ;;  %v3261_v38 = vpop.f32.mrf.mxu2  ;;  %v5164_v29 = vld [vmem:[#allocation34_spill] sm:$0xff] }
 0x52b   :  { %3390 = vmatmul.f32.gmra.mxu0 %v4806_v55  ;;  %3621 = vst [vmem:[#allocation11 + $0x70] sm:$0xff] %v3321_v14  ;;  %v3199_v51 = vpop.f32.mrf.mxu1  ;;  %v3132_v55 = vadd.f32 %v3131_v18, %v4948_v9 }
 0x52d   :  { %3582 = vmatmul.f32.gmra.mxu3 %v4820_v33  ;;  %3458 = vmatmul.f32.gmra.mxu1 %v5153_v58  ;;  %v3197_v12 = vadd.f32 %v3196_v60, %v3132_v55 }
 0x52e   :  { %3523 = vmatmul.f32.gmra.mxu2 %v5154_v10 }
 0x52f   :  { %v3262_v27 = vadd.f32 %v3261_v38, %v3197_v12 }
 0x530   :  { %v3134_v19 = vpop.f32.mrf.mxu0  ;;  %v3323_v28 = vpop.f32.mrf.mxu3 }
 0x531   :  { %v3324_v62 = vadd.f32 %v3323_v28, %v3259_v47  ;;  %v3264_v8 = vpop.f32.mrf.mxu2 }
 0x533   :  { %3393 = vmatmul.f32.gmra.mxu0 %v4826_v0  ;;  %3623 = vst [vmem:[#allocation11 + $0x80] sm:$0xff] %v3324_v62  ;;  %v3202_v33 = vpop.f32.mrf.mxu1  ;;  %v3135_v0 = vadd.f32 %v3134_v19, %v4948_v9 }
 0x535   :  { %3585 = vmatmul.f32.gmra.mxu3 %v5155_v41  ;;  %3461 = vmatmul.f32.gmra.mxu1 %v5157_v52  ;;  %v3200_v46 = vadd.f32 %v3199_v51, %v3135_v0  ;;  %v5028_v41 = vperm.slane %v4943_v34, 1 }
 0x536   :  { %3526 = vmatmul.f32.gmra.mxu2 %v5158_v13 }
 0x537   :  { %v3265_v43 = vadd.f32 %v3264_v8, %v3200_v46 }
 0x538   :  { %v3137_v49 = vpop.f32.mrf.mxu0  ;;  %v3326_v50 = vpop.f32.mrf.mxu3 }
 0x539   :  { %v3327_v42 = vadd.f32 %v3326_v50, %v3262_v27  ;;  %v3267_v4 = vpop.f32.mrf.mxu2  ;;  %v3138_v3 = vadd.f32 %v3137_v49, %v4948_v9 }
 0x53b   :  { %3396 = vmatmul.f32.gmra.mxu0 %v5156_v25  ;;  %3625 = vst [vmem:[#allocation11 + $0x90] sm:$0xff] %v3327_v42  ;;  %v3205_v44 = vpop.f32.mrf.mxu1  ;;  %v3203_v48 = vadd.f32 %v3202_v33, %v3138_v3 }
 0x53d   :  { %3588 = vmatmul.f32.gmra.mxu3 %v4860_v7  ;;  %3464 = vmatmul.f32.gmra.mxu1 %v5160_v59  ;;  %v3268_v11 = vadd.f32 %v3267_v4, %v3203_v48 }
 0x53e   :  { %3529 = vmatmul.f32.gmra.mxu2 %v5161_v6 }
 0x540   :  { %v3140_v53 = vpop.f32.mrf.mxu0  ;;  %v3329_v37 = vpop.f32.mrf.mxu3 }
 0x541   :  { %v3330_v35 = vadd.f32 %v3329_v37, %v3265_v43  ;;  %v3270_v45 = vpop.f32.mrf.mxu2  ;;  %v3141_v54 = vadd.f32 %v3140_v53, %v4948_v9 }
 0x543   :  { %3399 = vmatmul.f32.gmra.mxu0 %v5159_v16  ;;  %3627 = vst [vmem:[#allocation11 + $0xa0] sm:$0xff] %v3330_v35  ;;  %v3208_v7 = vpop.f32.mrf.mxu1  ;;  %v3206_v31 = vadd.f32 %v3205_v44, %v3141_v54 }
 0x545   :  { %3591 = vmatmul.f32.gmra.mxu3 %v4880_v17  ;;  %3467 = vmatmul.f32.gmra.mxu1 %v5162_v63  ;;  %v3271_v18 = vadd.f32 %v3270_v45, %v3206_v31 }
 0x546   :  { %3532 = vmatmul.f32.gmra.mxu2 %v5163_v15 }
 0x548   :  { %v3143_v39 = vpop.f32.mrf.mxu0  ;;  %v3332_v24 = vpop.f32.mrf.mxu3 }
 0x549   :  { %v3333_v1 = vadd.f32 %v3332_v24, %v3268_v11  ;;  %v3273_v5 = vpop.f32.mrf.mxu2 }
 0x54b   :  { %3402 = vmatmul.f32.gmra.mxu0 %v4886_v21  ;;  %3629 = vst [vmem:[#allocation11 + $0xb0] sm:$0xff] %v3333_v1  ;;  %v3211_v17 = vpop.f32.mrf.mxu1  ;;  %v3144_v21 = vadd.f32 %v3143_v39, %v4948_v9 }
 0x54d   :  { %3594 = vmatmul.f32.gmra.mxu3 %v4900_v2  ;;  %3470 = vmatmul.f32.gmra.mxu1 %v5164_v29  ;;  %v3209_v38 = vadd.f32 %v3208_v7, %v3144_v21 }
 0x54e   :  { %3535 = vmatmul.f32.gmra.mxu2 %v5165_v26 }
 0x54f   :  { %v3274_v19 = vadd.f32 %v3273_v5, %v3209_v38 }
 0x550   :  { %v3146_v32 = vpop.f32.mrf.mxu0  ;;  %v3335_v60 = vpop.f32.mrf.mxu3 }
 0x551   :  { %v3336_v20 = vadd.f32 %v3335_v60, %v3271_v18  ;;  %v3276_v14 = vpop.f32.mrf.mxu2 }
 0x553   :  { %3405 = vmatmul.f32.gmra.mxu0 %v4906_v61  ;;  %3631 = vst [vmem:[#allocation11 + $0xc0] sm:$0xff] %v3336_v20  ;;  %v3214_v2 = vpop.f32.mrf.mxu1  ;;  %v3147_v61 = vadd.f32 %v3146_v32, %v4948_v9 }
 0x555   :  { %3597 = vmatmul.f32.gmra.mxu3 %v4920_v23  ;;  %3473 = vmatmul.f32.gmra.mxu1 %v4929_v57  ;;  %v3212_v58 = vadd.f32 %v3211_v17, %v3147_v61 }
 0x556   :  { %3538 = vmatmul.f32.gmra.mxu2 %v4932_v36 }
 0x557   :  { %v3277_v62 = vadd.f32 %v3276_v14, %v3212_v58 }
 0x558   :  { %v3149_v56 = vpop.f32.mrf.mxu0  ;;  %v3338_v51 = vpop.f32.mrf.mxu3 }
 0x559   :  { %v3339_v47 = vadd.f32 %v3338_v51, %v3274_v19  ;;  %v3279_v28 = vpop.f32.mrf.mxu2  ;;  %v3150_v8 = vadd.f32 %v3149_v56, %v4948_v9 }
 0x55b   :  { %3408 = vmatmul.f32.gmra.mxu0 %v4926_v22  ;;  %3633 = vst [vmem:[#allocation11 + $0xd0] sm:$0xff] %v3339_v47  ;;  %v3429_v23 = vpop.f32.mrf.mxu1  ;;  %v3215_v57 = vadd.f32 %v3214_v2, %v3150_v8 }
 0x55d   :  { %3600 = vmatmul.f32.gmra.mxu3 %v4937_v40  ;;  %v3280_v33 = vadd.f32 %v3279_v28, %v3215_v57 }
 0x560   :  { %v3364_v55 = vpop.f32.mrf.mxu0  ;;  %v3341_v10 = vpop.f32.mrf.mxu3 }
 0x561   :  { %v3342_v12 = vadd.f32 %v3341_v10, %v3277_v62  ;;  %v3494_v22 = vpop.f32.mrf.mxu2  ;;  %v3365_v40 = vadd.f32 %v3364_v55, %v5028_v41 }
 0x563   :  { %3635 = vst [vmem:[#allocation11 + $0xe0] sm:$0xff] %v3342_v12  ;;  %v3432_v49 = vpop.f32.mrf.mxu1  ;;  %v3430_v52 = vadd.f32 %v3429_v23, %v3365_v40 }
 0x565   :  { %3603 = vmatmul.f32.gmra.mxu3 %v4945_v30  ;;  %v3495_v42 = vadd.f32 %v3494_v22, %v3430_v52 }
 0x568   :  { %v3367_v36 = vpop.f32.mrf.mxu0  ;;  %v3344_v27 = vpop.f32.mrf.mxu3 }
 0x569   :  { %v3345_v50 = vadd.f32 %v3344_v27, %v3280_v33  ;;  %v3497_v25 = vpop.f32.mrf.mxu2  ;;  %v3368_v4 = vadd.f32 %v3367_v36, %v5028_v41 }
 0x56b   :  { %3637 = vst [vmem:[#allocation11 + $0xf0] sm:$0xff] %v3345_v50  ;;  %v3435_v0 = vpop.f32.mrf.mxu1  ;;  %v3433_v30 = vadd.f32 %v3432_v49, %v3368_v4 }
 0x56d   :  { %v3498_v43 = vadd.f32 %v3497_v25, %v3433_v30 }
 0x570   :  { %v3370_v9 = vpop.f32.mrf.mxu0  ;;  %v3559_v13 = vpop.f32.mrf.mxu3 }
 0x571   :  { %v3560_v34 = vadd.f32 %v3559_v13, %v3495_v42  ;;  %v3500_v46 = vpop.f32.mrf.mxu2  ;;  %v3371_v16 = vadd.f32 %v3370_v9, %v5028_v41 }
 0x573   :  { %3608 = vst [vmem:[#allocation11 + $0x8] sm:$0xff] %v3560_v34  ;;  %v3438_v44 = vpop.f32.mrf.mxu1  ;;  %v3436_v35 = vadd.f32 %v3435_v0, %v3371_v16 }
 0x575   :  { %v3501_v48 = vadd.f32 %v3500_v46, %v3436_v35 }
 0x578   :  { %v3373_v53 = vpop.f32.mrf.mxu0  ;;  %v3562_v37 = vpop.f32.mrf.mxu3 }
 0x579   :  { %v3563_v59 = vadd.f32 %v3562_v37, %v3498_v43  ;;  %v3503_v3 = vpop.f32.mrf.mxu2  ;;  %v3374_v7 = vadd.f32 %v3373_v53, %v5028_v41 }
 0x57b   :  { %3610 = vst [vmem:[#allocation11 + $0x18] sm:$0xff] %v3563_v59  ;;  %v3441_v45 = vpop.f32.mrf.mxu1  ;;  %v3439_v63 = vadd.f32 %v3438_v44, %v3374_v7 }
 0x57d   :  { %v3504_v15 = vadd.f32 %v3503_v3, %v3439_v63 }
 0x580   :  { %v3376_v6 = vpop.f32.mrf.mxu0  ;;  %v3565_v39 = vpop.f32.mrf.mxu3 }
 0x581   :  { %v3566_v11 = vadd.f32 %v3565_v39, %v3501_v48  ;;  %v3506_v24 = vpop.f32.mrf.mxu2  ;;  %v3377_v31 = vadd.f32 %v3376_v6, %v5028_v41 }
 0x583   :  { %3612 = vst [vmem:[#allocation11 + $0x28] sm:$0xff] %v3566_v11  ;;  %v3444_v1 = vpop.f32.mrf.mxu1  ;;  %v3442_v18 = vadd.f32 %v3441_v45, %v3377_v31 }
 0x585   :  { %v3507_v21 = vadd.f32 %v3506_v24, %v3442_v18 }
 0x588   :  { %v3379_v54 = vpop.f32.mrf.mxu0  ;;  %v3568_v5 = vpop.f32.mrf.mxu3 }
 0x589   :  { %v3569_v32 = vadd.f32 %v3568_v5, %v3504_v15  ;;  %v3509_v17 = vpop.f32.mrf.mxu2  ;;  %v3380_v26 = vadd.f32 %v3379_v54, %v5028_v41 }
 0x58b   :  { %3614 = vst [vmem:[#allocation11 + $0x38] sm:$0xff] %v3569_v32  ;;  %v3447_v29 = vpop.f32.mrf.mxu1  ;;  %v3445_v56 = vadd.f32 %v3444_v1, %v3380_v26 }
 0x58d   :  { %v3510_v51 = vadd.f32 %v3509_v17, %v3445_v56 }
 0x590   :  { %v3382_v60 = vpop.f32.mrf.mxu0  ;;  %v3571_v20 = vpop.f32.mrf.mxu3 }
 0x591   :  { %v3572_v14 = vadd.f32 %v3571_v20, %v3507_v21  ;;  %v3512_v38 = vpop.f32.mrf.mxu2  ;;  %v3383_v47 = vadd.f32 %v3382_v60, %v5028_v41 }
 0x593   :  { %3616 = vst [vmem:[#allocation11 + $0x48] sm:$0xff] %v3572_v14  ;;  %v3450_v19 = vpop.f32.mrf.mxu1  ;;  %v3448_v55 = vadd.f32 %v3447_v29, %v3383_v47 }
 0x595   :  { %v3513_v10 = vadd.f32 %v3512_v38, %v3448_v55 }
 0x598   :  { %v3385_v2 = vpop.f32.mrf.mxu0  ;;  %v3574_v61 = vpop.f32.mrf.mxu3 }
 0x599   :  { %v3575_v28 = vadd.f32 %v3574_v61, %v3510_v51  ;;  %v3515_v58 = vpop.f32.mrf.mxu2  ;;  %v3386_v12 = vadd.f32 %v3385_v2, %v5028_v41 }
 0x59b   :  { %3618 = vst [vmem:[#allocation11 + $0x58] sm:$0xff] %v3575_v28  ;;  %v3453_v62 = vpop.f32.mrf.mxu1  ;;  %v3451_v36 = vadd.f32 %v3450_v19, %v3386_v12 }
 0x59d   :  { %v3516_v33 = vadd.f32 %v3515_v58, %v3451_v36 }
 0x5a0   :  { %v3388_v23 = vpop.f32.mrf.mxu0  ;;  %v3577_v8 = vpop.f32.mrf.mxu3 }
 0x5a1   :  { %v3578_v22 = vadd.f32 %v3577_v8, %v3513_v10  ;;  %v3518_v57 = vpop.f32.mrf.mxu2  ;;  %v3389_v50 = vadd.f32 %v3388_v23, %v5028_v41 }
 0x5a3   :  { %3620 = vst [vmem:[#allocation11 + $0x68] sm:$0xff] %v3578_v22  ;;  %v3456_v27 = vpop.f32.mrf.mxu1  ;;  %v3454_v9 = vadd.f32 %v3453_v62, %v3389_v50 }
 0x5a5   :  { %v3519_v42 = vadd.f32 %v3518_v57, %v3454_v9 }
 0x5a8   :  { %v3391_v49 = vpop.f32.mrf.mxu0  ;;  %v3580_v40 = vpop.f32.mrf.mxu3 }
 0x5a9   :  { %v3581_v25 = vadd.f32 %v3580_v40, %v3516_v33  ;;  %v3521_v52 = vpop.f32.mrf.mxu2  ;;  %v3392_v4 = vadd.f32 %v3391_v49, %v5028_v41 }
 0x5ab   :  { %3622 = vst [vmem:[#allocation11 + $0x78] sm:$0xff] %v3581_v25  ;;  %v3459_v34 = vpop.f32.mrf.mxu1  ;;  %v3457_v53 = vadd.f32 %v3456_v27, %v3392_v4 }
 0x5ad   :  { %v3522_v43 = vadd.f32 %v3521_v52, %v3457_v53 }
 0x5b0   :  { %v3394_v0 = vpop.f32.mrf.mxu0  ;;  %v3583_v13 = vpop.f32.mrf.mxu3 }
 0x5b1   :  { %v3584_v46 = vadd.f32 %v3583_v13, %v3519_v42  ;;  %v3524_v30 = vpop.f32.mrf.mxu2  ;;  %v3395_v16 = vadd.f32 %v3394_v0, %v5028_v41 }
 0x5b3   :  { %3624 = vst [vmem:[#allocation11 + $0x88] sm:$0xff] %v3584_v46  ;;  %v3462_v3 = vpop.f32.mrf.mxu1  ;;  %v3460_v6 = vadd.f32 %v3459_v34, %v3395_v16 }
 0x5b5   :  { %v3525_v45 = vadd.f32 %v3524_v30, %v3460_v6 }
 0x5b8   :  { %v3397_v44 = vpop.f32.mrf.mxu0  ;;  %v3586_v37 = vpop.f32.mrf.mxu3 }
 0x5b9   :  { %v3587_v59 = vadd.f32 %v3586_v37, %v3522_v43  ;;  %v3527_v35 = vpop.f32.mrf.mxu2  ;;  %v3398_v7 = vadd.f32 %v3397_v44, %v5028_v41 }
 0x5bb   :  { %3626 = vst [vmem:[#allocation11 + $0x98] sm:$0xff] %v3587_v59  ;;  %v3463_v24 = vadd.f32 %v3462_v3, %v3398_v7  ;;  %v3465_v63 = vpop.f32.mrf.mxu1 }
 0x5bd   :  { %v3528_v1 = vadd.f32 %v3527_v35, %v3463_v24 }
 0x5c0   :  { %v3400_v48 = vpop.f32.mrf.mxu0  ;;  %v3589_v39 = vpop.f32.mrf.mxu3 }
 0x5c1   :  { %v3590_v11 = vadd.f32 %v3589_v39, %v3525_v45  ;;  %v3530_v54 = vpop.f32.mrf.mxu2  ;;  %v3401_v5 = vadd.f32 %v3400_v48, %v5028_v41 }
 0x5c3   :  { %3628 = vst [vmem:[#allocation11 + $0xa8] sm:$0xff] %v3590_v11  ;;  %v3466_v17 = vadd.f32 %v3465_v63, %v3401_v5  ;;  %v3468_v60 = vpop.f32.mrf.mxu1 }
 0x5c5   :  { %v3531_v18 = vadd.f32 %v3530_v54, %v3466_v17 }
 0x5c8   :  { %v3592_v15 = vpop.f32.mrf.mxu3  ;;  %v3403_v32 = vpop.f32.mrf.mxu0 }
 0x5c9   :  { %v3593_v31 = vadd.f32 %v3592_v15, %v3528_v1  ;;  %v3533_v29 = vpop.f32.mrf.mxu2  ;;  %v3404_v20 = vadd.f32 %v3403_v32, %v5028_v41 }
 0x5cb   :  { %3630 = vst [vmem:[#allocation11 + $0xb8] sm:$0xff] %v3593_v31  ;;  %v3469_v38 = vadd.f32 %v3468_v60, %v3404_v20  ;;  %v3471_v61 = vpop.f32.mrf.mxu1 }
 0x5cd   :  { %v3534_v56 = vadd.f32 %v3533_v29, %v3469_v38 }
 0x5d0   :  { %v3595_v21 = vpop.f32.mrf.mxu3  ;;  %v3406_v14 = vpop.f32.mrf.mxu0 }
 0x5d1   :  { %v3596_v26 = vadd.f32 %v3595_v21, %v3531_v18  ;;  %v3407_v19 = vadd.f32 %v3406_v14, %v5028_v41  ;;  %v3536_v47 = vpop.f32.mrf.mxu2 }
 0x5d3   :  { %3632 = vst [vmem:[#allocation11 + $0xc8] sm:$0xff] %v3596_v26  ;;  %v3472_v28 = vadd.f32 %v3471_v61, %v3407_v19  ;;  %v3474_v8 = vpop.f32.mrf.mxu1 }
 0x5d5   :  { %v3537_v55 = vadd.f32 %v3536_v47, %v3472_v28 }
 0x5d8   :  { %v3598_v2 = vpop.f32.mrf.mxu3  ;;  %v3409_v58 = vpop.f32.mrf.mxu0 }
 0x5d9   :  { %v3599_v51 = vadd.f32 %v3598_v2, %v3534_v56  ;;  %v3410_v62 = vadd.f32 %v3409_v58, %v5028_v41  ;;  %v3539_v12 = vpop.f32.mrf.mxu2 }
 0x5db   :  { %3634 = vst [vmem:[#allocation11 + $0xd8] sm:$0xff] %v3599_v51  ;;  %v3475_v22 = vadd.f32 %v3474_v8, %v3410_v62 }
 0x5dd   :  { %v3540_v57 = vadd.f32 %v3539_v12, %v3475_v22 }
 0x5e0   :  { %v3601_v23 = vpop.f32.mrf.mxu3 }
 0x5e1   :  { %v3602_v10 = vadd.f32 %v3601_v23, %v3537_v55 }
 0x5e3   :  { %3636 = vst [vmem:[#allocation11 + $0xe8] sm:$0xff] %v3602_v10 }
 0x5e8   :  { %v3604_v36 = vpop.f32.mrf.mxu3 }
 0x5e9   :  { %v3605_v49 = vadd.f32 %v3604_v36, %v3540_v57 }
 0x5eb   :  { %3638 = vst [vmem:[#allocation11 + $0xf8] sm:$0xff] %v3605_v49 }
 0x5ec   :  { %3642 = vsyncadd [#allocation4], 3584  ;;  %s3645_s21 = sshll.u32 %s5058_s5, 4  ;;  %s4222_s22 = smov [#allocation11]   ;;  %s3646_s21 = int_to_ptr.hbm [resolvable:$true] %s3645_s21 }
 0x5ed   :  { %s3643_s23 = sshll.u32 %s4222_s22, 4  ;;  %s3644_s23 = int_to_ptr.vmem [resolvable:$true] %s3643_s23 }
 0x5ee   :  { %3651 = dma.vmem_to_hbm [thread:$0]  %s3644_s23, 512, %s3646_s21, [#allocation4], %s4215_s30, %s4215_s30, %s4216_s6  }
 0x5ef   :  { %4209 = dma.done.wait [#allocation4], 4096  }
 0x5f0   :  { %4210 = vsyncadd [#allocation4], 4294963200 }
 0x5f1   :  { %3656 = vsyncpa [#allocation3], 1 }
 0x5f2   :  { %3657 = vsyncpa [#allocation6], 1 }
 0x5f3   :  { %3658 = vsyncpa [#allocation9], 1 }
 0x5f4   :  { %3659 = vsyncpa [#allocation4], 1 }

</bundles_post_ra>
